<compile_context>
chip_gen: v6e
topology: v6e:2x2x1
jax: 0.10.0
libtpu: 0.0.40
codegen_flags: <defaults>
</compile_context>

<pallas_src>
import functools

import numpy as np
import jax
import jax.numpy as jnp
from jax import lax
from jax.experimental import pallas as pl
from jax.experimental.pallas import tpu as pltpu


def _conv_same_taps(a, w_ref, masks, *, W, K):
    """'SAME' KxK conv on a lane-packed activation via K*K accumulating MXU matmuls.

    a:      (Cin, H*W) f32, already ReLU'd.  Pixel (h, w) lives in lane h*W + w.
    w_ref:  (K*K, Cout, Cin) bf16 VMEM ref, tap order (dy, dx).
    masks:  (K*K, H*W) f32, 1.0 where the tap's source pixel is inside the image,
            0.0 in the zero-padding halo (also kills the pltpu.roll wraparound).
    Returns (Cout, H*W) f32.
    """
    HW = a.shape[-1]
    pad = K // 2
    acc = None
    for dy in range(K):
        for dx in range(K):
            t = dy * K + dx
            off = (dy - pad) * W + (dx - pad)   # flat source index = dest index + off
            if off == 0:
                tap = a                          # centre tap: no shift, no mask
            else:
                # pltpu.roll == jnp.roll semantics: rolled[p] = a[(p + off) % HW];
                # out-of-image / wrapped positions are zeroed by the tap mask.
                tap = pltpu.roll(a, (-off) % HW, axis=1) * masks[t:t + 1, :]
            contrib = jnp.dot(w_ref[t], tap.astype(jnp.bfloat16),
                              preferred_element_type=jnp.float32)
            acc = contrib if acc is None else acc + contrib
    return acc


def _residual_unit_kernel(x_ref, h0_ref, w1_ref, w2_ref, mask_ref, o_ref, *, W, K):
    # Blocks: x/h0/o -> (b_tile, C, H*W); w1/w2 -> (K*K, C, C) bf16; masks -> (K*K, H*W).
    masks = mask_ref[...]
    b_tile = x_ref.shape[0]
    for b in range(b_tile):                      # static unroll over images in the block
        x = x_ref[b].astype(jnp.float32)         # (C, HW)
        h0 = h0_ref[b].astype(jnp.float32)       # (C, HW)
        a1 = jnp.maximum(x, 0.0)                                   # ReLU 1
        y1 = _conv_same_taps(a1, w1_ref, masks, W=W, K=K)          # Conv 1 (f32 acc)
        a2 = jnp.maximum(y1, 0.0)                                  # ReLU 2
        y2 = _conv_same_taps(a2, w2_ref, masks, W=W, K=K)          # Conv 2 (f32 acc)
        o_ref[b] = (h0 + y2).astype(o_ref.dtype)                   # residual add


def _pick_batch_tile(N, C, HW):
    """Images per grid step: widen work per step when C is small (grid-overhead bound),
    but keep at least two grid steps when N allows so v7x's two TCs both get work."""
    if C >= 64:
        bt = 1
    else:
        budget = 2 * 1024 * 1024                  # ~2 MB of activations per step
        per_image = 6 * C * HW * 4                # x, h0, out, two activations, slack
        bt = max(1, min(N, budget // max(per_image, 1)))
    while N % bt:
        bt -= 1
    while bt > 1 and N // bt < 2 <= N:
        bt -= 1
        while N % bt:
            bt -= 1
    return bt


def residual_unit_forward(h0, x, w1, w2):
    """ResidualUnit.forward(h0, x).  h0, x: (N, C, H, W); w1, w2: (C, C, K, K)."""
    N, C, H, W = x.shape
    K = w1.shape[-1]
    assert K % 2 == 1, "SAME-padding tap masks assume an odd kernel size"
    assert h0.shape == x.shape
    assert w1.shape == (C, C, K, K) and w2.shape == (C, C, K, K)
    HW, KK = H * W, K * K

    b_tile = _pick_batch_tile(N, C, HW)
    n_steps = N // b_tile

    # Free layout plumbing: pure reshapes, no transpose / pad HBM round trips.
    x_f = x.reshape(N, C, HW)
    h0_f = h0.reshape(N, C, HW)

    # Per-tap weight matrices for the accumulating matmuls, bf16 for the MXU:
    # w_t[dy*K+dx] = w[:, :, dy, dx]  (Cout, Cin).
    w1_t = jnp.transpose(w1, (2, 3, 0, 1)).reshape(KK, C, C).astype(jnp.bfloat16)
    w2_t = jnp.transpose(w2, (2, 3, 0, 1)).reshape(KK, C, C).astype(jnp.bfloat16)

    # Static zero-padding validity masks, one row per (dy, dx) tap (built host-side).
    pad = K // 2
    hh = np.arange(H)[:, None]
    ww = np.arange(W)[None, :]
    rows = []
    for dy in range(K):
        for dx in range(K):
            valid = ((hh + dy - pad >= 0) & (hh + dy - pad < H) &
                     (ww + dx - pad >= 0) & (ww + dx - pad < W))
            rows.append(valid.reshape(HW))
    masks = jnp.asarray(np.stack(rows), dtype=jnp.float32)          # (KK, HW)

    kernel = functools.partial(_residual_unit_kernel, W=W, K=K)

    # Per-generation VMEM limit: size against physical VMEM (v7x: 64 MiB, v5e/v6e: 128 MiB)
    # and leave headroom for Mosaic internal scratch.
    try:
        vmem_cap = int(pltpu.get_tpu_info().vmem_capacity_bytes)
    except Exception:
        vmem_cap = 64 * 1024 * 1024                                 # conservative fallback
    vmem_limit = int(min((vmem_cap * 3) // 4, 112 * 1024 * 1024))

    def _pallas_call(single_buffer_consts):
        # Grid-invariant inputs (weights, masks) don't need a second pipeline buffer.
        const_kw = {"pipeline_mode": pl.Buffered(1)} if single_buffer_consts else {}
        return pl.pallas_call(
            kernel,
            out_shape=jax.ShapeDtypeStruct((N, C, HW), x.dtype),
            grid_spec=pltpu.PrefetchScalarGridSpec(
                num_scalar_prefetch=0,
                grid=(n_steps,),                                     # b_tile images / step
                in_specs=[
                    pl.BlockSpec((b_tile, C, HW), lambda n: (n, 0, 0)),   # x  (lane-dense)
                    pl.BlockSpec((b_tile, C, HW), lambda n: (n, 0, 0)),   # h0 (lane-dense)
                    pl.BlockSpec((KK, C, C), lambda n: (0, 0, 0), **const_kw),  # w1 taps
                    pl.BlockSpec((KK, C, C), lambda n: (0, 0, 0), **const_kw),  # w2 taps
                    pl.BlockSpec((KK, HW), lambda n: (0, 0), **const_kw),       # tap masks
                ],
                out_specs=pl.BlockSpec((b_tile, C, HW), lambda n: (n, 0, 0)),   # lane-dense
            ),
            compiler_params=pltpu.CompilerParams(
                dimension_semantics=("parallel",),                   # batch axis -> megacore
                vmem_limit_bytes=vmem_limit,
            ),
        )

    try:
        out_f = _pallas_call(True)(x_f, h0_f, w1_t, w2_t, masks)
    except Exception:
        # Fallback for jax builds without BlockSpec(pipeline_mode=...): default buffering.
        out_f = _pallas_call(False)(x_f, h0_f, w1_t, w2_t, masks)

    return out_f.reshape(N, C, H, W)


def _reference(h0, x, w1, w2):
    def conv_layer(inp, w):
        a = jnp.maximum(inp, 0.0)
        return lax.conv_general_dilated(
            a, w, window_strides=(1, 1), padding="SAME",
            dimension_numbers=("NCHW", "OIHW", "NCHW"))
    return h0 + conv_layer(conv_layer(x, w1), w2)


if __name__ == "__main__":
    key = jax.random.PRNGKey(0)
    N, C, H, W, K = 4, 8, 16, 16, 3   # small DRRN-style config; H*W = 256 lanes

    kx, kh, k1, k2 = jax.random.split(key, 4)
    x = jax.random.normal(kx, (N, C, H, W), dtype=jnp.float32)
    h0 = jax.random.normal(kh, (N, C, H, W), dtype=jnp.float32)
    fan_in = C * K * K
    bound = 1.0 / (fan_in ** 0.5)
    w1 = jax.random.uniform(k1, (C, C, K, K), jnp.float32, minval=-bound, maxval=bound)
    w2 = jax.random.uniform(k2, (C, C, K, K), jnp.float32, minval=-bound, maxval=bound)

    out = jax.block_until_ready(residual_unit_forward(h0, x, w1, w2))

    ref = _reference(h0, x, w1, w2)
    assert out.shape == (N, C, H, W)
    err = float(jnp.max(jnp.abs(out - ref)))
    # bf16 MXU operands (f32 accumulation) vs. an f32 reference -> slightly looser tolerance.
    assert jnp.allclose(out, ref, atol=2e-2, rtol=2e-2), err
    print("KERNEL_OK")
</pallas_src>

<mosaic_0001>
module attributes {stable_mosaic.version = 11 : i64} {
  func.func @_residual_unit_kernel(%arg0: i32, %arg1: memref<2x8x256xf32, #tpu.memory_space<vmem>>, %arg2: memref<2x8x256xf32, #tpu.memory_space<vmem>>, %arg3: memref<9x8x8xbf16, #tpu.memory_space<vmem>>, %arg4: memref<9x8x8xbf16, #tpu.memory_space<vmem>>, %arg5: memref<9x256xf32, #tpu.memory_space<vmem>>, %arg6: memref<2x8x256xf32, #tpu.memory_space<vmem>>) attributes {dimension_semantics = [#tpu.dimension_semantics<parallel>], iteration_bounds = array<i64: 2>, scalar_prefetch = 0 : i64, scratch_operands = 0 : i64, tpu.core_type = #tpu.core_type<tc>, window_params = [{transform_indices = @transform_0, window_bounds = array<i64: 2, 8, 256>}, {transform_indices = @transform_1, window_bounds = array<i64: 2, 8, 256>}, {pipeline_mode = #tpu.pipeline_mode<synchronous>, transform_indices = @transform_2, window_bounds = array<i64: 9, 8, 8>}, {pipeline_mode = #tpu.pipeline_mode<synchronous>, transform_indices = @transform_3, window_bounds = array<i64: 9, 8, 8>}, {pipeline_mode = #tpu.pipeline_mode<synchronous>, transform_indices = @transform_4, window_bounds = array<i64: 9, 256>}, {transform_indices = @transform_5, window_bounds = array<i64: 2, 8, 256>}]} {
    %c0 = arith.constant 0 : index
    %c0_0 = arith.constant 0 : index
    %0 = vector.load %arg5[%c0, %c0_0] : memref<9x256xf32, #tpu.memory_space<vmem>>, vector<9x256xf32>
    %c0_1 = arith.constant 0 : index
    %c0_2 = arith.constant 0 : index
    %c0_3 = arith.constant 0 : index
    %1 = vector.load %arg1[%c0_1, %c0_2, %c0_3] : memref<2x8x256xf32, #tpu.memory_space<vmem>>, vector<1x8x256xf32>
    %2 = vector.shape_cast %1 : vector<1x8x256xf32> to vector<8x256xf32>
    %c0_4 = arith.constant 0 : index
    %c0_5 = arith.constant 0 : index
    %c0_6 = arith.constant 0 : index
    %3 = vector.load %arg2[%c0_4, %c0_5, %c0_6] : memref<2x8x256xf32, #tpu.memory_space<vmem>>, vector<1x8x256xf32>
    %4 = vector.shape_cast %3 : vector<1x8x256xf32> to vector<8x256xf32>
    %cst = arith.constant 0.000000e+00 : f32
    %5 = vector.broadcast %cst : f32 to vector<8x256xf32>
    %6 = arith.maximumf %2, %5 : vector<8x256xf32>
    %c17_i32 = arith.constant 17 : i32
    %7 = tpu.dynamic_rotate %6 by %c17_i32 dim 1 : vector<8x256xf32>, i32 -> vector<8x256xf32>
    %8 = vector.extract_strided_slice %0 {offsets = [0, 0], sizes = [1, 256], strides = [1, 1]} : vector<9x256xf32> to vector<1x256xf32>
    %9 = vector.broadcast %8 : vector<1x256xf32> to vector<8x256xf32>
    %10 = arith.mulf %7, %9 : vector<8x256xf32>
    %c0_7 = arith.constant 0 : index
    %c0_8 = arith.constant 0 : index
    %c0_9 = arith.constant 0 : index
    %11 = vector.load %arg3[%c0_7, %c0_8, %c0_9] : memref<9x8x8xbf16, #tpu.memory_space<vmem>>, vector<1x8x8xbf16>
    %12 = vector.shape_cast %11 : vector<1x8x8xbf16> to vector<8x8xbf16>
    %13 = arith.truncf %10 : vector<8x256xf32> to vector<8x256xbf16>
    %cst_10 = arith.constant dense<0.000000e+00> : vector<8x256xf32>
    %14 = tpu.matmul %12, %13, %cst_10 {dimension_numbers = #tpu.dot_dimension_numbers<[1], [0], [0], [1], [0, 0, 1, 1], [], []>} : vector<8x8xbf16>, vector<8x256xbf16>, vector<8x256xf32> -> vector<8x256xf32>
    %c16_i32 = arith.constant 16 : i32
    %15 = tpu.dynamic_rotate %6 by %c16_i32 dim 1 : vector<8x256xf32>, i32 -> vector<8x256xf32>
    %16 = vector.extract_strided_slice %0 {offsets = [1, 0], sizes = [1, 256], strides = [1, 1]} : vector<9x256xf32> to vector<1x256xf32>
    %17 = vector.broadcast %16 : vector<1x256xf32> to vector<8x256xf32>
    %18 = arith.mulf %15, %17 : vector<8x256xf32>
    %c1 = arith.constant 1 : index
    %c0_11 = arith.constant 0 : index
    %c0_12 = arith.constant 0 : index
    %19 = vector.load %arg3[%c1, %c0_11, %c0_12] : memref<9x8x8xbf16, #tpu.memory_space<vmem>>, vector<1x8x8xbf16>
    %20 = vector.shape_cast %19 : vector<1x8x8xbf16> to vector<8x8xbf16>
    %21 = arith.truncf %18 : vector<8x256xf32> to vector<8x256xbf16>
    %cst_13 = arith.constant dense<0.000000e+00> : vector<8x256xf32>
    %22 = tpu.matmul %20, %21, %cst_13 {dimension_numbers = #tpu.dot_dimension_numbers<[1], [0], [0], [1], [0, 0, 1, 1], [], []>} : vector<8x8xbf16>, vector<8x256xbf16>, vector<8x256xf32> -> vector<8x256xf32>
    %23 = arith.addf %14, %22 : vector<8x256xf32>
    %c15_i32 = arith.constant 15 : i32
    %24 = tpu.dynamic_rotate %6 by %c15_i32 dim 1 : vector<8x256xf32>, i32 -> vector<8x256xf32>
    %25 = vector.extract_strided_slice %0 {offsets = [2, 0], sizes = [1, 256], strides = [1, 1]} : vector<9x256xf32> to vector<1x256xf32>
    %26 = vector.broadcast %25 : vector<1x256xf32> to vector<8x256xf32>
    %27 = arith.mulf %24, %26 : vector<8x256xf32>
    %c2 = arith.constant 2 : index
    %c0_14 = arith.constant 0 : index
    %c0_15 = arith.constant 0 : index
    %28 = vector.load %arg3[%c2, %c0_14, %c0_15] : memref<9x8x8xbf16, #tpu.memory_space<vmem>>, vector<1x8x8xbf16>
    %29 = vector.shape_cast %28 : vector<1x8x8xbf16> to vector<8x8xbf16>
    %30 = arith.truncf %27 : vector<8x256xf32> to vector<8x256xbf16>
    %cst_16 = arith.constant dense<0.000000e+00> : vector<8x256xf32>
    %31 = tpu.matmul %29, %30, %cst_16 {dimension_numbers = #tpu.dot_dimension_numbers<[1], [0], [0], [1], [0, 0, 1, 1], [], []>} : vector<8x8xbf16>, vector<8x256xbf16>, vector<8x256xf32> -> vector<8x256xf32>
    %32 = arith.addf %23, %31 : vector<8x256xf32>
    %c1_i32 = arith.constant 1 : i32
    %33 = tpu.dynamic_rotate %6 by %c1_i32 dim 1 : vector<8x256xf32>, i32 -> vector<8x256xf32>
    %34 = vector.extract_strided_slice %0 {offsets = [3, 0], sizes = [1, 256], strides = [1, 1]} : vector<9x256xf32> to vector<1x256xf32>
    %35 = vector.broadcast %34 : vector<1x256xf32> to vector<8x256xf32>
    %36 = arith.mulf %33, %35 : vector<8x256xf32>
    %c3 = arith.constant 3 : index
    %c0_17 = arith.constant 0 : index
    %c0_18 = arith.constant 0 : index
    %37 = vector.load %arg3[%c3, %c0_17, %c0_18] : memref<9x8x8xbf16, #tpu.memory_space<vmem>>, vector<1x8x8xbf16>
    %38 = vector.shape_cast %37 : vector<1x8x8xbf16> to vector<8x8xbf16>
    %39 = arith.truncf %36 : vector<8x256xf32> to vector<8x256xbf16>
    %cst_19 = arith.constant dense<0.000000e+00> : vector<8x256xf32>
    %40 = tpu.matmul %38, %39, %cst_19 {dimension_numbers = #tpu.dot_dimension_numbers<[1], [0], [0], [1], [0, 0, 1, 1], [], []>} : vector<8x8xbf16>, vector<8x256xbf16>, vector<8x256xf32> -> vector<8x256xf32>
    %41 = arith.addf %32, %40 : vector<8x256xf32>
    %c4 = arith.constant 4 : index
    %c0_20 = arith.constant 0 : index
    %c0_21 = arith.constant 0 : index
    %42 = vector.load %arg3[%c4, %c0_20, %c0_21] : memref<9x8x8xbf16, #tpu.memory_space<vmem>>, vector<1x8x8xbf16>
    %43 = vector.shape_cast %42 : vector<1x8x8xbf16> to vector<8x8xbf16>
    %44 = arith.truncf %6 : vector<8x256xf32> to vector<8x256xbf16>
    %cst_22 = arith.constant dense<0.000000e+00> : vector<8x256xf32>
    %45 = tpu.matmul %43, %44, %cst_22 {dimension_numbers = #tpu.dot_dimension_numbers<[1], [0], [0], [1], [0, 0, 1, 1], [], []>} : vector<8x8xbf16>, vector<8x256xbf16>, vector<8x256xf32> -> vector<8x256xf32>
    %46 = arith.addf %41, %45 : vector<8x256xf32>
    %c255_i32 = arith.constant 255 : i32
    %47 = tpu.dynamic_rotate %6 by %c255_i32 dim 1 : vector<8x256xf32>, i32 -> vector<8x256xf32>
    %48 = vector.extract_strided_slice %0 {offsets = [5, 0], sizes = [1, 256], strides = [1, 1]} : vector<9x256xf32> to vector<1x256xf32>
    %49 = vector.broadcast %48 : vector<1x256xf32> to vector<8x256xf32>
    %50 = arith.mulf %47, %49 : vector<8x256xf32>
    %c5 = arith.constant 5 : index
    %c0_23 = arith.constant 0 : index
    %c0_24 = arith.constant 0 : index
    %51 = vector.load %arg3[%c5, %c0_23, %c0_24] : memref<9x8x8xbf16, #tpu.memory_space<vmem>>, vector<1x8x8xbf16>
    %52 = vector.shape_cast %51 : vector<1x8x8xbf16> to vector<8x8xbf16>
    %53 = arith.truncf %50 : vector<8x256xf32> to vector<8x256xbf16>
    %cst_25 = arith.constant dense<0.000000e+00> : vector<8x256xf32>
    %54 = tpu.matmul %52, %53, %cst_25 {dimension_numbers = #tpu.dot_dimension_numbers<[1], [0], [0], [1], [0, 0, 1, 1], [], []>} : vector<8x8xbf16>, vector<8x256xbf16>, vector<8x256xf32> -> vector<8x256xf32>
    %55 = arith.addf %46, %54 : vector<8x256xf32>
    %c241_i32 = arith.constant 241 : i32
    %56 = tpu.dynamic_rotate %6 by %c241_i32 dim 1 : vector<8x256xf32>, i32 -> vector<8x256xf32>
    %57 = vector.extract_strided_slice %0 {offsets = [6, 0], sizes = [1, 256], strides = [1, 1]} : vector<9x256xf32> to vector<1x256xf32>
    %58 = vector.broadcast %57 : vector<1x256xf32> to vector<8x256xf32>
    %59 = arith.mulf %56, %58 : vector<8x256xf32>
    %c6 = arith.constant 6 : index
    %c0_26 = arith.constant 0 : index
    %c0_27 = arith.constant 0 : index
    %60 = vector.load %arg3[%c6, %c0_26, %c0_27] : memref<9x8x8xbf16, #tpu.memory_space<vmem>>, vector<1x8x8xbf16>
    %61 = vector.shape_cast %60 : vector<1x8x8xbf16> to vector<8x8xbf16>
    %62 = arith.truncf %59 : vector<8x256xf32> to vector<8x256xbf16>
    %cst_28 = arith.constant dense<0.000000e+00> : vector<8x256xf32>
    %63 = tpu.matmul %61, %62, %cst_28 {dimension_numbers = #tpu.dot_dimension_numbers<[1], [0], [0], [1], [0, 0, 1, 1], [], []>} : vector<8x8xbf16>, vector<8x256xbf16>, vector<8x256xf32> -> vector<8x256xf32>
    %64 = arith.addf %55, %63 : vector<8x256xf32>
    %c240_i32 = arith.constant 240 : i32
    %65 = tpu.dynamic_rotate %6 by %c240_i32 dim 1 : vector<8x256xf32>, i32 -> vector<8x256xf32>
    %66 = vector.extract_strided_slice %0 {offsets = [7, 0], sizes = [1, 256], strides = [1, 1]} : vector<9x256xf32> to vector<1x256xf32>
    %67 = vector.broadcast %66 : vector<1x256xf32> to vector<8x256xf32>
    %68 = arith.mulf %65, %67 : vector<8x256xf32>
    %c7 = arith.constant 7 : index
    %c0_29 = arith.constant 0 : index
    %c0_30 = arith.constant 0 : index
    %69 = vector.load %arg3[%c7, %c0_29, %c0_30] : memref<9x8x8xbf16, #tpu.memory_space<vmem>>, vector<1x8x8xbf16>
    %70 = vector.shape_cast %69 : vector<1x8x8xbf16> to vector<8x8xbf16>
    %71 = arith.truncf %68 : vector<8x256xf32> to vector<8x256xbf16>
    %cst_31 = arith.constant dense<0.000000e+00> : vector<8x256xf32>
    %72 = tpu.matmul %70, %71, %cst_31 {dimension_numbers = #tpu.dot_dimension_numbers<[1], [0], [0], [1], [0, 0, 1, 1], [], []>} : vector<8x8xbf16>, vector<8x256xbf16>, vector<8x256xf32> -> vector<8x256xf32>
    %73 = arith.addf %64, %72 : vector<8x256xf32>
    %c239_i32 = arith.constant 239 : i32
    %74 = tpu.dynamic_rotate %6 by %c239_i32 dim 1 : vector<8x256xf32>, i32 -> vector<8x256xf32>
    %75 = vector.extract_strided_slice %0 {offsets = [8, 0], sizes = [1, 256], strides = [1, 1]} : vector<9x256xf32> to vector<1x256xf32>
    %76 = vector.broadcast %75 : vector<1x256xf32> to vector<8x256xf32>
    %77 = arith.mulf %74, %76 : vector<8x256xf32>
    %c8 = arith.constant 8 : index
    %c0_32 = arith.constant 0 : index
    %c0_33 = arith.constant 0 : index
    %78 = vector.load %arg3[%c8, %c0_32, %c0_33] : memref<9x8x8xbf16, #tpu.memory_space<vmem>>, vector<1x8x8xbf16>
    %79 = vector.shape_cast %78 : vector<1x8x8xbf16> to vector<8x8xbf16>
    %80 = arith.truncf %77 : vector<8x256xf32> to vector<8x256xbf16>
    %cst_34 = arith.constant dense<0.000000e+00> : vector<8x256xf32>
    %81 = tpu.matmul %79, %80, %cst_34 {dimension_numbers = #tpu.dot_dimension_numbers<[1], [0], [0], [1], [0, 0, 1, 1], [], []>} : vector<8x8xbf16>, vector<8x256xbf16>, vector<8x256xf32> -> vector<8x256xf32>
    %82 = arith.addf %73, %81 : vector<8x256xf32>
    %cst_35 = arith.constant 0.000000e+00 : f32
    %83 = vector.broadcast %cst_35 : f32 to vector<8x256xf32>
    %84 = arith.maximumf %82, %83 : vector<8x256xf32>
    %c17_i32_36 = arith.constant 17 : i32
    %85 = tpu.dynamic_rotate %84 by %c17_i32_36 dim 1 : vector<8x256xf32>, i32 -> vector<8x256xf32>
    %86 = vector.extract_strided_slice %0 {offsets = [0, 0], sizes = [1, 256], strides = [1, 1]} : vector<9x256xf32> to vector<1x256xf32>
    %87 = vector.broadcast %86 : vector<1x256xf32> to vector<8x256xf32>
    %88 = arith.mulf %85, %87 : vector<8x256xf32>
    %c0_37 = arith.constant 0 : index
    %c0_38 = arith.constant 0 : index
    %c0_39 = arith.constant 0 : index
    %89 = vector.load %arg4[%c0_37, %c0_38, %c0_39] : memref<9x8x8xbf16, #tpu.memory_space<vmem>>, vector<1x8x8xbf16>
    %90 = vector.shape_cast %89 : vector<1x8x8xbf16> to vector<8x8xbf16>
    %91 = arith.truncf %88 : vector<8x256xf32> to vector<8x256xbf16>
    %cst_40 = arith.constant dense<0.000000e+00> : vector<8x256xf32>
    %92 = tpu.matmul %90, %91, %cst_40 {dimension_numbers = #tpu.dot_dimension_numbers<[1], [0], [0], [1], [0, 0, 1, 1], [], []>} : vector<8x8xbf16>, vector<8x256xbf16>, vector<8x256xf32> -> vector<8x256xf32>
    %c16_i32_41 = arith.constant 16 : i32
    %93 = tpu.dynamic_rotate %84 by %c16_i32_41 dim 1 : vector<8x256xf32>, i32 -> vector<8x256xf32>
    %94 = vector.extract_strided_slice %0 {offsets = [1, 0], sizes = [1, 256], strides = [1, 1]} : vector<9x256xf32> to vector<1x256xf32>
    %95 = vector.broadcast %94 : vector<1x256xf32> to vector<8x256xf32>
    %96 = arith.mulf %93, %95 : vector<8x256xf32>
    %c1_42 = arith.constant 1 : index
    %c0_43 = arith.constant 0 : index
    %c0_44 = arith.constant 0 : index
    %97 = vector.load %arg4[%c1_42, %c0_43, %c0_44] : memref<9x8x8xbf16, #tpu.memory_space<vmem>>, vector<1x8x8xbf16>
    %98 = vector.shape_cast %97 : vector<1x8x8xbf16> to vector<8x8xbf16>
    %99 = arith.truncf %96 : vector<8x256xf32> to vector<8x256xbf16>
    %cst_45 = arith.constant dense<0.000000e+00> : vector<8x256xf32>
    %100 = tpu.matmul %98, %99, %cst_45 {dimension_numbers = #tpu.dot_dimension_numbers<[1], [0], [0], [1], [0, 0, 1, 1], [], []>} : vector<8x8xbf16>, vector<8x256xbf16>, vector<8x256xf32> -> vector<8x256xf32>
    %101 = arith.addf %92, %100 : vector<8x256xf32>
    %c15_i32_46 = arith.constant 15 : i32
    %102 = tpu.dynamic_rotate %84 by %c15_i32_46 dim 1 : vector<8x256xf32>, i32 -> vector<8x256xf32>
    %103 = vector.extract_strided_slice %0 {offsets = [2, 0], sizes = [1, 256], strides = [1, 1]} : vector<9x256xf32> to vector<1x256xf32>
    %104 = vector.broadcast %103 : vector<1x256xf32> to vector<8x256xf32>
    %105 = arith.mulf %102, %104 : vector<8x256xf32>
    %c2_47 = arith.constant 2 : index
    %c0_48 = arith.constant 0 : index
    %c0_49 = arith.constant 0 : index
    %106 = vector.load %arg4[%c2_47, %c0_48, %c0_49] : memref<9x8x8xbf16, #tpu.memory_space<vmem>>, vector<1x8x8xbf16>
    %107 = vector.shape_cast %106 : vector<1x8x8xbf16> to vector<8x8xbf16>
    %108 = arith.truncf %105 : vector<8x256xf32> to vector<8x256xbf16>
    %cst_50 = arith.constant dense<0.000000e+00> : vector<8x256xf32>
    %109 = tpu.matmul %107, %108, %cst_50 {dimension_numbers = #tpu.dot_dimension_numbers<[1], [0], [0], [1], [0, 0, 1, 1], [], []>} : vector<8x8xbf16>, vector<8x256xbf16>, vector<8x256xf32> -> vector<8x256xf32>
    %110 = arith.addf %101, %109 : vector<8x256xf32>
    %c1_i32_51 = arith.constant 1 : i32
    %111 = tpu.dynamic_rotate %84 by %c1_i32_51 dim 1 : vector<8x256xf32>, i32 -> vector<8x256xf32>
    %112 = vector.extract_strided_slice %0 {offsets = [3, 0], sizes = [1, 256], strides = [1, 1]} : vector<9x256xf32> to vector<1x256xf32>
    %113 = vector.broadcast %112 : vector<1x256xf32> to vector<8x256xf32>
    %114 = arith.mulf %111, %113 : vector<8x256xf32>
    %c3_52 = arith.constant 3 : index
    %c0_53 = arith.constant 0 : index
    %c0_54 = arith.constant 0 : index
    %115 = vector.load %arg4[%c3_52, %c0_53, %c0_54] : memref<9x8x8xbf16, #tpu.memory_space<vmem>>, vector<1x8x8xbf16>
    %116 = vector.shape_cast %115 : vector<1x8x8xbf16> to vector<8x8xbf16>
    %117 = arith.truncf %114 : vector<8x256xf32> to vector<8x256xbf16>
    %cst_55 = arith.constant dense<0.000000e+00> : vector<8x256xf32>
    %118 = tpu.matmul %116, %117, %cst_55 {dimension_numbers = #tpu.dot_dimension_numbers<[1], [0], [0], [1], [0, 0, 1, 1], [], []>} : vector<8x8xbf16>, vector<8x256xbf16>, vector<8x256xf32> -> vector<8x256xf32>
    %119 = arith.addf %110, %118 : vector<8x256xf32>
    %c4_56 = arith.constant 4 : index
    %c0_57 = arith.constant 0 : index
    %c0_58 = arith.constant 0 : index
    %120 = vector.load %arg4[%c4_56, %c0_57, %c0_58] : memref<9x8x8xbf16, #tpu.memory_space<vmem>>, vector<1x8x8xbf16>
    %121 = vector.shape_cast %120 : vector<1x8x8xbf16> to vector<8x8xbf16>
    %122 = arith.truncf %84 : vector<8x256xf32> to vector<8x256xbf16>
    %cst_59 = arith.constant dense<0.000000e+00> : vector<8x256xf32>
    %123 = tpu.matmul %121, %122, %cst_59 {dimension_numbers = #tpu.dot_dimension_numbers<[1], [0], [0], [1], [0, 0, 1, 1], [], []>} : vector<8x8xbf16>, vector<8x256xbf16>, vector<8x256xf32> -> vector<8x256xf32>
    %124 = arith.addf %119, %123 : vector<8x256xf32>
    %c255_i32_60 = arith.constant 255 : i32
    %125 = tpu.dynamic_rotate %84 by %c255_i32_60 dim 1 : vector<8x256xf32>, i32 -> vector<8x256xf32>
    %126 = vector.extract_strided_slice %0 {offsets = [5, 0], sizes = [1, 256], strides = [1, 1]} : vector<9x256xf32> to vector<1x256xf32>
    %127 = vector.broadcast %126 : vector<1x256xf32> to vector<8x256xf32>
    %128 = arith.mulf %125, %127 : vector<8x256xf32>
    %c5_61 = arith.constant 5 : index
    %c0_62 = arith.constant 0 : index
    %c0_63 = arith.constant 0 : index
    %129 = vector.load %arg4[%c5_61, %c0_62, %c0_63] : memref<9x8x8xbf16, #tpu.memory_space<vmem>>, vector<1x8x8xbf16>
    %130 = vector.shape_cast %129 : vector<1x8x8xbf16> to vector<8x8xbf16>
    %131 = arith.truncf %128 : vector<8x256xf32> to vector<8x256xbf16>
    %cst_64 = arith.constant dense<0.000000e+00> : vector<8x256xf32>
    %132 = tpu.matmul %130, %131, %cst_64 {dimension_numbers = #tpu.dot_dimension_numbers<[1], [0], [0], [1], [0, 0, 1, 1], [], []>} : vector<8x8xbf16>, vector<8x256xbf16>, vector<8x256xf32> -> vector<8x256xf32>
    %133 = arith.addf %124, %132 : vector<8x256xf32>
    %c241_i32_65 = arith.constant 241 : i32
    %134 = tpu.dynamic_rotate %84 by %c241_i32_65 dim 1 : vector<8x256xf32>, i32 -> vector<8x256xf32>
    %135 = vector.extract_strided_slice %0 {offsets = [6, 0], sizes = [1, 256], strides = [1, 1]} : vector<9x256xf32> to vector<1x256xf32>
    %136 = vector.broadcast %135 : vector<1x256xf32> to vector<8x256xf32>
    %137 = arith.mulf %134, %136 : vector<8x256xf32>
    %c6_66 = arith.constant 6 : index
    %c0_67 = arith.constant 0 : index
    %c0_68 = arith.constant 0 : index
    %138 = vector.load %arg4[%c6_66, %c0_67, %c0_68] : memref<9x8x8xbf16, #tpu.memory_space<vmem>>, vector<1x8x8xbf16>
    %139 = vector.shape_cast %138 : vector<1x8x8xbf16> to vector<8x8xbf16>
    %140 = arith.truncf %137 : vector<8x256xf32> to vector<8x256xbf16>
    %cst_69 = arith.constant dense<0.000000e+00> : vector<8x256xf32>
    %141 = tpu.matmul %139, %140, %cst_69 {dimension_numbers = #tpu.dot_dimension_numbers<[1], [0], [0], [1], [0, 0, 1, 1], [], []>} : vector<8x8xbf16>, vector<8x256xbf16>, vector<8x256xf32> -> vector<8x256xf32>
    %142 = arith.addf %133, %141 : vector<8x256xf32>
    %c240_i32_70 = arith.constant 240 : i32
    %143 = tpu.dynamic_rotate %84 by %c240_i32_70 dim 1 : vector<8x256xf32>, i32 -> vector<8x256xf32>
    %144 = vector.extract_strided_slice %0 {offsets = [7, 0], sizes = [1, 256], strides = [1, 1]} : vector<9x256xf32> to vector<1x256xf32>
    %145 = vector.broadcast %144 : vector<1x256xf32> to vector<8x256xf32>
    %146 = arith.mulf %143, %145 : vector<8x256xf32>
    %c7_71 = arith.constant 7 : index
    %c0_72 = arith.constant 0 : index
    %c0_73 = arith.constant 0 : index
    %147 = vector.load %arg4[%c7_71, %c0_72, %c0_73] : memref<9x8x8xbf16, #tpu.memory_space<vmem>>, vector<1x8x8xbf16>
    %148 = vector.shape_cast %147 : vector<1x8x8xbf16> to vector<8x8xbf16>
    %149 = arith.truncf %146 : vector<8x256xf32> to vector<8x256xbf16>
    %cst_74 = arith.constant dense<0.000000e+00> : vector<8x256xf32>
    %150 = tpu.matmul %148, %149, %cst_74 {dimension_numbers = #tpu.dot_dimension_numbers<[1], [0], [0], [1], [0, 0, 1, 1], [], []>} : vector<8x8xbf16>, vector<8x256xbf16>, vector<8x256xf32> -> vector<8x256xf32>
    %151 = arith.addf %142, %150 : vector<8x256xf32>
    %c239_i32_75 = arith.constant 239 : i32
    %152 = tpu.dynamic_rotate %84 by %c239_i32_75 dim 1 : vector<8x256xf32>, i32 -> vector<8x256xf32>
    %153 = vector.extract_strided_slice %0 {offsets = [8, 0], sizes = [1, 256], strides = [1, 1]} : vector<9x256xf32> to vector<1x256xf32>
    %154 = vector.broadcast %153 : vector<1x256xf32> to vector<8x256xf32>
    %155 = arith.mulf %152, %154 : vector<8x256xf32>
    %c8_76 = arith.constant 8 : index
    %c0_77 = arith.constant 0 : index
    %c0_78 = arith.constant 0 : index
    %156 = vector.load %arg4[%c8_76, %c0_77, %c0_78] : memref<9x8x8xbf16, #tpu.memory_space<vmem>>, vector<1x8x8xbf16>
    %157 = vector.shape_cast %156 : vector<1x8x8xbf16> to vector<8x8xbf16>
    %158 = arith.truncf %155 : vector<8x256xf32> to vector<8x256xbf16>
    %cst_79 = arith.constant dense<0.000000e+00> : vector<8x256xf32>
    %159 = tpu.matmul %157, %158, %cst_79 {dimension_numbers = #tpu.dot_dimension_numbers<[1], [0], [0], [1], [0, 0, 1, 1], [], []>} : vector<8x8xbf16>, vector<8x256xbf16>, vector<8x256xf32> -> vector<8x256xf32>
    %160 = arith.addf %151, %159 : vector<8x256xf32>
    %161 = arith.addf %4, %160 : vector<8x256xf32>
    %c0_80 = arith.constant 0 : index
    %c0_81 = arith.constant 0 : index
    %c0_82 = arith.constant 0 : index
    %162 = vector.load %arg6[%c0_80, %c0_81, %c0_82] : memref<2x8x256xf32, #tpu.memory_space<vmem>>, vector<1x8x256xf32>
    %163 = vector.shape_cast %162 : vector<1x8x256xf32> to vector<8x256xf32>
    %164 = vector.shape_cast %161 : vector<8x256xf32> to vector<1x8x256xf32>
    tpu.vector_store %arg6[%c0_80, %c0_81, %c0_82], %164 {strides = array<i32>} : memref<2x8x256xf32, #tpu.memory_space<vmem>>, vector<1x8x256xf32>,
    %c1_83 = arith.constant 1 : index
    %c0_84 = arith.constant 0 : index
    %c0_85 = arith.constant 0 : index
    %165 = vector.load %arg1[%c1_83, %c0_84, %c0_85] : memref<2x8x256xf32, #tpu.memory_space<vmem>>, vector<1x8x256xf32>
    %166 = vector.shape_cast %165 : vector<1x8x256xf32> to vector<8x256xf32>
    %c1_86 = arith.constant 1 : index
    %c0_87 = arith.constant 0 : index
    %c0_88 = arith.constant 0 : index
    %167 = vector.load %arg2[%c1_86, %c0_87, %c0_88] : memref<2x8x256xf32, #tpu.memory_space<vmem>>, vector<1x8x256xf32>
    %168 = vector.shape_cast %167 : vector<1x8x256xf32> to vector<8x256xf32>
    %cst_89 = arith.constant 0.000000e+00 : f32
    %169 = vector.broadcast %cst_89 : f32 to vector<8x256xf32>
    %170 = arith.maximumf %166, %169 : vector<8x256xf32>
    %c17_i32_90 = arith.constant 17 : i32
    %171 = tpu.dynamic_rotate %170 by %c17_i32_90 dim 1 : vector<8x256xf32>, i32 -> vector<8x256xf32>
    %172 = vector.extract_strided_slice %0 {offsets = [0, 0], sizes = [1, 256], strides = [1, 1]} : vector<9x256xf32> to vector<1x256xf32>
    %173 = vector.broadcast %172 : vector<1x256xf32> to vector<8x256xf32>
    %174 = arith.mulf %171, %173 : vector<8x256xf32>
    %c0_91 = arith.constant 0 : index
    %c0_92 = arith.constant 0 : index
    %c0_93 = arith.constant 0 : index
    %175 = vector.load %arg3[%c0_91, %c0_92, %c0_93] : memref<9x8x8xbf16, #tpu.memory_space<vmem>>, vector<1x8x8xbf16>
    %176 = vector.shape_cast %175 : vector<1x8x8xbf16> to vector<8x8xbf16>
    %177 = arith.truncf %174 : vector<8x256xf32> to vector<8x256xbf16>
    %cst_94 = arith.constant dense<0.000000e+00> : vector<8x256xf32>
    %178 = tpu.matmul %176, %177, %cst_94 {dimension_numbers = #tpu.dot_dimension_numbers<[1], [0], [0], [1], [0, 0, 1, 1], [], []>} : vector<8x8xbf16>, vector<8x256xbf16>, vector<8x256xf32> -> vector<8x256xf32>
    %c16_i32_95 = arith.constant 16 : i32
    %179 = tpu.dynamic_rotate %170 by %c16_i32_95 dim 1 : vector<8x256xf32>, i32 -> vector<8x256xf32>
    %180 = vector.extract_strided_slice %0 {offsets = [1, 0], sizes = [1, 256], strides = [1, 1]} : vector<9x256xf32> to vector<1x256xf32>
    %181 = vector.broadcast %180 : vector<1x256xf32> to vector<8x256xf32>
    %182 = arith.mulf %179, %181 : vector<8x256xf32>
    %c1_96 = arith.constant 1 : index
    %c0_97 = arith.constant 0 : index
    %c0_98 = arith.constant 0 : index
    %183 = vector.load %arg3[%c1_96, %c0_97, %c0_98] : memref<9x8x8xbf16, #tpu.memory_space<vmem>>, vector<1x8x8xbf16>
    %184 = vector.shape_cast %183 : vector<1x8x8xbf16> to vector<8x8xbf16>
    %185 = arith.truncf %182 : vector<8x256xf32> to vector<8x256xbf16>
    %cst_99 = arith.constant dense<0.000000e+00> : vector<8x256xf32>
    %186 = tpu.matmul %184, %185, %cst_99 {dimension_numbers = #tpu.dot_dimension_numbers<[1], [0], [0], [1], [0, 0, 1, 1], [], []>} : vector<8x8xbf16>, vector<8x256xbf16>, vector<8x256xf32> -> vector<8x256xf32>
    %187 = arith.addf %178, %186 : vector<8x256xf32>
    %c15_i32_100 = arith.constant 15 : i32
    %188 = tpu.dynamic_rotate %170 by %c15_i32_100 dim 1 : vector<8x256xf32>, i32 -> vector<8x256xf32>
    %189 = vector.extract_strided_slice %0 {offsets = [2, 0], sizes = [1, 256], strides = [1, 1]} : vector<9x256xf32> to vector<1x256xf32>
    %190 = vector.broadcast %189 : vector<1x256xf32> to vector<8x256xf32>
    %191 = arith.mulf %188, %190 : vector<8x256xf32>
    %c2_101 = arith.constant 2 : index
    %c0_102 = arith.constant 0 : index
    %c0_103 = arith.constant 0 : index
    %192 = vector.load %arg3[%c2_101, %c0_102, %c0_103] : memref<9x8x8xbf16, #tpu.memory_space<vmem>>, vector<1x8x8xbf16>
    %193 = vector.shape_cast %192 : vector<1x8x8xbf16> to vector<8x8xbf16>
    %194 = arith.truncf %191 : vector<8x256xf32> to vector<8x256xbf16>
    %cst_104 = arith.constant dense<0.000000e+00> : vector<8x256xf32>
    %195 = tpu.matmul %193, %194, %cst_104 {dimension_numbers = #tpu.dot_dimension_numbers<[1], [0], [0], [1], [0, 0, 1, 1], [], []>} : vector<8x8xbf16>, vector<8x256xbf16>, vector<8x256xf32> -> vector<8x256xf32>
    %196 = arith.addf %187, %195 : vector<8x256xf32>
    %c1_i32_105 = arith.constant 1 : i32
    %197 = tpu.dynamic_rotate %170 by %c1_i32_105 dim 1 : vector<8x256xf32>, i32 -> vector<8x256xf32>
    %198 = vector.extract_strided_slice %0 {offsets = [3, 0], sizes = [1, 256], strides = [1, 1]} : vector<9x256xf32> to vector<1x256xf32>
    %199 = vector.broadcast %198 : vector<1x256xf32> to vector<8x256xf32>
    %200 = arith.mulf %197, %199 : vector<8x256xf32>
    %c3_106 = arith.constant 3 : index
    %c0_107 = arith.constant 0 : index
    %c0_108 = arith.constant 0 : index
    %201 = vector.load %arg3[%c3_106, %c0_107, %c0_108] : memref<9x8x8xbf16, #tpu.memory_space<vmem>>, vector<1x8x8xbf16>
    %202 = vector.shape_cast %201 : vector<1x8x8xbf16> to vector<8x8xbf16>
    %203 = arith.truncf %200 : vector<8x256xf32> to vector<8x256xbf16>
    %cst_109 = arith.constant dense<0.000000e+00> : vector<8x256xf32>
    %204 = tpu.matmul %202, %203, %cst_109 {dimension_numbers = #tpu.dot_dimension_numbers<[1], [0], [0], [1], [0, 0, 1, 1], [], []>} : vector<8x8xbf16>, vector<8x256xbf16>, vector<8x256xf32> -> vector<8x256xf32>
    %205 = arith.addf %196, %204 : vector<8x256xf32>
    %c4_110 = arith.constant 4 : index
    %c0_111 = arith.constant 0 : index
    %c0_112 = arith.constant 0 : index
    %206 = vector.load %arg3[%c4_110, %c0_111, %c0_112] : memref<9x8x8xbf16, #tpu.memory_space<vmem>>, vector<1x8x8xbf16>
    %207 = vector.shape_cast %206 : vector<1x8x8xbf16> to vector<8x8xbf16>
    %208 = arith.truncf %170 : vector<8x256xf32> to vector<8x256xbf16>
    %cst_113 = arith.constant dense<0.000000e+00> : vector<8x256xf32>
    %209 = tpu.matmul %207, %208, %cst_113 {dimension_numbers = #tpu.dot_dimension_numbers<[1], [0], [0], [1], [0, 0, 1, 1], [], []>} : vector<8x8xbf16>, vector<8x256xbf16>, vector<8x256xf32> -> vector<8x256xf32>
    %210 = arith.addf %205, %209 : vector<8x256xf32>
    %c255_i32_114 = arith.constant 255 : i32
    %211 = tpu.dynamic_rotate %170 by %c255_i32_114 dim 1 : vector<8x256xf32>, i32 -> vector<8x256xf32>
    %212 = vector.extract_strided_slice %0 {offsets = [5, 0], sizes = [1, 256], strides = [1, 1]} : vector<9x256xf32> to vector<1x256xf32>
    %213 = vector.broadcast %212 : vector<1x256xf32> to vector<8x256xf32>
    %214 = arith.mulf %211, %213 : vector<8x256xf32>
    %c5_115 = arith.constant 5 : index
    %c0_116 = arith.constant 0 : index
    %c0_117 = arith.constant 0 : index
    %215 = vector.load %arg3[%c5_115, %c0_116, %c0_117] : memref<9x8x8xbf16, #tpu.memory_space<vmem>>, vector<1x8x8xbf16>
    %216 = vector.shape_cast %215 : vector<1x8x8xbf16> to vector<8x8xbf16>
    %217 = arith.truncf %214 : vector<8x256xf32> to vector<8x256xbf16>
    %cst_118 = arith.constant dense<0.000000e+00> : vector<8x256xf32>
    %218 = tpu.matmul %216, %217, %cst_118 {dimension_numbers = #tpu.dot_dimension_numbers<[1], [0], [0], [1], [0, 0, 1, 1], [], []>} : vector<8x8xbf16>, vector<8x256xbf16>, vector<8x256xf32> -> vector<8x256xf32>
    %219 = arith.addf %210, %218 : vector<8x256xf32>
    %c241_i32_119 = arith.constant 241 : i32
    %220 = tpu.dynamic_rotate %170 by %c241_i32_119 dim 1 : vector<8x256xf32>, i32 -> vector<8x256xf32>
    %221 = vector.extract_strided_slice %0 {offsets = [6, 0], sizes = [1, 256], strides = [1, 1]} : vector<9x256xf32> to vector<1x256xf32>
    %222 = vector.broadcast %221 : vector<1x256xf32> to vector<8x256xf32>
    %223 = arith.mulf %220, %222 : vector<8x256xf32>
    %c6_120 = arith.constant 6 : index
    %c0_121 = arith.constant 0 : index
    %c0_122 = arith.constant 0 : index
    %224 = vector.load %arg3[%c6_120, %c0_121, %c0_122] : memref<9x8x8xbf16, #tpu.memory_space<vmem>>, vector<1x8x8xbf16>
    %225 = vector.shape_cast %224 : vector<1x8x8xbf16> to vector<8x8xbf16>
    %226 = arith.truncf %223 : vector<8x256xf32> to vector<8x256xbf16>
    %cst_123 = arith.constant dense<0.000000e+00> : vector<8x256xf32>
    %227 = tpu.matmul %225, %226, %cst_123 {dimension_numbers = #tpu.dot_dimension_numbers<[1], [0], [0], [1], [0, 0, 1, 1], [], []>} : vector<8x8xbf16>, vector<8x256xbf16>, vector<8x256xf32> -> vector<8x256xf32>
    %228 = arith.addf %219, %227 : vector<8x256xf32>
    %c240_i32_124 = arith.constant 240 : i32
    %229 = tpu.dynamic_rotate %170 by %c240_i32_124 dim 1 : vector<8x256xf32>, i32 -> vector<8x256xf32>
    %230 = vector.extract_strided_slice %0 {offsets = [7, 0], sizes = [1, 256], strides = [1, 1]} : vector<9x256xf32> to vector<1x256xf32>
    %231 = vector.broadcast %230 : vector<1x256xf32> to vector<8x256xf32>
    %232 = arith.mulf %229, %231 : vector<8x256xf32>
    %c7_125 = arith.constant 7 : index
    %c0_126 = arith.constant 0 : index
    %c0_127 = arith.constant 0 : index
    %233 = vector.load %arg3[%c7_125, %c0_126, %c0_127] : memref<9x8x8xbf16, #tpu.memory_space<vmem>>, vector<1x8x8xbf16>
    %234 = vector.shape_cast %233 : vector<1x8x8xbf16> to vector<8x8xbf16>
    %235 = arith.truncf %232 : vector<8x256xf32> to vector<8x256xbf16>
    %cst_128 = arith.constant dense<0.000000e+00> : vector<8x256xf32>
    %236 = tpu.matmul %234, %235, %cst_128 {dimension_numbers = #tpu.dot_dimension_numbers<[1], [0], [0], [1], [0, 0, 1, 1], [], []>} : vector<8x8xbf16>, vector<8x256xbf16>, vector<8x256xf32> -> vector<8x256xf32>
    %237 = arith.addf %228, %236 : vector<8x256xf32>
    %c239_i32_129 = arith.constant 239 : i32
    %238 = tpu.dynamic_rotate %170 by %c239_i32_129 dim 1 : vector<8x256xf32>, i32 -> vector<8x256xf32>
    %239 = vector.extract_strided_slice %0 {offsets = [8, 0], sizes = [1, 256], strides = [1, 1]} : vector<9x256xf32> to vector<1x256xf32>
    %240 = vector.broadcast %239 : vector<1x256xf32> to vector<8x256xf32>
    %241 = arith.mulf %238, %240 : vector<8x256xf32>
    %c8_130 = arith.constant 8 : index
    %c0_131 = arith.constant 0 : index
    %c0_132 = arith.constant 0 : index
    %242 = vector.load %arg3[%c8_130, %c0_131, %c0_132] : memref<9x8x8xbf16, #tpu.memory_space<vmem>>, vector<1x8x8xbf16>
    %243 = vector.shape_cast %242 : vector<1x8x8xbf16> to vector<8x8xbf16>
    %244 = arith.truncf %241 : vector<8x256xf32> to vector<8x256xbf16>
    %cst_133 = arith.constant dense<0.000000e+00> : vector<8x256xf32>
    %245 = tpu.matmul %243, %244, %cst_133 {dimension_numbers = #tpu.dot_dimension_numbers<[1], [0], [0], [1], [0, 0, 1, 1], [], []>} : vector<8x8xbf16>, vector<8x256xbf16>, vector<8x256xf32> -> vector<8x256xf32>
    %246 = arith.addf %237, %245 : vector<8x256xf32>
    %cst_134 = arith.constant 0.000000e+00 : f32
    %247 = vector.broadcast %cst_134 : f32 to vector<8x256xf32>
    %248 = arith.maximumf %246, %247 : vector<8x256xf32>
    %c17_i32_135 = arith.constant 17 : i32
    %249 = tpu.dynamic_rotate %248 by %c17_i32_135 dim 1 : vector<8x256xf32>, i32 -> vector<8x256xf32>
    %250 = vector.extract_strided_slice %0 {offsets = [0, 0], sizes = [1, 256], strides = [1, 1]} : vector<9x256xf32> to vector<1x256xf32>
    %251 = vector.broadcast %250 : vector<1x256xf32> to vector<8x256xf32>
    %252 = arith.mulf %249, %251 : vector<8x256xf32>
    %c0_136 = arith.constant 0 : index
    %c0_137 = arith.constant 0 : index
    %c0_138 = arith.constant 0 : index
    %253 = vector.load %arg4[%c0_136, %c0_137, %c0_138] : memref<9x8x8xbf16, #tpu.memory_space<vmem>>, vector<1x8x8xbf16>
    %254 = vector.shape_cast %253 : vector<1x8x8xbf16> to vector<8x8xbf16>
    %255 = arith.truncf %252 : vector<8x256xf32> to vector<8x256xbf16>
    %cst_139 = arith.constant dense<0.000000e+00> : vector<8x256xf32>
    %256 = tpu.matmul %254, %255, %cst_139 {dimension_numbers = #tpu.dot_dimension_numbers<[1], [0], [0], [1], [0, 0, 1, 1], [], []>} : vector<8x8xbf16>, vector<8x256xbf16>, vector<8x256xf32> -> vector<8x256xf32>
    %c16_i32_140 = arith.constant 16 : i32
    %257 = tpu.dynamic_rotate %248 by %c16_i32_140 dim 1 : vector<8x256xf32>, i32 -> vector<8x256xf32>
    %258 = vector.extract_strided_slice %0 {offsets = [1, 0], sizes = [1, 256], strides = [1, 1]} : vector<9x256xf32> to vector<1x256xf32>
    %259 = vector.broadcast %258 : vector<1x256xf32> to vector<8x256xf32>
    %260 = arith.mulf %257, %259 : vector<8x256xf32>
    %c1_141 = arith.constant 1 : index
    %c0_142 = arith.constant 0 : index
    %c0_143 = arith.constant 0 : index
    %261 = vector.load %arg4[%c1_141, %c0_142, %c0_143] : memref<9x8x8xbf16, #tpu.memory_space<vmem>>, vector<1x8x8xbf16>
    %262 = vector.shape_cast %261 : vector<1x8x8xbf16> to vector<8x8xbf16>
    %263 = arith.truncf %260 : vector<8x256xf32> to vector<8x256xbf16>
    %cst_144 = arith.constant dense<0.000000e+00> : vector<8x256xf32>
    %264 = tpu.matmul %262, %263, %cst_144 {dimension_numbers = #tpu.dot_dimension_numbers<[1], [0], [0], [1], [0, 0, 1, 1], [], []>} : vector<8x8xbf16>, vector<8x256xbf16>, vector<8x256xf32> -> vector<8x256xf32>
    %265 = arith.addf %256, %264 : vector<8x256xf32>
    %c15_i32_145 = arith.constant 15 : i32
    %266 = tpu.dynamic_rotate %248 by %c15_i32_145 dim 1 : vector<8x256xf32>, i32 -> vector<8x256xf32>
    %267 = vector.extract_strided_slice %0 {offsets = [2, 0], sizes = [1, 256], strides = [1, 1]} : vector<9x256xf32> to vector<1x256xf32>
    %268 = vector.broadcast %267 : vector<1x256xf32> to vector<8x256xf32>
    %269 = arith.mulf %266, %268 : vector<8x256xf32>
    %c2_146 = arith.constant 2 : index
    %c0_147 = arith.constant 0 : index
    %c0_148 = arith.constant 0 : index
    %270 = vector.load %arg4[%c2_146, %c0_147, %c0_148] : memref<9x8x8xbf16, #tpu.memory_space<vmem>>, vector<1x8x8xbf16>
    %271 = vector.shape_cast %270 : vector<1x8x8xbf16> to vector<8x8xbf16>
    %272 = arith.truncf %269 : vector<8x256xf32> to vector<8x256xbf16>
    %cst_149 = arith.constant dense<0.000000e+00> : vector<8x256xf32>
    %273 = tpu.matmul %271, %272, %cst_149 {dimension_numbers = #tpu.dot_dimension_numbers<[1], [0], [0], [1], [0, 0, 1, 1], [], []>} : vector<8x8xbf16>, vector<8x256xbf16>, vector<8x256xf32> -> vector<8x256xf32>
    %274 = arith.addf %265, %273 : vector<8x256xf32>
    %c1_i32_150 = arith.constant 1 : i32
    %275 = tpu.dynamic_rotate %248 by %c1_i32_150 dim 1 : vector<8x256xf32>, i32 -> vector<8x256xf32>
    %276 = vector.extract_strided_slice %0 {offsets = [3, 0], sizes = [1, 256], strides = [1, 1]} : vector<9x256xf32> to vector<1x256xf32>
    %277 = vector.broadcast %276 : vector<1x256xf32> to vector<8x256xf32>
    %278 = arith.mulf %275, %277 : vector<8x256xf32>
    %c3_151 = arith.constant 3 : index
    %c0_152 = arith.constant 0 : index
    %c0_153 = arith.constant 0 : index
    %279 = vector.load %arg4[%c3_151, %c0_152, %c0_153] : memref<9x8x8xbf16, #tpu.memory_space<vmem>>, vector<1x8x8xbf16>
    %280 = vector.shape_cast %279 : vector<1x8x8xbf16> to vector<8x8xbf16>
    %281 = arith.truncf %278 : vector<8x256xf32> to vector<8x256xbf16>
    %cst_154 = arith.constant dense<0.000000e+00> : vector<8x256xf32>
    %282 = tpu.matmul %280, %281, %cst_154 {dimension_numbers = #tpu.dot_dimension_numbers<[1], [0], [0], [1], [0, 0, 1, 1], [], []>} : vector<8x8xbf16>, vector<8x256xbf16>, vector<8x256xf32> -> vector<8x256xf32>
    %283 = arith.addf %274, %282 : vector<8x256xf32>
    %c4_155 = arith.constant 4 : index
    %c0_156 = arith.constant 0 : index
    %c0_157 = arith.constant 0 : index
    %284 = vector.load %arg4[%c4_155, %c0_156, %c0_157] : memref<9x8x8xbf16, #tpu.memory_space<vmem>>, vector<1x8x8xbf16>
    %285 = vector.shape_cast %284 : vector<1x8x8xbf16> to vector<8x8xbf16>
    %286 = arith.truncf %248 : vector<8x256xf32> to vector<8x256xbf16>
    %cst_158 = arith.constant dense<0.000000e+00> : vector<8x256xf32>
    %287 = tpu.matmul %285, %286, %cst_158 {dimension_numbers = #tpu.dot_dimension_numbers<[1], [0], [0], [1], [0, 0, 1, 1], [], []>} : vector<8x8xbf16>, vector<8x256xbf16>, vector<8x256xf32> -> vector<8x256xf32>
    %288 = arith.addf %283, %287 : vector<8x256xf32>
    %c255_i32_159 = arith.constant 255 : i32
    %289 = tpu.dynamic_rotate %248 by %c255_i32_159 dim 1 : vector<8x256xf32>, i32 -> vector<8x256xf32>
    %290 = vector.extract_strided_slice %0 {offsets = [5, 0], sizes = [1, 256], strides = [1, 1]} : vector<9x256xf32> to vector<1x256xf32>
    %291 = vector.broadcast %290 : vector<1x256xf32> to vector<8x256xf32>
    %292 = arith.mulf %289, %291 : vector<8x256xf32>
    %c5_160 = arith.constant 5 : index
    %c0_161 = arith.constant 0 : index
    %c0_162 = arith.constant 0 : index
    %293 = vector.load %arg4[%c5_160, %c0_161, %c0_162] : memref<9x8x8xbf16, #tpu.memory_space<vmem>>, vector<1x8x8xbf16>
    %294 = vector.shape_cast %293 : vector<1x8x8xbf16> to vector<8x8xbf16>
    %295 = arith.truncf %292 : vector<8x256xf32> to vector<8x256xbf16>
    %cst_163 = arith.constant dense<0.000000e+00> : vector<8x256xf32>
    %296 = tpu.matmul %294, %295, %cst_163 {dimension_numbers = #tpu.dot_dimension_numbers<[1], [0], [0], [1], [0, 0, 1, 1], [], []>} : vector<8x8xbf16>, vector<8x256xbf16>, vector<8x256xf32> -> vector<8x256xf32>
    %297 = arith.addf %288, %296 : vector<8x256xf32>
    %c241_i32_164 = arith.constant 241 : i32
    %298 = tpu.dynamic_rotate %248 by %c241_i32_164 dim 1 : vector<8x256xf32>, i32 -> vector<8x256xf32>
    %299 = vector.extract_strided_slice %0 {offsets = [6, 0], sizes = [1, 256], strides = [1, 1]} : vector<9x256xf32> to vector<1x256xf32>
    %300 = vector.broadcast %299 : vector<1x256xf32> to vector<8x256xf32>
    %301 = arith.mulf %298, %300 : vector<8x256xf32>
    %c6_165 = arith.constant 6 : index
    %c0_166 = arith.constant 0 : index
    %c0_167 = arith.constant 0 : index
    %302 = vector.load %arg4[%c6_165, %c0_166, %c0_167] : memref<9x8x8xbf16, #tpu.memory_space<vmem>>, vector<1x8x8xbf16>
    %303 = vector.shape_cast %302 : vector<1x8x8xbf16> to vector<8x8xbf16>
    %304 = arith.truncf %301 : vector<8x256xf32> to vector<8x256xbf16>
    %cst_168 = arith.constant dense<0.000000e+00> : vector<8x256xf32>
    %305 = tpu.matmul %303, %304, %cst_168 {dimension_numbers = #tpu.dot_dimension_numbers<[1], [0], [0], [1], [0, 0, 1, 1], [], []>} : vector<8x8xbf16>, vector<8x256xbf16>, vector<8x256xf32> -> vector<8x256xf32>
    %306 = arith.addf %297, %305 : vector<8x256xf32>
    %c240_i32_169 = arith.constant 240 : i32
    %307 = tpu.dynamic_rotate %248 by %c240_i32_169 dim 1 : vector<8x256xf32>, i32 -> vector<8x256xf32>
    %308 = vector.extract_strided_slice %0 {offsets = [7, 0], sizes = [1, 256], strides = [1, 1]} : vector<9x256xf32> to vector<1x256xf32>
    %309 = vector.broadcast %308 : vector<1x256xf32> to vector<8x256xf32>
    %310 = arith.mulf %307, %309 : vector<8x256xf32>
    %c7_170 = arith.constant 7 : index
    %c0_171 = arith.constant 0 : index
    %c0_172 = arith.constant 0 : index
    %311 = vector.load %arg4[%c7_170, %c0_171, %c0_172] : memref<9x8x8xbf16, #tpu.memory_space<vmem>>, vector<1x8x8xbf16>
    %312 = vector.shape_cast %311 : vector<1x8x8xbf16> to vector<8x8xbf16>
    %313 = arith.truncf %310 : vector<8x256xf32> to vector<8x256xbf16>
    %cst_173 = arith.constant dense<0.000000e+00> : vector<8x256xf32>
    %314 = tpu.matmul %312, %313, %cst_173 {dimension_numbers = #tpu.dot_dimension_numbers<[1], [0], [0], [1], [0, 0, 1, 1], [], []>} : vector<8x8xbf16>, vector<8x256xbf16>, vector<8x256xf32> -> vector<8x256xf32>
    %315 = arith.addf %306, %314 : vector<8x256xf32>
    %c239_i32_174 = arith.constant 239 : i32
    %316 = tpu.dynamic_rotate %248 by %c239_i32_174 dim 1 : vector<8x256xf32>, i32 -> vector<8x256xf32>
    %317 = vector.extract_strided_slice %0 {offsets = [8, 0], sizes = [1, 256], strides = [1, 1]} : vector<9x256xf32> to vector<1x256xf32>
    %318 = vector.broadcast %317 : vector<1x256xf32> to vector<8x256xf32>
    %319 = arith.mulf %316, %318 : vector<8x256xf32>
    %c8_175 = arith.constant 8 : index
    %c0_176 = arith.constant 0 : index
    %c0_177 = arith.constant 0 : index
    %320 = vector.load %arg4[%c8_175, %c0_176, %c0_177] : memref<9x8x8xbf16, #tpu.memory_space<vmem>>, vector<1x8x8xbf16>
    %321 = vector.shape_cast %320 : vector<1x8x8xbf16> to vector<8x8xbf16>
    %322 = arith.truncf %319 : vector<8x256xf32> to vector<8x256xbf16>
    %cst_178 = arith.constant dense<0.000000e+00> : vector<8x256xf32>
    %323 = tpu.matmul %321, %322, %cst_178 {dimension_numbers = #tpu.dot_dimension_numbers<[1], [0], [0], [1], [0, 0, 1, 1], [], []>} : vector<8x8xbf16>, vector<8x256xbf16>, vector<8x256xf32> -> vector<8x256xf32>
    %324 = arith.addf %315, %323 : vector<8x256xf32>
    %325 = arith.addf %168, %324 : vector<8x256xf32>
    %c1_179 = arith.constant 1 : index
    %c0_180 = arith.constant 0 : index
    %c0_181 = arith.constant 0 : index
    %326 = vector.load %arg6[%c1_179, %c0_180, %c0_181] : memref<2x8x256xf32, #tpu.memory_space<vmem>>, vector<1x8x256xf32>
    %327 = vector.shape_cast %326 : vector<1x8x256xf32> to vector<8x256xf32>
    %328 = vector.shape_cast %325 : vector<8x256xf32> to vector<1x8x256xf32>
    tpu.vector_store %arg6[%c1_179, %c0_180, %c0_181], %328 {strides = array<i32>} : memref<2x8x256xf32, #tpu.memory_space<vmem>>, vector<1x8x256xf32>,
    return
  }
  func.func @transform_0(%arg0: i32) -> (i32, i32, i32) {
    %c0_i32 = arith.constant 0 : i32
    %c0_i32_0 = arith.constant 0 : i32
    %c0_i32_1 = arith.constant 0 : i32
    return %arg0, %c0_i32, %c0_i32_0 : i32, i32, i32
  }
  func.func @transform_1(%arg0: i32) -> (i32, i32, i32) {
    %c0_i32 = arith.constant 0 : i32
    %c0_i32_0 = arith.constant 0 : i32
    %c0_i32_1 = arith.constant 0 : i32
    return %arg0, %c0_i32, %c0_i32_0 : i32, i32, i32
  }
  func.func @transform_2(%arg0: i32) -> (i32, i32, i32) {
    %c0_i32 = arith.constant 0 : i32
    %c0_i32_0 = arith.constant 0 : i32
    %c0_i32_1 = arith.constant 0 : i32
    %c0_i32_2 = arith.constant 0 : i32
    return %c0_i32, %c0_i32_0, %c0_i32_1 : i32, i32, i32
  }
  func.func @transform_3(%arg0: i32) -> (i32, i32, i32) {
    %c0_i32 = arith.constant 0 : i32
    %c0_i32_0 = arith.constant 0 : i32
    %c0_i32_1 = arith.constant 0 : i32
    %c0_i32_2 = arith.constant 0 : i32
    return %c0_i32, %c0_i32_0, %c0_i32_1 : i32, i32, i32
  }
  func.func @transform_4(%arg0: i32) -> (i32, i32) {
    %c0_i32 = arith.constant 0 : i32
    %c0_i32_0 = arith.constant 0 : i32
    %c0_i32_1 = arith.constant 0 : i32
    return %c0_i32, %c0_i32_0 : i32, i32
  }
  func.func @transform_5(%arg0: i32) -> (i32, i32, i32) {
    %c0_i32 = arith.constant 0 : i32
    %c0_i32_0 = arith.constant 0 : i32
    %c0_i32_1 = arith.constant 0 : i32
    return %arg0, %c0_i32, %c0_i32_0 : i32, i32, i32
  }
}

module attributes {stable_mosaic.version = 11 : i64} {
  func.func @_residual_unit_kernel(%arg0: i32, %arg1: memref<2x8x256xf32, #tpu.memory_space<vmem>>, %arg2: memref<2x8x256xf32, #tpu.memory_space<vmem>>, %arg3: memref<9x8x8xbf16, #tpu.memory_space<vmem>>, %arg4: memref<9x8x8xbf16, #tpu.memory_space<vmem>>, %arg5: memref<9x256xf32, #tpu.memory_space<vmem>>, %arg6: memref<2x8x256xf32, #tpu.memory_space<vmem>>) attributes {dimension_semantics = [#tpu.dimension_semantics<parallel>], iteration_bounds = array<i64: 2>, scalar_prefetch = 0 : i64, scratch_operands = 0 : i64, tpu.core_type = #tpu.core_type<tc>, window_params = [{transform_indices = @transform_0, window_bounds = array<i64: 2, 8, 256>}, {transform_indices = @transform_1, window_bounds = array<i64: 2, 8, 256>}, {pipeline_mode = #tpu.pipeline_mode<synchronous>, transform_indices = @transform_2, window_bounds = array<i64: 9, 8, 8>}, {pipeline_mode = #tpu.pipeline_mode<synchronous>, transform_indices = @transform_3, window_bounds = array<i64: 9, 8, 8>}, {pipeline_mode = #tpu.pipeline_mode<synchronous>, transform_indices = @transform_4, window_bounds = array<i64: 9, 256>}, {transform_indices = @transform_5, window_bounds = array<i64: 2, 8, 256>}]} {
    %c0 = arith.constant 0 : index
    %c0_0 = arith.constant 0 : index
    %0 = vector.load %arg5[%c0, %c0_0] : memref<9x256xf32, #tpu.memory_space<vmem>>, vector<9x256xf32>
    %c0_1 = arith.constant 0 : index
    %c0_2 = arith.constant 0 : index
    %c0_3 = arith.constant 0 : index
    %1 = vector.load %arg1[%c0_1, %c0_2, %c0_3] : memref<2x8x256xf32, #tpu.memory_space<vmem>>, vector<1x8x256xf32>
    %2 = vector.shape_cast %1 : vector<1x8x256xf32> to vector<8x256xf32>
    %c0_4 = arith.constant 0 : index
    %c0_5 = arith.constant 0 : index
    %c0_6 = arith.constant 0 : index
    %3 = vector.load %arg2[%c0_4, %c0_5, %c0_6] : memref<2x8x256xf32, #tpu.memory_space<vmem>>, vector<1x8x256xf32>
    %4 = vector.shape_cast %3 : vector<1x8x256xf32> to vector<8x256xf32>
    %cst = arith.constant 0.000000e+00 : f32
    %5 = vector.broadcast %cst : f32 to vector<8x256xf32>
    %6 = arith.maximumf %2, %5 : vector<8x256xf32>
    %c17_i32 = arith.constant 17 : i32
    %7 = tpu.dynamic_rotate %6 by %c17_i32 dim 1 : vector<8x256xf32>, i32 -> vector<8x256xf32>
    %8 = vector.extract_strided_slice %0 {offsets = [0, 0], sizes = [1, 256], strides = [1, 1]} : vector<9x256xf32> to vector<1x256xf32>
    %9 = vector.broadcast %8 : vector<1x256xf32> to vector<8x256xf32>
    %10 = arith.mulf %7, %9 : vector<8x256xf32>
    %c0_7 = arith.constant 0 : index
    %c0_8 = arith.constant 0 : index
    %c0_9 = arith.constant 0 : index
    %11 = vector.load %arg3[%c0_7, %c0_8, %c0_9] : memref<9x8x8xbf16, #tpu.memory_space<vmem>>, vector<1x8x8xbf16>
    %12 = vector.shape_cast %11 : vector<1x8x8xbf16> to vector<8x8xbf16>
    %13 = arith.truncf %10 : vector<8x256xf32> to vector<8x256xbf16>
    %cst_10 = arith.constant dense<0.000000e+00> : vector<8x256xf32>
    %14 = tpu.matmul %12, %13, %cst_10 {dimension_numbers = #tpu.dot_dimension_numbers<[1], [0], [0], [1], [0, 0, 1, 1], [], []>} : vector<8x8xbf16>, vector<8x256xbf16>, vector<8x256xf32> -> vector<8x256xf32>
    %c16_i32 = arith.constant 16 : i32
    %15 = tpu.dynamic_rotate %6 by %c16_i32 dim 1 : vector<8x256xf32>, i32 -> vector<8x256xf32>
    %16 = vector.extract_strided_slice %0 {offsets = [1, 0], sizes = [1, 256], strides = [1, 1]} : vector<9x256xf32> to vector<1x256xf32>
    %17 = vector.broadcast %16 : vector<1x256xf32> to vector<8x256xf32>
    %18 = arith.mulf %15, %17 : vector<8x256xf32>
    %c1 = arith.constant 1 : index
    %c0_11 = arith.constant 0 : index
    %c0_12 = arith.constant 0 : index
    %19 = vector.load %arg3[%c1, %c0_11, %c0_12] : memref<9x8x8xbf16, #tpu.memory_space<vmem>>, vector<1x8x8xbf16>
    %20 = vector.shape_cast %19 : vector<1x8x8xbf16> to vector<8x8xbf16>
    %21 = arith.truncf %18 : vector<8x256xf32> to vector<8x256xbf16>
    %cst_13 = arith.constant dense<0.000000e+00> : vector<8x256xf32>
    %22 = tpu.matmul %20, %21, %cst_13 {dimension_numbers = #tpu.dot_dimension_numbers<[1], [0], [0], [1], [0, 0, 1, 1], [], []>} : vector<8x8xbf16>, vector<8x256xbf16>, vector<8x256xf32> -> vector<8x256xf32>
    %23 = arith.addf %14, %22 : vector<8x256xf32>
    %c15_i32 = arith.constant 15 : i32
    %24 = tpu.dynamic_rotate %6 by %c15_i32 dim 1 : vector<8x256xf32>, i32 -> vector<8x256xf32>
    %25 = vector.extract_strided_slice %0 {offsets = [2, 0], sizes = [1, 256], strides = [1, 1]} : vector<9x256xf32> to vector<1x256xf32>
    %26 = vector.broadcast %25 : vector<1x256xf32> to vector<8x256xf32>
    %27 = arith.mulf %24, %26 : vector<8x256xf32>
    %c2 = arith.constant 2 : index
    %c0_14 = arith.constant 0 : index
    %c0_15 = arith.constant 0 : index
    %28 = vector.load %arg3[%c2, %c0_14, %c0_15] : memref<9x8x8xbf16, #tpu.memory_space<vmem>>, vector<1x8x8xbf16>
    %29 = vector.shape_cast %28 : vector<1x8x8xbf16> to vector<8x8xbf16>
    %30 = arith.truncf %27 : vector<8x256xf32> to vector<8x256xbf16>
    %cst_16 = arith.constant dense<0.000000e+00> : vector<8x256xf32>
    %31 = tpu.matmul %29, %30, %cst_16 {dimension_numbers = #tpu.dot_dimension_numbers<[1], [0], [0], [1], [0, 0, 1, 1], [], []>} : vector<8x8xbf16>, vector<8x256xbf16>, vector<8x256xf32> -> vector<8x256xf32>
    %32 = arith.addf %23, %31 : vector<8x256xf32>
    %c1_i32 = arith.constant 1 : i32
    %33 = tpu.dynamic_rotate %6 by %c1_i32 dim 1 : vector<8x256xf32>, i32 -> vector<8x256xf32>
    %34 = vector.extract_strided_slice %0 {offsets = [3, 0], sizes = [1, 256], strides = [1, 1]} : vector<9x256xf32> to vector<1x256xf32>
    %35 = vector.broadcast %34 : vector<1x256xf32> to vector<8x256xf32>
    %36 = arith.mulf %33, %35 : vector<8x256xf32>
    %c3 = arith.constant 3 : index
    %c0_17 = arith.constant 0 : index
    %c0_18 = arith.constant 0 : index
    %37 = vector.load %arg3[%c3, %c0_17, %c0_18] : memref<9x8x8xbf16, #tpu.memory_space<vmem>>, vector<1x8x8xbf16>
    %38 = vector.shape_cast %37 : vector<1x8x8xbf16> to vector<8x8xbf16>
    %39 = arith.truncf %36 : vector<8x256xf32> to vector<8x256xbf16>
    %cst_19 = arith.constant dense<0.000000e+00> : vector<8x256xf32>
    %40 = tpu.matmul %38, %39, %cst_19 {dimension_numbers = #tpu.dot_dimension_numbers<[1], [0], [0], [1], [0, 0, 1, 1], [], []>} : vector<8x8xbf16>, vector<8x256xbf16>, vector<8x256xf32> -> vector<8x256xf32>
    %41 = arith.addf %32, %40 : vector<8x256xf32>
    %c4 = arith.constant 4 : index
    %c0_20 = arith.constant 0 : index
    %c0_21 = arith.constant 0 : index
    %42 = vector.load %arg3[%c4, %c0_20, %c0_21] : memref<9x8x8xbf16, #tpu.memory_space<vmem>>, vector<1x8x8xbf16>
    %43 = vector.shape_cast %42 : vector<1x8x8xbf16> to vector<8x8xbf16>
    %44 = arith.truncf %6 : vector<8x256xf32> to vector<8x256xbf16>
    %cst_22 = arith.constant dense<0.000000e+00> : vector<8x256xf32>
    %45 = tpu.matmul %43, %44, %cst_22 {dimension_numbers = #tpu.dot_dimension_numbers<[1], [0], [0], [1], [0, 0, 1, 1], [], []>} : vector<8x8xbf16>, vector<8x256xbf16>, vector<8x256xf32> -> vector<8x256xf32>
    %46 = arith.addf %41, %45 : vector<8x256xf32>
    %c255_i32 = arith.constant 255 : i32
    %47 = tpu.dynamic_rotate %6 by %c255_i32 dim 1 : vector<8x256xf32>, i32 -> vector<8x256xf32>
    %48 = vector.extract_strided_slice %0 {offsets = [5, 0], sizes = [1, 256], strides = [1, 1]} : vector<9x256xf32> to vector<1x256xf32>
    %49 = vector.broadcast %48 : vector<1x256xf32> to vector<8x256xf32>
    %50 = arith.mulf %47, %49 : vector<8x256xf32>
    %c5 = arith.constant 5 : index
    %c0_23 = arith.constant 0 : index
    %c0_24 = arith.constant 0 : index
    %51 = vector.load %arg3[%c5, %c0_23, %c0_24] : memref<9x8x8xbf16, #tpu.memory_space<vmem>>, vector<1x8x8xbf16>
    %52 = vector.shape_cast %51 : vector<1x8x8xbf16> to vector<8x8xbf16>
    %53 = arith.truncf %50 : vector<8x256xf32> to vector<8x256xbf16>
    %cst_25 = arith.constant dense<0.000000e+00> : vector<8x256xf32>
    %54 = tpu.matmul %52, %53, %cst_25 {dimension_numbers = #tpu.dot_dimension_numbers<[1], [0], [0], [1], [0, 0, 1, 1], [], []>} : vector<8x8xbf16>, vector<8x256xbf16>, vector<8x256xf32> -> vector<8x256xf32>
    %55 = arith.addf %46, %54 : vector<8x256xf32>
    %c241_i32 = arith.constant 241 : i32
    %56 = tpu.dynamic_rotate %6 by %c241_i32 dim 1 : vector<8x256xf32>, i32 -> vector<8x256xf32>
    %57 = vector.extract_strided_slice %0 {offsets = [6, 0], sizes = [1, 256], strides = [1, 1]} : vector<9x256xf32> to vector<1x256xf32>
    %58 = vector.broadcast %57 : vector<1x256xf32> to vector<8x256xf32>
    %59 = arith.mulf %56, %58 : vector<8x256xf32>
    %c6 = arith.constant 6 : index
    %c0_26 = arith.constant 0 : index
    %c0_27 = arith.constant 0 : index
    %60 = vector.load %arg3[%c6, %c0_26, %c0_27] : memref<9x8x8xbf16, #tpu.memory_space<vmem>>, vector<1x8x8xbf16>
    %61 = vector.shape_cast %60 : vector<1x8x8xbf16> to vector<8x8xbf16>
    %62 = arith.truncf %59 : vector<8x256xf32> to vector<8x256xbf16>
    %cst_28 = arith.constant dense<0.000000e+00> : vector<8x256xf32>
    %63 = tpu.matmul %61, %62, %cst_28 {dimension_numbers = #tpu.dot_dimension_numbers<[1], [0], [0], [1], [0, 0, 1, 1], [], []>} : vector<8x8xbf16>, vector<8x256xbf16>, vector<8x256xf32> -> vector<8x256xf32>
    %64 = arith.addf %55, %63 : vector<8x256xf32>
    %c240_i32 = arith.constant 240 : i32
    %65 = tpu.dynamic_rotate %6 by %c240_i32 dim 1 : vector<8x256xf32>, i32 -> vector<8x256xf32>
    %66 = vector.extract_strided_slice %0 {offsets = [7, 0], sizes = [1, 256], strides = [1, 1]} : vector<9x256xf32> to vector<1x256xf32>
    %67 = vector.broadcast %66 : vector<1x256xf32> to vector<8x256xf32>
    %68 = arith.mulf %65, %67 : vector<8x256xf32>
    %c7 = arith.constant 7 : index
    %c0_29 = arith.constant 0 : index
    %c0_30 = arith.constant 0 : index
    %69 = vector.load %arg3[%c7, %c0_29, %c0_30] : memref<9x8x8xbf16, #tpu.memory_space<vmem>>, vector<1x8x8xbf16>
    %70 = vector.shape_cast %69 : vector<1x8x8xbf16> to vector<8x8xbf16>
    %71 = arith.truncf %68 : vector<8x256xf32> to vector<8x256xbf16>
    %cst_31 = arith.constant dense<0.000000e+00> : vector<8x256xf32>
    %72 = tpu.matmul %70, %71, %cst_31 {dimension_numbers = #tpu.dot_dimension_numbers<[1], [0], [0], [1], [0, 0, 1, 1], [], []>} : vector<8x8xbf16>, vector<8x256xbf16>, vector<8x256xf32> -> vector<8x256xf32>
    %73 = arith.addf %64, %72 : vector<8x256xf32>
    %c239_i32 = arith.constant 239 : i32
    %74 = tpu.dynamic_rotate %6 by %c239_i32 dim 1 : vector<8x256xf32>, i32 -> vector<8x256xf32>
    %75 = vector.extract_strided_slice %0 {offsets = [8, 0], sizes = [1, 256], strides = [1, 1]} : vector<9x256xf32> to vector<1x256xf32>
    %76 = vector.broadcast %75 : vector<1x256xf32> to vector<8x256xf32>
    %77 = arith.mulf %74, %76 : vector<8x256xf32>
    %c8 = arith.constant 8 : index
    %c0_32 = arith.constant 0 : index
    %c0_33 = arith.constant 0 : index
    %78 = vector.load %arg3[%c8, %c0_32, %c0_33] : memref<9x8x8xbf16, #tpu.memory_space<vmem>>, vector<1x8x8xbf16>
    %79 = vector.shape_cast %78 : vector<1x8x8xbf16> to vector<8x8xbf16>
    %80 = arith.truncf %77 : vector<8x256xf32> to vector<8x256xbf16>
    %cst_34 = arith.constant dense<0.000000e+00> : vector<8x256xf32>
    %81 = tpu.matmul %79, %80, %cst_34 {dimension_numbers = #tpu.dot_dimension_numbers<[1], [0], [0], [1], [0, 0, 1, 1], [], []>} : vector<8x8xbf16>, vector<8x256xbf16>, vector<8x256xf32> -> vector<8x256xf32>
    %82 = arith.addf %73, %81 : vector<8x256xf32>
    %cst_35 = arith.constant 0.000000e+00 : f32
    %83 = vector.broadcast %cst_35 : f32 to vector<8x256xf32>
    %84 = arith.maximumf %82, %83 : vector<8x256xf32>
    %c17_i32_36 = arith.constant 17 : i32
    %85 = tpu.dynamic_rotate %84 by %c17_i32_36 dim 1 : vector<8x256xf32>, i32 -> vector<8x256xf32>
    %86 = vector.extract_strided_slice %0 {offsets = [0, 0], sizes = [1, 256], strides = [1, 1]} : vector<9x256xf32> to vector<1x256xf32>
    %87 = vector.broadcast %86 : vector<1x256xf32> to vector<8x256xf32>
    %88 = arith.mulf %85, %87 : vector<8x256xf32>
    %c0_37 = arith.constant 0 : index
    %c0_38 = arith.constant 0 : index
    %c0_39 = arith.constant 0 : index
    %89 = vector.load %arg4[%c0_37, %c0_38, %c0_39] : memref<9x8x8xbf16, #tpu.memory_space<vmem>>, vector<1x8x8xbf16>
    %90 = vector.shape_cast %89 : vector<1x8x8xbf16> to vector<8x8xbf16>
    %91 = arith.truncf %88 : vector<8x256xf32> to vector<8x256xbf16>
    %cst_40 = arith.constant dense<0.000000e+00> : vector<8x256xf32>
    %92 = tpu.matmul %90, %91, %cst_40 {dimension_numbers = #tpu.dot_dimension_numbers<[1], [0], [0], [1], [0, 0, 1, 1], [], []>} : vector<8x8xbf16>, vector<8x256xbf16>, vector<8x256xf32> -> vector<8x256xf32>
    %c16_i32_41 = arith.constant 16 : i32
    %93 = tpu.dynamic_rotate %84 by %c16_i32_41 dim 1 : vector<8x256xf32>, i32 -> vector<8x256xf32>
    %94 = vector.extract_strided_slice %0 {offsets = [1, 0], sizes = [1, 256], strides = [1, 1]} : vector<9x256xf32> to vector<1x256xf32>
    %95 = vector.broadcast %94 : vector<1x256xf32> to vector<8x256xf32>
    %96 = arith.mulf %93, %95 : vector<8x256xf32>
    %c1_42 = arith.constant 1 : index
    %c0_43 = arith.constant 0 : index
    %c0_44 = arith.constant 0 : index
    %97 = vector.load %arg4[%c1_42, %c0_43, %c0_44] : memref<9x8x8xbf16, #tpu.memory_space<vmem>>, vector<1x8x8xbf16>
    %98 = vector.shape_cast %97 : vector<1x8x8xbf16> to vector<8x8xbf16>
    %99 = arith.truncf %96 : vector<8x256xf32> to vector<8x256xbf16>
    %cst_45 = arith.constant dense<0.000000e+00> : vector<8x256xf32>
    %100 = tpu.matmul %98, %99, %cst_45 {dimension_numbers = #tpu.dot_dimension_numbers<[1], [0], [0], [1], [0, 0, 1, 1], [], []>} : vector<8x8xbf16>, vector<8x256xbf16>, vector<8x256xf32> -> vector<8x256xf32>
    %101 = arith.addf %92, %100 : vector<8x256xf32>
    %c15_i32_46 = arith.constant 15 : i32
    %102 = tpu.dynamic_rotate %84 by %c15_i32_46 dim 1 : vector<8x256xf32>, i32 -> vector<8x256xf32>
    %103 = vector.extract_strided_slice %0 {offsets = [2, 0], sizes = [1, 256], strides = [1, 1]} : vector<9x256xf32> to vector<1x256xf32>
    %104 = vector.broadcast %103 : vector<1x256xf32> to vector<8x256xf32>
    %105 = arith.mulf %102, %104 : vector<8x256xf32>
    %c2_47 = arith.constant 2 : index
    %c0_48 = arith.constant 0 : index
    %c0_49 = arith.constant 0 : index
    %106 = vector.load %arg4[%c2_47, %c0_48, %c0_49] : memref<9x8x8xbf16, #tpu.memory_space<vmem>>, vector<1x8x8xbf16>
    %107 = vector.shape_cast %106 : vector<1x8x8xbf16> to vector<8x8xbf16>
    %108 = arith.truncf %105 : vector<8x256xf32> to vector<8x256xbf16>
    %cst_50 = arith.constant dense<0.000000e+00> : vector<8x256xf32>
    %109 = tpu.matmul %107, %108, %cst_50 {dimension_numbers = #tpu.dot_dimension_numbers<[1], [0], [0], [1], [0, 0, 1, 1], [], []>} : vector<8x8xbf16>, vector<8x256xbf16>, vector<8x256xf32> -> vector<8x256xf32>
    %110 = arith.addf %101, %109 : vector<8x256xf32>
    %c1_i32_51 = arith.constant 1 : i32
    %111 = tpu.dynamic_rotate %84 by %c1_i32_51 dim 1 : vector<8x256xf32>, i32 -> vector<8x256xf32>
    %112 = vector.extract_strided_slice %0 {offsets = [3, 0], sizes = [1, 256], strides = [1, 1]} : vector<9x256xf32> to vector<1x256xf32>
    %113 = vector.broadcast %112 : vector<1x256xf32> to vector<8x256xf32>
    %114 = arith.mulf %111, %113 : vector<8x256xf32>
    %c3_52 = arith.constant 3 : index
    %c0_53 = arith.constant 0 : index
    %c0_54 = arith.constant 0 : index
    %115 = vector.load %arg4[%c3_52, %c0_53, %c0_54] : memref<9x8x8xbf16, #tpu.memory_space<vmem>>, vector<1x8x8xbf16>
    %116 = vector.shape_cast %115 : vector<1x8x8xbf16> to vector<8x8xbf16>
    %117 = arith.truncf %114 : vector<8x256xf32> to vector<8x256xbf16>
    %cst_55 = arith.constant dense<0.000000e+00> : vector<8x256xf32>
    %118 = tpu.matmul %116, %117, %cst_55 {dimension_numbers = #tpu.dot_dimension_numbers<[1], [0], [0], [1], [0, 0, 1, 1], [], []>} : vector<8x8xbf16>, vector<8x256xbf16>, vector<8x256xf32> -> vector<8x256xf32>
    %119 = arith.addf %110, %118 : vector<8x256xf32>
    %c4_56 = arith.constant 4 : index
    %c0_57 = arith.constant 0 : index
    %c0_58 = arith.constant 0 : index
    %120 = vector.load %arg4[%c4_56, %c0_57, %c0_58] : memref<9x8x8xbf16, #tpu.memory_space<vmem>>, vector<1x8x8xbf16>
    %121 = vector.shape_cast %120 : vector<1x8x8xbf16> to vector<8x8xbf16>
    %122 = arith.truncf %84 : vector<8x256xf32> to vector<8x256xbf16>
    %cst_59 = arith.constant dense<0.000000e+00> : vector<8x256xf32>
    %123 = tpu.matmul %121, %122, %cst_59 {dimension_numbers = #tpu.dot_dimension_numbers<[1], [0], [0], [1], [0, 0, 1, 1], [], []>} : vector<8x8xbf16>, vector<8x256xbf16>, vector<8x256xf32> -> vector<8x256xf32>
    %124 = arith.addf %119, %123 : vector<8x256xf32>
    %c255_i32_60 = arith.constant 255 : i32
    %125 = tpu.dynamic_rotate %84 by %c255_i32_60 dim 1 : vector<8x256xf32>, i32 -> vector<8x256xf32>
    %126 = vector.extract_strided_slice %0 {offsets = [5, 0], sizes = [1, 256], strides = [1, 1]} : vector<9x256xf32> to vector<1x256xf32>
    %127 = vector.broadcast %126 : vector<1x256xf32> to vector<8x256xf32>
    %128 = arith.mulf %125, %127 : vector<8x256xf32>
    %c5_61 = arith.constant 5 : index
    %c0_62 = arith.constant 0 : index
    %c0_63 = arith.constant 0 : index
    %129 = vector.load %arg4[%c5_61, %c0_62, %c0_63] : memref<9x8x8xbf16, #tpu.memory_space<vmem>>, vector<1x8x8xbf16>
    %130 = vector.shape_cast %129 : vector<1x8x8xbf16> to vector<8x8xbf16>
    %131 = arith.truncf %128 : vector<8x256xf32> to vector<8x256xbf16>
    %cst_64 = arith.constant dense<0.000000e+00> : vector<8x256xf32>
    %132 = tpu.matmul %130, %131, %cst_64 {dimension_numbers = #tpu.dot_dimension_numbers<[1], [0], [0], [1], [0, 0, 1, 1], [], []>} : vector<8x8xbf16>, vector<8x256xbf16>, vector<8x256xf32> -> vector<8x256xf32>
    %133 = arith.addf %124, %132 : vector<8x256xf32>
    %c241_i32_65 = arith.constant 241 : i32
    %134 = tpu.dynamic_rotate %84 by %c241_i32_65 dim 1 : vector<8x256xf32>, i32 -> vector<8x256xf32>
    %135 = vector.extract_strided_slice %0 {offsets = [6, 0], sizes = [1, 256], strides = [1, 1]} : vector<9x256xf32> to vector<1x256xf32>
    %136 = vector.broadcast %135 : vector<1x256xf32> to vector<8x256xf32>
    %137 = arith.mulf %134, %136 : vector<8x256xf32>
    %c6_66 = arith.constant 6 : index
    %c0_67 = arith.constant 0 : index
    %c0_68 = arith.constant 0 : index
    %138 = vector.load %arg4[%c6_66, %c0_67, %c0_68] : memref<9x8x8xbf16, #tpu.memory_space<vmem>>, vector<1x8x8xbf16>
    %139 = vector.shape_cast %138 : vector<1x8x8xbf16> to vector<8x8xbf16>
    %140 = arith.truncf %137 : vector<8x256xf32> to vector<8x256xbf16>
    %cst_69 = arith.constant dense<0.000000e+00> : vector<8x256xf32>
    %141 = tpu.matmul %139, %140, %cst_69 {dimension_numbers = #tpu.dot_dimension_numbers<[1], [0], [0], [1], [0, 0, 1, 1], [], []>} : vector<8x8xbf16>, vector<8x256xbf16>, vector<8x256xf32> -> vector<8x256xf32>
    %142 = arith.addf %133, %141 : vector<8x256xf32>
    %c240_i32_70 = arith.constant 240 : i32
    %143 = tpu.dynamic_rotate %84 by %c240_i32_70 dim 1 : vector<8x256xf32>, i32 -> vector<8x256xf32>
    %144 = vector.extract_strided_slice %0 {offsets = [7, 0], sizes = [1, 256], strides = [1, 1]} : vector<9x256xf32> to vector<1x256xf32>
    %145 = vector.broadcast %144 : vector<1x256xf32> to vector<8x256xf32>
    %146 = arith.mulf %143, %145 : vector<8x256xf32>
    %c7_71 = arith.constant 7 : index
    %c0_72 = arith.constant 0 : index
    %c0_73 = arith.constant 0 : index
    %147 = vector.load %arg4[%c7_71, %c0_72, %c0_73] : memref<9x8x8xbf16, #tpu.memory_space<vmem>>, vector<1x8x8xbf16>
    %148 = vector.shape_cast %147 : vector<1x8x8xbf16> to vector<8x8xbf16>
    %149 = arith.truncf %146 : vector<8x256xf32> to vector<8x256xbf16>
    %cst_74 = arith.constant dense<0.000000e+00> : vector<8x256xf32>
    %150 = tpu.matmul %148, %149, %cst_74 {dimension_numbers = #tpu.dot_dimension_numbers<[1], [0], [0], [1], [0, 0, 1, 1], [], []>} : vector<8x8xbf16>, vector<8x256xbf16>, vector<8x256xf32> -> vector<8x256xf32>
    %151 = arith.addf %142, %150 : vector<8x256xf32>
    %c239_i32_75 = arith.constant 239 : i32
    %152 = tpu.dynamic_rotate %84 by %c239_i32_75 dim 1 : vector<8x256xf32>, i32 -> vector<8x256xf32>
    %153 = vector.extract_strided_slice %0 {offsets = [8, 0], sizes = [1, 256], strides = [1, 1]} : vector<9x256xf32> to vector<1x256xf32>
    %154 = vector.broadcast %153 : vector<1x256xf32> to vector<8x256xf32>
    %155 = arith.mulf %152, %154 : vector<8x256xf32>
    %c8_76 = arith.constant 8 : index
    %c0_77 = arith.constant 0 : index
    %c0_78 = arith.constant 0 : index
    %156 = vector.load %arg4[%c8_76, %c0_77, %c0_78] : memref<9x8x8xbf16, #tpu.memory_space<vmem>>, vector<1x8x8xbf16>
    %157 = vector.shape_cast %156 : vector<1x8x8xbf16> to vector<8x8xbf16>
    %158 = arith.truncf %155 : vector<8x256xf32> to vector<8x256xbf16>
    %cst_79 = arith.constant dense<0.000000e+00> : vector<8x256xf32>
    %159 = tpu.matmul %157, %158, %cst_79 {dimension_numbers = #tpu.dot_dimension_numbers<[1], [0], [0], [1], [0, 0, 1, 1], [], []>} : vector<8x8xbf16>, vector<8x256xbf16>, vector<8x256xf32> -> vector<8x256xf32>
    %160 = arith.addf %151, %159 : vector<8x256xf32>
    %161 = arith.addf %4, %160 : vector<8x256xf32>
    %c0_80 = arith.constant 0 : index
    %c0_81 = arith.constant 0 : index
    %c0_82 = arith.constant 0 : index
    %162 = vector.load %arg6[%c0_80, %c0_81, %c0_82] : memref<2x8x256xf32, #tpu.memory_space<vmem>>, vector<1x8x256xf32>
    %163 = vector.shape_cast %162 : vector<1x8x256xf32> to vector<8x256xf32>
    %164 = vector.shape_cast %161 : vector<8x256xf32> to vector<1x8x256xf32>
    tpu.vector_store %arg6[%c0_80, %c0_81, %c0_82], %164 {strides = array<i32>} : memref<2x8x256xf32, #tpu.memory_space<vmem>>, vector<1x8x256xf32>,
    %c1_83 = arith.constant 1 : index
    %c0_84 = arith.constant 0 : index
    %c0_85 = arith.constant 0 : index
    %165 = vector.load %arg1[%c1_83, %c0_84, %c0_85] : memref<2x8x256xf32, #tpu.memory_space<vmem>>, vector<1x8x256xf32>
    %166 = vector.shape_cast %165 : vector<1x8x256xf32> to vector<8x256xf32>
    %c1_86 = arith.constant 1 : index
    %c0_87 = arith.constant 0 : index
    %c0_88 = arith.constant 0 : index
    %167 = vector.load %arg2[%c1_86, %c0_87, %c0_88] : memref<2x8x256xf32, #tpu.memory_space<vmem>>, vector<1x8x256xf32>
    %168 = vector.shape_cast %167 : vector<1x8x256xf32> to vector<8x256xf32>
    %cst_89 = arith.constant 0.000000e+00 : f32
    %169 = vector.broadcast %cst_89 : f32 to vector<8x256xf32>
    %170 = arith.maximumf %166, %169 : vector<8x256xf32>
    %c17_i32_90 = arith.constant 17 : i32
    %171 = tpu.dynamic_rotate %170 by %c17_i32_90 dim 1 : vector<8x256xf32>, i32 -> vector<8x256xf32>
    %172 = vector.extract_strided_slice %0 {offsets = [0, 0], sizes = [1, 256], strides = [1, 1]} : vector<9x256xf32> to vector<1x256xf32>
    %173 = vector.broadcast %172 : vector<1x256xf32> to vector<8x256xf32>
    %174 = arith.mulf %171, %173 : vector<8x256xf32>
    %c0_91 = arith.constant 0 : index
    %c0_92 = arith.constant 0 : index
    %c0_93 = arith.constant 0 : index
    %175 = vector.load %arg3[%c0_91, %c0_92, %c0_93] : memref<9x8x8xbf16, #tpu.memory_space<vmem>>, vector<1x8x8xbf16>
    %176 = vector.shape_cast %175 : vector<1x8x8xbf16> to vector<8x8xbf16>
    %177 = arith.truncf %174 : vector<8x256xf32> to vector<8x256xbf16>
    %cst_94 = arith.constant dense<0.000000e+00> : vector<8x256xf32>
    %178 = tpu.matmul %176, %177, %cst_94 {dimension_numbers = #tpu.dot_dimension_numbers<[1], [0], [0], [1], [0, 0, 1, 1], [], []>} : vector<8x8xbf16>, vector<8x256xbf16>, vector<8x256xf32> -> vector<8x256xf32>
    %c16_i32_95 = arith.constant 16 : i32
    %179 = tpu.dynamic_rotate %170 by %c16_i32_95 dim 1 : vector<8x256xf32>, i32 -> vector<8x256xf32>
    %180 = vector.extract_strided_slice %0 {offsets = [1, 0], sizes = [1, 256], strides = [1, 1]} : vector<9x256xf32> to vector<1x256xf32>
    %181 = vector.broadcast %180 : vector<1x256xf32> to vector<8x256xf32>
    %182 = arith.mulf %179, %181 : vector<8x256xf32>
    %c1_96 = arith.constant 1 : index
    %c0_97 = arith.constant 0 : index
    %c0_98 = arith.constant 0 : index
    %183 = vector.load %arg3[%c1_96, %c0_97, %c0_98] : memref<9x8x8xbf16, #tpu.memory_space<vmem>>, vector<1x8x8xbf16>
    %184 = vector.shape_cast %183 : vector<1x8x8xbf16> to vector<8x8xbf16>
    %185 = arith.truncf %182 : vector<8x256xf32> to vector<8x256xbf16>
    %cst_99 = arith.constant dense<0.000000e+00> : vector<8x256xf32>
    %186 = tpu.matmul %184, %185, %cst_99 {dimension_numbers = #tpu.dot_dimension_numbers<[1], [0], [0], [1], [0, 0, 1, 1], [], []>} : vector<8x8xbf16>, vector<8x256xbf16>, vector<8x256xf32> -> vector<8x256xf32>
    %187 = arith.addf %178, %186 : vector<8x256xf32>
    %c15_i32_100 = arith.constant 15 : i32
    %188 = tpu.dynamic_rotate %170 by %c15_i32_100 dim 1 : vector<8x256xf32>, i32 -> vector<8x256xf32>
    %189 = vector.extract_strided_slice %0 {offsets = [2, 0], sizes = [1, 256], strides = [1, 1]} : vector<9x256xf32> to vector<1x256xf32>
    %190 = vector.broadcast %189 : vector<1x256xf32> to vector<8x256xf32>
    %191 = arith.mulf %188, %190 : vector<8x256xf32>
    %c2_101 = arith.constant 2 : index
    %c0_102 = arith.constant 0 : index
    %c0_103 = arith.constant 0 : index
    %192 = vector.load %arg3[%c2_101, %c0_102, %c0_103] : memref<9x8x8xbf16, #tpu.memory_space<vmem>>, vector<1x8x8xbf16>
    %193 = vector.shape_cast %192 : vector<1x8x8xbf16> to vector<8x8xbf16>
    %194 = arith.truncf %191 : vector<8x256xf32> to vector<8x256xbf16>
    %cst_104 = arith.constant dense<0.000000e+00> : vector<8x256xf32>
    %195 = tpu.matmul %193, %194, %cst_104 {dimension_numbers = #tpu.dot_dimension_numbers<[1], [0], [0], [1], [0, 0, 1, 1], [], []>} : vector<8x8xbf16>, vector<8x256xbf16>, vector<8x256xf32> -> vector<8x256xf32>
    %196 = arith.addf %187, %195 : vector<8x256xf32>
    %c1_i32_105 = arith.constant 1 : i32
    %197 = tpu.dynamic_rotate %170 by %c1_i32_105 dim 1 : vector<8x256xf32>, i32 -> vector<8x256xf32>
    %198 = vector.extract_strided_slice %0 {offsets = [3, 0], sizes = [1, 256], strides = [1, 1]} : vector<9x256xf32> to vector<1x256xf32>
    %199 = vector.broadcast %198 : vector<1x256xf32> to vector<8x256xf32>
    %200 = arith.mulf %197, %199 : vector<8x256xf32>
    %c3_106 = arith.constant 3 : index
    %c0_107 = arith.constant 0 : index
    %c0_108 = arith.constant 0 : index
    %201 = vector.load %arg3[%c3_106, %c0_107, %c0_108] : memref<9x8x8xbf16, #tpu.memory_space<vmem>>, vector<1x8x8xbf16>
    %202 = vector.shape_cast %201 : vector<1x8x8xbf16> to vector<8x8xbf16>
    %203 = arith.truncf %200 : vector<8x256xf32> to vector<8x256xbf16>
    %cst_109 = arith.constant dense<0.000000e+00> : vector<8x256xf32>
    %204 = tpu.matmul %202, %203, %cst_109 {dimension_numbers = #tpu.dot_dimension_numbers<[1], [0], [0], [1], [0, 0, 1, 1], [], []>} : vector<8x8xbf16>, vector<8x256xbf16>, vector<8x256xf32> -> vector<8x256xf32>
    %205 = arith.addf %196, %204 : vector<8x256xf32>
    %c4_110 = arith.constant 4 : index
    %c0_111 = arith.constant 0 : index
    %c0_112 = arith.constant 0 : index
    %206 = vector.load %arg3[%c4_110, %c0_111, %c0_112] : memref<9x8x8xbf16, #tpu.memory_space<vmem>>, vector<1x8x8xbf16>
    %207 = vector.shape_cast %206 : vector<1x8x8xbf16> to vector<8x8xbf16>
    %208 = arith.truncf %170 : vector<8x256xf32> to vector<8x256xbf16>
    %cst_113 = arith.constant dense<0.000000e+00> : vector<8x256xf32>
    %209 = tpu.matmul %207, %208, %cst_113 {dimension_numbers = #tpu.dot_dimension_numbers<[1], [0], [0], [1], [0, 0, 1, 1], [], []>} : vector<8x8xbf16>, vector<8x256xbf16>, vector<8x256xf32> -> vector<8x256xf32>
    %210 = arith.addf %205, %209 : vector<8x256xf32>
    %c255_i32_114 = arith.constant 255 : i32
    %211 = tpu.dynamic_rotate %170 by %c255_i32_114 dim 1 : vector<8x256xf32>, i32 -> vector<8x256xf32>
    %212 = vector.extract_strided_slice %0 {offsets = [5, 0], sizes = [1, 256], strides = [1, 1]} : vector<9x256xf32> to vector<1x256xf32>
    %213 = vector.broadcast %212 : vector<1x256xf32> to vector<8x256xf32>
    %214 = arith.mulf %211, %213 : vector<8x256xf32>
    %c5_115 = arith.constant 5 : index
    %c0_116 = arith.constant 0 : index
    %c0_117 = arith.constant 0 : index
    %215 = vector.load %arg3[%c5_115, %c0_116, %c0_117] : memref<9x8x8xbf16, #tpu.memory_space<vmem>>, vector<1x8x8xbf16>
    %216 = vector.shape_cast %215 : vector<1x8x8xbf16> to vector<8x8xbf16>
    %217 = arith.truncf %214 : vector<8x256xf32> to vector<8x256xbf16>
    %cst_118 = arith.constant dense<0.000000e+00> : vector<8x256xf32>
    %218 = tpu.matmul %216, %217, %cst_118 {dimension_numbers = #tpu.dot_dimension_numbers<[1], [0], [0], [1], [0, 0, 1, 1], [], []>} : vector<8x8xbf16>, vector<8x256xbf16>, vector<8x256xf32> -> vector<8x256xf32>
    %219 = arith.addf %210, %218 : vector<8x256xf32>
    %c241_i32_119 = arith.constant 241 : i32
    %220 = tpu.dynamic_rotate %170 by %c241_i32_119 dim 1 : vector<8x256xf32>, i32 -> vector<8x256xf32>
    %221 = vector.extract_strided_slice %0 {offsets = [6, 0], sizes = [1, 256], strides = [1, 1]} : vector<9x256xf32> to vector<1x256xf32>
    %222 = vector.broadcast %221 : vector<1x256xf32> to vector<8x256xf32>
    %223 = arith.mulf %220, %222 : vector<8x256xf32>
    %c6_120 = arith.constant 6 : index
    %c0_121 = arith.constant 0 : index
    %c0_122 = arith.constant 0 : index
    %224 = vector.load %arg3[%c6_120, %c0_121, %c0_122] : memref<9x8x8xbf16, #tpu.memory_space<vmem>>, vector<1x8x8xbf16>
    %225 = vector.shape_cast %224 : vector<1x8x8xbf16> to vector<8x8xbf16>
    %226 = arith.truncf %223 : vector<8x256xf32> to vector<8x256xbf16>
    %cst_123 = arith.constant dense<0.000000e+00> : vector<8x256xf32>
    %227 = tpu.matmul %225, %226, %cst_123 {dimension_numbers = #tpu.dot_dimension_numbers<[1], [0], [0], [1], [0, 0, 1, 1], [], []>} : vector<8x8xbf16>, vector<8x256xbf16>, vector<8x256xf32> -> vector<8x256xf32>
    %228 = arith.addf %219, %227 : vector<8x256xf32>
    %c240_i32_124 = arith.constant 240 : i32
    %229 = tpu.dynamic_rotate %170 by %c240_i32_124 dim 1 : vector<8x256xf32>, i32 -> vector<8x256xf32>
    %230 = vector.extract_strided_slice %0 {offsets = [7, 0], sizes = [1, 256], strides = [1, 1]} : vector<9x256xf32> to vector<1x256xf32>
    %231 = vector.broadcast %230 : vector<1x256xf32> to vector<8x256xf32>
    %232 = arith.mulf %229, %231 : vector<8x256xf32>
    %c7_125 = arith.constant 7 : index
    %c0_126 = arith.constant 0 : index
    %c0_127 = arith.constant 0 : index
    %233 = vector.load %arg3[%c7_125, %c0_126, %c0_127] : memref<9x8x8xbf16, #tpu.memory_space<vmem>>, vector<1x8x8xbf16>
    %234 = vector.shape_cast %233 : vector<1x8x8xbf16> to vector<8x8xbf16>
    %235 = arith.truncf %232 : vector<8x256xf32> to vector<8x256xbf16>
    %cst_128 = arith.constant dense<0.000000e+00> : vector<8x256xf32>
    %236 = tpu.matmul %234, %235, %cst_128 {dimension_numbers = #tpu.dot_dimension_numbers<[1], [0], [0], [1], [0, 0, 1, 1], [], []>} : vector<8x8xbf16>, vector<8x256xbf16>, vector<8x256xf32> -> vector<8x256xf32>
    %237 = arith.addf %228, %236 : vector<8x256xf32>
    %c239_i32_129 = arith.constant 239 : i32
    %238 = tpu.dynamic_rotate %170 by %c239_i32_129 dim 1 : vector<8x256xf32>, i32 -> vector<8x256xf32>
    %239 = vector.extract_strided_slice %0 {offsets = [8, 0], sizes = [1, 256], strides = [1, 1]} : vector<9x256xf32> to vector<1x256xf32>
    %240 = vector.broadcast %239 : vector<1x256xf32> to vector<8x256xf32>
    %241 = arith.mulf %238, %240 : vector<8x256xf32>
    %c8_130 = arith.constant 8 : index
    %c0_131 = arith.constant 0 : index
    %c0_132 = arith.constant 0 : index
    %242 = vector.load %arg3[%c8_130, %c0_131, %c0_132] : memref<9x8x8xbf16, #tpu.memory_space<vmem>>, vector<1x8x8xbf16>
    %243 = vector.shape_cast %242 : vector<1x8x8xbf16> to vector<8x8xbf16>
    %244 = arith.truncf %241 : vector<8x256xf32> to vector<8x256xbf16>
    %cst_133 = arith.constant dense<0.000000e+00> : vector<8x256xf32>
    %245 = tpu.matmul %243, %244, %cst_133 {dimension_numbers = #tpu.dot_dimension_numbers<[1], [0], [0], [1], [0, 0, 1, 1], [], []>} : vector<8x8xbf16>, vector<8x256xbf16>, vector<8x256xf32> -> vector<8x256xf32>
    %246 = arith.addf %237, %245 : vector<8x256xf32>
    %cst_134 = arith.constant 0.000000e+00 : f32
    %247 = vector.broadcast %cst_134 : f32 to vector<8x256xf32>
    %248 = arith.maximumf %246, %247 : vector<8x256xf32>
    %c17_i32_135 = arith.constant 17 : i32
    %249 = tpu.dynamic_rotate %248 by %c17_i32_135 dim 1 : vector<8x256xf32>, i32 -> vector<8x256xf32>
    %250 = vector.extract_strided_slice %0 {offsets = [0, 0], sizes = [1, 256], strides = [1, 1]} : vector<9x256xf32> to vector<1x256xf32>
    %251 = vector.broadcast %250 : vector<1x256xf32> to vector<8x256xf32>
    %252 = arith.mulf %249, %251 : vector<8x256xf32>
    %c0_136 = arith.constant 0 : index
    %c0_137 = arith.constant 0 : index
    %c0_138 = arith.constant 0 : index
    %253 = vector.load %arg4[%c0_136, %c0_137, %c0_138] : memref<9x8x8xbf16, #tpu.memory_space<vmem>>, vector<1x8x8xbf16>
    %254 = vector.shape_cast %253 : vector<1x8x8xbf16> to vector<8x8xbf16>
    %255 = arith.truncf %252 : vector<8x256xf32> to vector<8x256xbf16>
    %cst_139 = arith.constant dense<0.000000e+00> : vector<8x256xf32>
    %256 = tpu.matmul %254, %255, %cst_139 {dimension_numbers = #tpu.dot_dimension_numbers<[1], [0], [0], [1], [0, 0, 1, 1], [], []>} : vector<8x8xbf16>, vector<8x256xbf16>, vector<8x256xf32> -> vector<8x256xf32>
    %c16_i32_140 = arith.constant 16 : i32
    %257 = tpu.dynamic_rotate %248 by %c16_i32_140 dim 1 : vector<8x256xf32>, i32 -> vector<8x256xf32>
    %258 = vector.extract_strided_slice %0 {offsets = [1, 0], sizes = [1, 256], strides = [1, 1]} : vector<9x256xf32> to vector<1x256xf32>
    %259 = vector.broadcast %258 : vector<1x256xf32> to vector<8x256xf32>
    %260 = arith.mulf %257, %259 : vector<8x256xf32>
    %c1_141 = arith.constant 1 : index
    %c0_142 = arith.constant 0 : index
    %c0_143 = arith.constant 0 : index
    %261 = vector.load %arg4[%c1_141, %c0_142, %c0_143] : memref<9x8x8xbf16, #tpu.memory_space<vmem>>, vector<1x8x8xbf16>
    %262 = vector.shape_cast %261 : vector<1x8x8xbf16> to vector<8x8xbf16>
    %263 = arith.truncf %260 : vector<8x256xf32> to vector<8x256xbf16>
    %cst_144 = arith.constant dense<0.000000e+00> : vector<8x256xf32>
    %264 = tpu.matmul %262, %263, %cst_144 {dimension_numbers = #tpu.dot_dimension_numbers<[1], [0], [0], [1], [0, 0, 1, 1], [], []>} : vector<8x8xbf16>, vector<8x256xbf16>, vector<8x256xf32> -> vector<8x256xf32>
    %265 = arith.addf %256, %264 : vector<8x256xf32>
    %c15_i32_145 = arith.constant 15 : i32
    %266 = tpu.dynamic_rotate %248 by %c15_i32_145 dim 1 : vector<8x256xf32>, i32 -> vector<8x256xf32>
    %267 = vector.extract_strided_slice %0 {offsets = [2, 0], sizes = [1, 256], strides = [1, 1]} : vector<9x256xf32> to vector<1x256xf32>
    %268 = vector.broadcast %267 : vector<1x256xf32> to vector<8x256xf32>
    %269 = arith.mulf %266, %268 : vector<8x256xf32>
    %c2_146 = arith.constant 2 : index
    %c0_147 = arith.constant 0 : index
    %c0_148 = arith.constant 0 : index
    %270 = vector.load %arg4[%c2_146, %c0_147, %c0_148] : memref<9x8x8xbf16, #tpu.memory_space<vmem>>, vector<1x8x8xbf16>
    %271 = vector.shape_cast %270 : vector<1x8x8xbf16> to vector<8x8xbf16>
    %272 = arith.truncf %269 : vector<8x256xf32> to vector<8x256xbf16>
    %cst_149 = arith.constant dense<0.000000e+00> : vector<8x256xf32>
    %273 = tpu.matmul %271, %272, %cst_149 {dimension_numbers = #tpu.dot_dimension_numbers<[1], [0], [0], [1], [0, 0, 1, 1], [], []>} : vector<8x8xbf16>, vector<8x256xbf16>, vector<8x256xf32> -> vector<8x256xf32>
    %274 = arith.addf %265, %273 : vector<8x256xf32>
    %c1_i32_150 = arith.constant 1 : i32
    %275 = tpu.dynamic_rotate %248 by %c1_i32_150 dim 1 : vector<8x256xf32>, i32 -> vector<8x256xf32>
    %276 = vector.extract_strided_slice %0 {offsets = [3, 0], sizes = [1, 256], strides = [1, 1]} : vector<9x256xf32> to vector<1x256xf32>
    %277 = vector.broadcast %276 : vector<1x256xf32> to vector<8x256xf32>
    %278 = arith.mulf %275, %277 : vector<8x256xf32>
    %c3_151 = arith.constant 3 : index
    %c0_152 = arith.constant 0 : index
    %c0_153 = arith.constant 0 : index
    %279 = vector.load %arg4[%c3_151, %c0_152, %c0_153] : memref<9x8x8xbf16, #tpu.memory_space<vmem>>, vector<1x8x8xbf16>
    %280 = vector.shape_cast %279 : vector<1x8x8xbf16> to vector<8x8xbf16>
    %281 = arith.truncf %278 : vector<8x256xf32> to vector<8x256xbf16>
    %cst_154 = arith.constant dense<0.000000e+00> : vector<8x256xf32>
    %282 = tpu.matmul %280, %281, %cst_154 {dimension_numbers = #tpu.dot_dimension_numbers<[1], [0], [0], [1], [0, 0, 1, 1], [], []>} : vector<8x8xbf16>, vector<8x256xbf16>, vector<8x256xf32> -> vector<8x256xf32>
    %283 = arith.addf %274, %282 : vector<8x256xf32>
    %c4_155 = arith.constant 4 : index
    %c0_156 = arith.constant 0 : index
    %c0_157 = arith.constant 0 : index
    %284 = vector.load %arg4[%c4_155, %c0_156, %c0_157] : memref<9x8x8xbf16, #tpu.memory_space<vmem>>, vector<1x8x8xbf16>
    %285 = vector.shape_cast %284 : vector<1x8x8xbf16> to vector<8x8xbf16>
    %286 = arith.truncf %248 : vector<8x256xf32> to vector<8x256xbf16>
    %cst_158 = arith.constant dense<0.000000e+00> : vector<8x256xf32>
    %287 = tpu.matmul %285, %286, %cst_158 {dimension_numbers = #tpu.dot_dimension_numbers<[1], [0], [0], [1], [0, 0, 1, 1], [], []>} : vector<8x8xbf16>, vector<8x256xbf16>, vector<8x256xf32> -> vector<8x256xf32>
    %288 = arith.addf %283, %287 : vector<8x256xf32>
    %c255_i32_159 = arith.constant 255 : i32
    %289 = tpu.dynamic_rotate %248 by %c255_i32_159 dim 1 : vector<8x256xf32>, i32 -> vector<8x256xf32>
    %290 = vector.extract_strided_slice %0 {offsets = [5, 0], sizes = [1, 256], strides = [1, 1]} : vector<9x256xf32> to vector<1x256xf32>
    %291 = vector.broadcast %290 : vector<1x256xf32> to vector<8x256xf32>
    %292 = arith.mulf %289, %291 : vector<8x256xf32>
    %c5_160 = arith.constant 5 : index
    %c0_161 = arith.constant 0 : index
    %c0_162 = arith.constant 0 : index
    %293 = vector.load %arg4[%c5_160, %c0_161, %c0_162] : memref<9x8x8xbf16, #tpu.memory_space<vmem>>, vector<1x8x8xbf16>
    %294 = vector.shape_cast %293 : vector<1x8x8xbf16> to vector<8x8xbf16>
    %295 = arith.truncf %292 : vector<8x256xf32> to vector<8x256xbf16>
    %cst_163 = arith.constant dense<0.000000e+00> : vector<8x256xf32>
    %296 = tpu.matmul %294, %295, %cst_163 {dimension_numbers = #tpu.dot_dimension_numbers<[1], [0], [0], [1], [0, 0, 1, 1], [], []>} : vector<8x8xbf16>, vector<8x256xbf16>, vector<8x256xf32> -> vector<8x256xf32>
    %297 = arith.addf %288, %296 : vector<8x256xf32>
    %c241_i32_164 = arith.constant 241 : i32
    %298 = tpu.dynamic_rotate %248 by %c241_i32_164 dim 1 : vector<8x256xf32>, i32 -> vector<8x256xf32>
    %299 = vector.extract_strided_slice %0 {offsets = [6, 0], sizes = [1, 256], strides = [1, 1]} : vector<9x256xf32> to vector<1x256xf32>
    %300 = vector.broadcast %299 : vector<1x256xf32> to vector<8x256xf32>
    %301 = arith.mulf %298, %300 : vector<8x256xf32>
    %c6_165 = arith.constant 6 : index
    %c0_166 = arith.constant 0 : index
    %c0_167 = arith.constant 0 : index
    %302 = vector.load %arg4[%c6_165, %c0_166, %c0_167] : memref<9x8x8xbf16, #tpu.memory_space<vmem>>, vector<1x8x8xbf16>
    %303 = vector.shape_cast %302 : vector<1x8x8xbf16> to vector<8x8xbf16>
    %304 = arith.truncf %301 : vector<8x256xf32> to vector<8x256xbf16>
    %cst_168 = arith.constant dense<0.000000e+00> : vector<8x256xf32>
    %305 = tpu.matmul %303, %304, %cst_168 {dimension_numbers = #tpu.dot_dimension_numbers<[1], [0], [0], [1], [0, 0, 1, 1], [], []>} : vector<8x8xbf16>, vector<8x256xbf16>, vector<8x256xf32> -> vector<8x256xf32>
    %306 = arith.addf %297, %305 : vector<8x256xf32>
    %c240_i32_169 = arith.constant 240 : i32
    %307 = tpu.dynamic_rotate %248 by %c240_i32_169 dim 1 : vector<8x256xf32>, i32 -> vector<8x256xf32>
    %308 = vector.extract_strided_slice %0 {offsets = [7, 0], sizes = [1, 256], strides = [1, 1]} : vector<9x256xf32> to vector<1x256xf32>
    %309 = vector.broadcast %308 : vector<1x256xf32> to vector<8x256xf32>
    %310 = arith.mulf %307, %309 : vector<8x256xf32>
    %c7_170 = arith.constant 7 : index
    %c0_171 = arith.constant 0 : index
    %c0_172 = arith.constant 0 : index
    %311 = vector.load %arg4[%c7_170, %c0_171, %c0_172] : memref<9x8x8xbf16, #tpu.memory_space<vmem>>, vector<1x8x8xbf16>
    %312 = vector.shape_cast %311 : vector<1x8x8xbf16> to vector<8x8xbf16>
    %313 = arith.truncf %310 : vector<8x256xf32> to vector<8x256xbf16>
    %cst_173 = arith.constant dense<0.000000e+00> : vector<8x256xf32>
    %314 = tpu.matmul %312, %313, %cst_173 {dimension_numbers = #tpu.dot_dimension_numbers<[1], [0], [0], [1], [0, 0, 1, 1], [], []>} : vector<8x8xbf16>, vector<8x256xbf16>, vector<8x256xf32> -> vector<8x256xf32>
    %315 = arith.addf %306, %314 : vector<8x256xf32>
    %c239_i32_174 = arith.constant 239 : i32
    %316 = tpu.dynamic_rotate %248 by %c239_i32_174 dim 1 : vector<8x256xf32>, i32 -> vector<8x256xf32>
    %317 = vector.extract_strided_slice %0 {offsets = [8, 0], sizes = [1, 256], strides = [1, 1]} : vector<9x256xf32> to vector<1x256xf32>
    %318 = vector.broadcast %317 : vector<1x256xf32> to vector<8x256xf32>
    %319 = arith.mulf %316, %318 : vector<8x256xf32>
    %c8_175 = arith.constant 8 : index
    %c0_176 = arith.constant 0 : index
    %c0_177 = arith.constant 0 : index
    %320 = vector.load %arg4[%c8_175, %c0_176, %c0_177] : memref<9x8x8xbf16, #tpu.memory_space<vmem>>, vector<1x8x8xbf16>
    %321 = vector.shape_cast %320 : vector<1x8x8xbf16> to vector<8x8xbf16>
    %322 = arith.truncf %319 : vector<8x256xf32> to vector<8x256xbf16>
    %cst_178 = arith.constant dense<0.000000e+00> : vector<8x256xf32>
    %323 = tpu.matmul %321, %322, %cst_178 {dimension_numbers = #tpu.dot_dimension_numbers<[1], [0], [0], [1], [0, 0, 1, 1], [], []>} : vector<8x8xbf16>, vector<8x256xbf16>, vector<8x256xf32> -> vector<8x256xf32>
    %324 = arith.addf %315, %323 : vector<8x256xf32>
    %325 = arith.addf %168, %324 : vector<8x256xf32>
    %c1_179 = arith.constant 1 : index
    %c0_180 = arith.constant 0 : index
    %c0_181 = arith.constant 0 : index
    %326 = vector.load %arg6[%c1_179, %c0_180, %c0_181] : memref<2x8x256xf32, #tpu.memory_space<vmem>>, vector<1x8x256xf32>
    %327 = vector.shape_cast %326 : vector<1x8x256xf32> to vector<8x256xf32>
    %328 = vector.shape_cast %325 : vector<8x256xf32> to vector<1x8x256xf32>
    tpu.vector_store %arg6[%c1_179, %c0_180, %c0_181], %328 {strides = array<i32>} : memref<2x8x256xf32, #tpu.memory_space<vmem>>, vector<1x8x256xf32>,
    return
  }
  func.func @transform_0(%arg0: i32) -> (i32, i32, i32) {
    %c0_i32 = arith.constant 0 : i32
    %c0_i32_0 = arith.constant 0 : i32
    %c0_i32_1 = arith.constant 0 : i32
    return %arg0, %c0_i32, %c0_i32_0 : i32, i32, i32
  }
  func.func @transform_1(%arg0: i32) -> (i32, i32, i32) {
    %c0_i32 = arith.constant 0 : i32
    %c0_i32_0 = arith.constant 0 : i32
    %c0_i32_1 = arith.constant 0 : i32
    return %arg0, %c0_i32, %c0_i32_0 : i32, i32, i32
  }
  func.func @transform_2(%arg0: i32) -> (i32, i32, i32) {
    %c0_i32 = arith.constant 0 : i32
    %c0_i32_0 = arith.constant 0 : i32
    %c0_i32_1 = arith.constant 0 : i32
    %c0_i32_2 = arith.constant 0 : i32
    return %c0_i32, %c0_i32_0, %c0_i32_1 : i32, i32, i32
  }
  func.func @transform_3(%arg0: i32) -> (i32, i32, i32) {
    %c0_i32 = arith.constant 0 : i32
    %c0_i32_0 = arith.constant 0 : i32
    %c0_i32_1 = arith.constant 0 : i32
    %c0_i32_2 = arith.constant 0 : i32
    return %c0_i32, %c0_i32_0, %c0_i32_1 : i32, i32, i32
  }
  func.func @transform_4(%arg0: i32) -> (i32, i32) {
    %c0_i32 = arith.constant 0 : i32
    %c0_i32_0 = arith.constant 0 : i32
    %c0_i32_1 = arith.constant 0 : i32
    return %c0_i32, %c0_i32_0 : i32, i32
  }
  func.func @transform_5(%arg0: i32) -> (i32, i32, i32) {
    %c0_i32 = arith.constant 0 : i32
    %c0_i32_0 = arith.constant 0 : i32
    %c0_i32_1 = arith.constant 0 : i32
    return %arg0, %c0_i32, %c0_i32_0 : i32, i32, i32
  }
}

</mosaic_0001>

<bundles_post_ra>
// kernel: tpu_custom_call.1
= control target key start
LH: loop header
LB: loop body
LE: loop exit
PB: predicated region body
PF: predicated region fallthrough
CT: control target
= control target key end

     0   :  { %10 = vsyncpa [#allocation3], 0  ;;  %s3873_s0 = inlined_call_operand.vmem [shape: f32[4,8,256], index: 0, kind: input, shape index: {}]   ;;  %s3874_s1 = inlined_call_operand.vmem [shape: f32[4,8,256], index: 1, kind: input, shape index: {}]   ;;  %s3875_s2 = inlined_call_operand.vmem [shape: bf16[9,8,8], index: 2, kind: input, shape index: {}]   ;;  %s3876_s3 = inlined_call_operand.vmem [shape: bf16[9,8,8], index: 3, kind: input, shape index: {}]   ;;  %s3877_s4 = inlined_call_operand.hbm [shape: f32[9,256], index: 4, kind: input, shape index: {}]   ;;  %s3878_s5 = inlined_call_operand.hbm [shape: f32[4,8,256], index: 5, kind: output, shape index: {}]  }
   0x1   :  { %11 = vsyncpa [#allocation4], 0 }
   0x2   :  { %13 = vsyncpa [#allocation4 + $0x1], 0  ;;  %s3049_s18 = smov 0   ;;  %s3051_s19 = smov 0  }
   0x3   :  { %s3053_s20 = smov 0   ;;  %s3055_s21 = smov 0  }
   0x4 LB: > { %s3070_s22 = sadd.s32 4294967295, %s3003_s21   ;;  %s2714_s23 = sadd.s32 4294967294, %s3003_s21   ;;  %s3003_s21 = sphi %s3055_s21, %s3888_s21   ;;  %s2999_s20 = sphi %s3053_s20, %s3887_s20   ;;  %s2995_s19 = sphi %s3051_s19, %s3886_s19   ;;  %s2991_s18 = sphi %s3049_s18, %s3885_s18  }
   0x5   : > { %s3074_s24 = sadd.s32 1, %s3003_s21   ;;  %s141_s25 = sadd.s32 1, %s2999_s20 }
   0x6   : > { %s138_s26 = ssub.s32 %s3003_s21, %s3074_s24  ;;  %p151_p0 = scmp.ne.s32.totalorder %s2999_s20, %s2995_s19 }
   0x7   : > { %p139_p1 = scmp.eq.s32.totalorder %s138_s26, 0  ;;  %p152_p2 = scmp.eq.s32.totalorder %s3070_s22, 1 }
   0x8   : > { %p157_p3 = scmp.ne.s32.totalorder %s2995_s19, %s2991_s18  ;;  %p158_p4 = scmp.eq.s32.totalorder %s2714_s23, 1 }
   0x9   : > { %s3085_s27 = scalar_select %p139_p1, %s2999_s20, %s141_s25  }
   0xa   : > { %p3087_p5 = por %p152_p2, %p151_p0  ;;  %p3091_p6 = por %p158_p4, %p157_p3 }
   0xb   : > { %p2715_p7 = scmp.ge.s32.totalorder %s3003_s21, 1  ;;  %p165_p8 = scmp.lt.s32.totalorder %s3003_s21, 3 }
   0xc   : > { %s3881_s29 = scalar_select %p3091_p6, 1, 0 }
   0xd   : > { %p2863_p9 = scmp.eq.s32.totalorder %s3070_s22, 0  ;;  %p3098_p10 = pnand %p2715_p7, %p165_p8 }
   0xe   : > { %s3005_s6 = smov [#allocation2]  }
   0xf   : > { %s183_s7 = sshll.u32 %s3005_s6, 4  ;;  %p2855_p11 = pneg %p3098_p10  ;;  %s184_s7 = int_to_ptr.vmem [resolvable:$true] %s183_s7 }
  0x10   : > { %s2924_s8 = scalar_lea.vmem %s184_s7, 512  ;;  %p2932_p3 = scmp.lt.s32.totalorder %s184_s7, %s184_s7 }
  0x11   : > { %p2856_p12 = pnand %p2863_p9, %p2855_p11  ;;  %p2925_p0 = scmp.ne.s32.totalorder %s184_s7, %s2924_s8 }
  0x12   : > { %p2933_p4 = scmp.lt.s32.totalorder %s2924_s8, %s2924_s8 }
  0x13   : > { %p2915_p13 = pneg %p2856_p12 }
  0x14   : > { %p2934_p6 = por %p2933_p4, %p2932_p3 }
  0x15   : > { %p2927_p1 = pnand %p2925_p0, %p2915_p13 }
  0x17   : > { %p2928_p2 = pneg %p2927_p1 }
  0x19   : > { %p2935_p7 = pnand %p2934_p6, %p2928_p2 }
  0x1b   : > { %2938 = shalt.err (!%p2935_p7)
}
  0x1c   : > { %s3006_s9 = smov 256   ;;  %s3007_s10 = smov 16  }
  0x1d   : > { %2858 = dma.hbm_to_vmem [thread:$0]  (!%p2856_p12), %s3877_s4, 512, %s184_s7, [#allocation3], %s3006_s9, %s3006_s9, %s3007_s10  }
  0x1e   : > { %219 = sbr.rel (%p3098_p10) target bundleno = 1164 (0x48c), region = 40 }
  0x23   : > { %2982 = dma.done.wait (%p2863_p9), [#allocation3], 512  }
  0x24   : > { %2984 = vsyncadd (%p2863_p9), [#allocation3], 4294966784  ;;  %s2721_s13 = sshll.u32 %s3070_s22, 1  ;;  %s3008_s23 = smov 17   ;;  %v3010_v4 = vmov 0   ;;  %v284_v5 = vlaneseq  ;;  %v3172_v10 = vld [vmem:[#allocation2] sm:$0xff] }
  0x25   : > { %p255_p8 = scmp.lt.s32.totalorder %s2721_s13, 3  ;;  %s3009_s25 = smov 16   ;;  %366 = vmatprep.mubr.bf16.mxu0 %v3010_v4  ;;  %416 = vmatprep.mubr.bf16.mxu1 %v3010_v4  ;;  %v3174_v11 = vld [vmem:[#allocation2 + $0x8] sm:$0xff]  ;;  %vm327_vm3 = vcmask 1043456   ;;  %v2727_v47 = vld [vmem:[%s3875_s2 + $0x4] sm:$0xf] }
  0x26   : > { %s3011_s26 = smov 15   ;;  %s3012_s30 = smov 1   ;;  %v3166_v6 = vshrl.u32 %v284_v5, 7  ;;  %v3168_v7 = vand.u32 127, %v284_v5  ;;  %vm323_vm5 = vcmask 64512  }
  0x27   : > { %s3890_s13 = smov (!%p255_p8, %s2721_s13), 3  ;;  %s3013_s6 = smov 127   ;;  %v299_v48 = vld [vmem:[%s3875_s2] sm:$0xf] }
  0x28   : > { %s3879_s14 = sshll.u32 %s3890_s13, 4  ;;  %s3014_s7 = smov 113   ;;  %v291_v8 = vsub.s32 0, %v3166_v6  ;;  %v311_v9 = vsub.s32 1, %v3166_v6  ;;  %v434_v14 = vsub.s32 2, %v3166_v6  ;;  %vm286_vm0 = vcmp.lt.s32.totalorder %v3168_v7, 17 }
  0x29   : > { %s3124_s17 = scalar_lea.vmem %s3873_s0, %s3879_s14  ;;  %s3015_s8 = smov 112   ;;  %vm306_vm1 = vcmp.lt.s32.totalorder %v3168_v7, 16  ;;  %vm429_vm2 = vcmp.lt.s32.totalorder %v3168_v7, 15  ;;  %v507_v23 = vsub.s32 3, %v3166_v6  ;;  %vm502_vm4 = vcmp.lt.s32.totalorder %v3168_v7, 1 }
  0x2a   : > { %v274_v0 = vld [vmem:[%s3124_s17] sm:$0xff]  ;;  %v275_v1 = vld [vmem:[%s3124_s17 + $0x8] sm:$0xff]  ;;  %s3016_s9 = smov 111   ;;  %v3180_v15 = vrot.slane %v3172_v10, %v291_v8  ;;  %v3183_v16 = vrot.slane %v3172_v10, %v311_v9  ;;  %v3186_v17 = vrot.slane %v3174_v11, %v311_v9  ;;  %v3189_v18 = vrot.slane %v3174_v11, %v291_v8  ;;  %s3883_s12 = sshll.u32 %s3890_s13, 4 }
  0x2b   : > { %v3128_v2 = vmax.f32 %v274_v0, 0.0  ;;  %v3134_v3 = vmax.f32 %v275_v1, 0.0  ;;  %v3193_v21 = vrot.slane %v3172_v10, %v434_v14  ;;  %v3196_v22 = vrot.slane %v3174_v11, %v434_v14  ;;  %s3660_s10 = scalar_lea.vmem %s3874_s1, %s3883_s12  ;;  %s2848_s14 = sshll.u32 %s3070_s22, 9 }
  0x2c   : > { %v636_v32 = vsub.s32 5, %v3166_v6  ;;  %v3218_v41 = vrot.slane %v3172_v10, %v507_v23  ;;  %v3221_v42 = vrot.slane %v3174_v11, %v507_v23  ;;  %vm631_vm6 = vcmp.lt.s32.totalorder %v3168_v7, 127  ;;  %s3827_s16 = scalar_lea.hbm %s3878_s5, %s2848_s14 }
  0x2d   : > { %280 = vrot.lane.b32.xlu1 %v3128_v2, %s3008_s23  ;;  %302 = vrot.lane.b32.xlu0 %v3128_v2, %s3009_s25  ;;  %v709_v56 = vsub.s32 6, %v3166_v6  ;;  %v574_v57 = vpack.c.bf16 %v3134_v3, %v3134_v3  ;;  %vm704_vm7 = vcmp.lt.s32.totalorder %v3168_v7, 113  ;;  %vm777_vm8 = vcmp.lt.s32.totalorder %v3168_v7, 112 }
  0x2e   : > { %v3237_v53 = vrot.slane %v3172_v10, %v636_v32  ;;  %v3252_v61 = vrot.slane %v3174_v11, %v636_v32  ;;  %vm850_vm9 = vcmp.lt.s32.totalorder %v3168_v7, 111 }
  0x2f   : > { %v3265_v9 = vrot.slane %v3172_v10, %v709_v56 }
  0x31   : > { %282 = vrot.lane.b32.xlu1 %v3134_v3, %s3008_s23  ;;  %304 = vrot.lane.b32.xlu0 %v3134_v3, %s3009_s25 }
  0x35   : > { %427 = vrot.lane.b32.xlu1 %v3134_v3, %s3011_s26  ;;  %425 = vrot.lane.b32.xlu0 %v3128_v2, %s3011_s26 }
  0x39   : > { %500 = vrot.lane.b32.xlu1 %v3134_v3, %s3012_s30  ;;  %498 = vrot.lane.b32.xlu0 %v3128_v2, %s3012_s30 }
  0x3d   : > { %629 = vrot.lane.b32.xlu1 %v3134_v3, %s3013_s6  ;;  %627 = vrot.lane.b32.xlu0 %v3128_v2, %s3013_s6 }
  0x41   : > { %702 = vrot.lane.b32.xlu1 %v3134_v3, %s3014_s7  ;;  %700 = vrot.lane.b32.xlu0 %v3128_v2, %s3014_s7 }
  0x45   : > { %775 = vrot.lane.b32.xlu1 %v3134_v3, %s3015_s8  ;;  %773 = vrot.lane.b32.xlu0 %v3128_v2, %s3015_s8 }
  0x49   : > { %848 = vrot.lane.b32.xlu1 %v3134_v3, %s3016_s9  ;;  %846 = vrot.lane.b32.xlu0 %v3128_v2, %s3016_s9  ;;  %v573_v3 = vpack.c.bf16 %v3128_v2, %v3128_v2 }
  0x9f   : > { %v281_v12 = vpop.permute.xlu1 %280  ;;  %v303_v13 = vpop.permute.xlu0 %302 }
  0xa3   : > { %v283_v19 = vpop.permute.xlu1 %282  ;;  %v305_v20 = vpop.permute.xlu0 %304 }
  0xa4   : > { %v287_v24 = vsel %vm286_vm0, %v281_v12, %v283_v19  ;;  %v288_v25 = vsel %vm286_vm0, %v283_v19, %v281_v12  ;;  %v307_v26 = vsel %vm306_vm1, %v303_v13, %v305_v20  ;;  %v308_v27 = vsel %vm306_vm1, %v305_v20, %v303_v13  ;;  %v2732_v20 = vld [vmem:[%s3875_s2 + $0x8] sm:$0xf] }
  0xa5   : > { %v297_v28 = vmul.f32 %v3180_v15, %v288_v25  ;;  %v317_v29 = vmul.f32 %v3183_v16, %v308_v27  ;;  %v318_v30 = vmul.f32 %v3186_v17, %v307_v26  ;;  %v298_v31 = vmul.f32 %v3189_v18, %v287_v24 }
  0xa6   : > { %v782_v12 = vsub.s32 7, %v3166_v6  ;;  %v3274_v19 = vrot.slane %v3174_v11, %v709_v56  ;;  %v2735_v6 = vld [vmem:[%s3875_s2 + $0xc] sm:$0xf]  ;;  %v579_v27 = vsel %vm327_vm3, %v573_v3, 0 }
  0xa7   : > { %v428_v33 = vpop.permute.xlu1 %427  ;;  %v426_v34 = vpop.permute.xlu0 %425  ;;  %v322_v35 = vpack.c.bf16 %v318_v30, %v318_v30  ;;  %v301_v36 = vpack.c.bf16 %v298_v31, %v298_v31  ;;  %v321_v37 = vpack.c.bf16 %v317_v29, %v317_v29  ;;  %v300_v38 = vpack.c.bf16 %v297_v28, %v297_v28 }
  0xa8   : > { %v430_v39 = vsel %vm429_vm2, %v426_v34, %v428_v33  ;;  %v431_v40 = vsel %vm429_vm2, %v428_v33, %v426_v34  ;;  %v3289_v30 = vrot.slane %v3172_v10, %v782_v12  ;;  %v3297_v34 = vrot.slane %v3174_v11, %v782_v12 }
  0xa9   : > { %v440_v43 = vmul.f32 %v3193_v21, %v431_v40  ;;  %v441_v44 = vmul.f32 %v3196_v22, %v430_v39  ;;  %2728 = vmatprep.subr.msk.bf16.mxu0 %vm327_vm3, %v322_v35  ;;  %2730 = vmatprep.subr.msk.bf16.mxu1 %vm327_vm3, %v301_v36  ;;  %v329_v45 = vsel %vm327_vm3, %v321_v37, 0  ;;  %v379_v46 = vsel %vm327_vm3, %v300_v38, 0 }
  0xaa   : > { %349 = vmatpush1.bf16.msra.mxu0 %v329_v45  ;;  %399 = vmatpush1.bf16.msra.mxu1 %v379_v46  ;;  %v3316_v45 = vld [vmem:[#allocation2 + $0x10] ss:$0 sm:$0xff]  ;;  %v3318_v46 = vld [vmem:[#allocation2 + $0x18] ss:$0 sm:$0xff] }
  0xab   : > { %v444_v49 = vpack.c.bf16 %v440_v43, %v440_v43  ;;  %v445_v50 = vpack.c.bf16 %v441_v44, %v441_v44  ;;  %v501_v51 = vpop.permute.xlu1 %500  ;;  %v499_v52 = vpop.permute.xlu0 %498  ;;  %v2738_v43 = vld [vmem:[%s3875_s2 + $0x10] sm:$0xf]  ;;  %v2741_v44 = vld [vmem:[%s3875_s2 + $0x14] sm:$0xf] }
  0xac   : > { %v503_v54 = vsel %vm502_vm4, %v499_v52, %v501_v51  ;;  %v504_v55 = vsel %vm502_vm4, %v501_v51, %v499_v52 }
  0xad   : > { %v513_v58 = vmul.f32 %v3218_v41, %v504_v55  ;;  %v514_v59 = vmul.f32 %v3221_v42, %v503_v54  ;;  %2729 = vmatmul.mubr.msk.bf16.vlgmr.msra.gmra.mxu0 %vm323_vm5, %v2727_v47  ;;  %2731 = vmatmul.mubr.msk.bf16.vlgmr.msra.gmra.mxu1 %vm323_vm5, %v299_v48  ;;  %v450_v60 = vsel %vm327_vm3, %v444_v49, 0 }
  0xae   : > { %2733 = vmatprep.subr.msk.bf16.mxu0 %vm327_vm3, %v445_v50  ;;  %487 = vmatprep.mubr.bf16.mxu0 %v3010_v4 }
  0xaf   : > { %v517_v62 = vpack.c.bf16 %v513_v58, %v513_v58  ;;  %v518_v63 = vpack.c.bf16 %v514_v59, %v514_v59  ;;  %470 = vmatpush1.bf16.msra.mxu0 %v450_v60  ;;  %v630_v0 = vpop.permute.xlu1 %629  ;;  %v628_v1 = vpop.permute.xlu0 %627  ;;  %560 = vmatprep.mubr.bf16.mxu1 %v3010_v4  ;;  %v2744_v60 = vld [vmem:[%s3875_s2 + $0x18] sm:$0xf] }
  0xb0   : > { %v632_v5 = vsel %vm631_vm6, %v628_v1, %v630_v0  ;;  %v633_v8 = vsel %vm631_vm6, %v630_v0, %v628_v1  ;;  %2739 = vmatprep.subr.msk.bf16.mxu0 %vm327_vm3, %v574_v57  ;;  %v2752_v0 = vld [vmem:[%s3875_s2 + $0x20] sm:$0xf] }
  0xb1   : > { %2736 = vmatprep.subr.msk.bf16.mxu1 %vm327_vm3, %v518_v63  ;;  %v523_v13 = vsel %vm327_vm3, %v517_v62, 0  ;;  %v642_v14 = vmul.f32 %v3237_v53, %v632_v5  ;;  %v643_v2 = vmul.f32 %v3252_v61, %v633_v8  ;;  %v2747_v62 = vld [vmem:[%s3875_s2 + $0x1c] sm:$0xf] }
  0xb2   : > { %543 = vmatpush1.bf16.msra.mxu1 %v523_v13 }
  0xb3   : > { %v646_v23 = vpack.c.bf16 %v642_v14, %v642_v14  ;;  %v647_v24 = vpack.c.bf16 %v643_v2, %v643_v2  ;;  %v703_v25 = vpop.permute.xlu1 %702  ;;  %v701_v26 = vpop.permute.xlu0 %700 }
  0xb4   : > { %v705_v28 = vsel %vm704_vm7, %v701_v26, %v703_v25  ;;  %v706_v29 = vsel %vm704_vm7, %v703_v25, %v701_v26 }
  0xb5   : > { %2734 = vmatmul.mubr.msk.bf16.vlgmr.msra.gmra.mxu0 %vm323_vm5, %v2732_v20  ;;  %2737 = vmatmul.mubr.msk.bf16.vlgmr.msra.gmra.mxu1 %vm323_vm5, %v2735_v6  ;;  %v715_v31 = vmul.f32 %v3265_v9, %v705_v28  ;;  %v716_v32 = vmul.f32 %v3274_v19, %v706_v29  ;;  %v652_v33 = vsel %vm327_vm3, %v646_v23, 0 }
  0xb6   : > { %2742 = vmatprep.subr.msk.bf16.mxu1 %vm327_vm3, %v647_v24  ;;  %599 = vmatpush1.bf16.msra.mxu0 %v579_v27 }
  0xb7   : > { %v719_v35 = vpack.c.bf16 %v715_v31, %v715_v31  ;;  %v720_v36 = vpack.c.bf16 %v716_v32, %v716_v32  ;;  %672 = vmatpush1.bf16.msra.mxu1 %v652_v33  ;;  %v776_v10 = vpop.permute.xlu1 %775  ;;  %v774_v37 = vpop.permute.xlu0 %773  ;;  %616 = vmatprep.mubr.bf16.mxu0 %v3010_v4 }
  0xb8   : > { %v778_v38 = vsel %vm777_vm8, %v774_v37, %v776_v10  ;;  %v779_v39 = vsel %vm777_vm8, %v776_v10, %v774_v37  ;;  %689 = vmatprep.mubr.bf16.mxu1 %v3010_v4 }
  0xb9   : > { %v788_v11 = vmul.f32 %v3289_v30, %v778_v38  ;;  %v789_v40 = vmul.f32 %v3297_v34, %v779_v39  ;;  %2745 = vmatprep.subr.msk.bf16.mxu0 %vm327_vm3, %v720_v36  ;;  %v725_v49 = vsel %vm327_vm3, %v719_v35, 0 }
  0xbb   : > { %v792_v47 = vpack.c.bf16 %v788_v11, %v788_v11  ;;  %v793_v48 = vpack.c.bf16 %v789_v40, %v789_v40  ;;  %v849_v50 = vpop.permute.xlu1 %848  ;;  %v847_v51 = vpop.permute.xlu0 %846 }
  0xbc   : > { %v851_v52 = vsel %vm850_vm9, %v847_v51, %v849_v50  ;;  %v852_v54 = vsel %vm850_vm9, %v849_v50, %v847_v51 }
  0xbd   : > { %2740 = vmatmul.mubr.msk.bf16.vlgmr.msra.gmra.mxu0 %vm323_vm5, %v2738_v43  ;;  %2743 = vmatmul.mubr.msk.bf16.vlgmr.msra.gmra.mxu1 %vm323_vm5, %v2741_v44  ;;  %v798_v55 = vsel %vm327_vm3, %v792_v47, 0  ;;  %v861_v56 = vmul.f32 %v3316_v45, %v851_v52  ;;  %v862_v57 = vmul.f32 %v3318_v46, %v852_v54 }
  0xbe   : > { %2748 = vmatprep.subr.msk.bf16.mxu1 %vm327_vm3, %v793_v48  ;;  %745 = vmatpush1.bf16.msra.mxu0 %v725_v49 }
  0xbf   : > { %818 = vmatpush1.bf16.msra.mxu1 %v798_v55  ;;  %v865_v58 = vpack.c.bf16 %v861_v56, %v861_v56  ;;  %v866_v59 = vpack.c.bf16 %v862_v57, %v862_v57  ;;  %762 = vmatprep.mubr.bf16.mxu0 %v3010_v4 }
  0xc0   : > { %835 = vmatprep.mubr.bf16.mxu1 %v3010_v4 }
  0xc1   : > { %2753 = vmatprep.subr.msk.bf16.mxu0 %vm327_vm3, %v866_v59  ;;  %v871_v63 = vsel %vm327_vm3, %v865_v58, 0 }
  0xc5   : > { %2746 = vmatmul.mubr.msk.bf16.vlgmr.msra.gmra.mxu0 %vm323_vm5, %v2744_v60  ;;  %2749 = vmatmul.mubr.msk.bf16.vlgmr.msra.gmra.mxu1 %vm323_vm5, %v2747_v62 }
  0xc6   : > { %891 = vmatpush1.bf16.msra.mxu0 %v871_v63  ;;  %908 = vmatprep.mubr.bf16.mxu0 %v3010_v4 }
  0xc7   : > { %985 = vmatprep.mubr.bf16.mxu1 %v3010_v4 }
  0xcd   : > { %2754 = vmatmul.mubr.msk.bf16.vlgmr.msra.gmra.mxu0 %vm323_vm5, %v2752_v0 }
  0xce   : > { %1035 = vmatprep.mubr.bf16.mxu0 %v3010_v4 }
 0x16d   : > { %v368_v1 = vpop.f32.mrf.mxu0  ;;  %v418_v3 = vpop.f32.mrf.mxu1 }
 0x16e   : > { %v419_v27 = vadd.f32 %v418_v3, %v368_v1 }
 0x16f   : > { %v370_v5 = vpop.f32.mrf.mxu0  ;;  %v420_v8 = vpop.f32.mrf.mxu1 }
 0x170   : > { %v421_v31 = vadd.f32 %v420_v8, %v370_v5 }
 0x171   : > { %v372_v12 = vpop.f32.mrf.mxu0  ;;  %v422_v13 = vpop.f32.mrf.mxu1 }
 0x173   : > { %v373_v14 = vpop.f32.mrf.mxu0  ;;  %v423_v2 = vpop.f32.mrf.mxu1 }
 0x175   : > { %v489_v20 = vpop.f32.mrf.mxu0  ;;  %v562_v6 = vpop.f32.mrf.mxu1 }
 0x176   : > { %v496_v32 = vadd.f32 %v489_v20, %v419_v27  ;;  %v2781_v20 = vld [vmem:[%s3124_s17 + $0x10] sm:$0xff] }
 0x177   : > { %v491_v23 = vpop.f32.mrf.mxu0  ;;  %v564_v24 = vpop.f32.mrf.mxu1 }
 0x178   : > { %v497_v36 = vadd.f32 %v491_v23, %v421_v31  ;;  %v569_v38 = vadd.f32 %v562_v6, %v496_v32  ;;  %v2782_v6 = vld [vmem:[%s3124_s17 + $0x18] sm:$0xff]  ;;  %v3386_v23 = vmax.f32 %v2781_v20, 0.0  ;;  %s251_s17 = sand.u32 1, %s2995_s19  }
 0x179   : > { %v493_v25 = vpop.f32.mrf.mxu0  ;;  %v566_v26 = vpop.f32.mrf.mxu1  ;;  %s2720_s11 = sshll.u32 %s251_s17, 5 }
 0x17a   : > { %v570_v40 = vadd.f32 %v564_v24, %v497_v36  ;;  %v3390_v24 = vmax.f32 %v2782_v6, 0.0  ;;  %s3666_s13 = scalar_lea.vmem [#allocation5], %s2720_s11  ;;  %s3017_s11 = smov [#allocation5]  }
 0x17b   : > { %v494_v28 = vpop.f32.mrf.mxu0  ;;  %v567_v29 = vpop.f32.mrf.mxu1 }
 0x17d   : > { %v618_v33 = vpop.f32.mrf.mxu0  ;;  %v691_v35 = vpop.f32.mrf.mxu1 }
 0x17e   : > { %v625_v43 = vadd.f32 %v618_v33, %v569_v38 }
 0x17f   : > { %v620_v10 = vpop.f32.mrf.mxu0  ;;  %v693_v37 = vpop.f32.mrf.mxu1 }
 0x180   : > { %v626_v48 = vadd.f32 %v620_v10, %v570_v40  ;;  %v698_v51 = vadd.f32 %v691_v35, %v625_v43  ;;  %v2755_v43 = vld [vmem:[%s3876_s3 + $0x4] sm:$0xf] }
 0x181   : > { %v622_v39 = vpop.f32.mrf.mxu0  ;;  %v695_v11 = vpop.f32.mrf.mxu1 }
 0x182   : > { %v699_v55 = vadd.f32 %v693_v37, %v626_v48 }
 0x183   : > { %v623_v44 = vpop.f32.mrf.mxu0  ;;  %v696_v47 = vpop.f32.mrf.mxu1 }
 0x185   : > { %v764_v49 = vpop.f32.mrf.mxu0  ;;  %v837_v50 = vpop.f32.mrf.mxu1 }
 0x186   : > { %v771_v56 = vadd.f32 %v764_v49, %v698_v51 }
 0x187   : > { %v766_v52 = vpop.f32.mrf.mxu0  ;;  %v839_v54 = vpop.f32.mrf.mxu1 }
 0x188   : > { %v772_v59 = vadd.f32 %v766_v52, %v699_v55  ;;  %v844_v63 = vadd.f32 %v837_v50, %v771_v56  ;;  %v929_v56 = vld [vmem:[%s3876_s3] sm:$0xf] }
 0x189   : > { %v768_v57 = vpop.f32.mrf.mxu0  ;;  %v841_v58 = vpop.f32.mrf.mxu1 }
 0x18a   : > { %v845_v1 = vadd.f32 %v839_v54, %v772_v59 }
 0x18b   : > { %v769_v60 = vpop.f32.mrf.mxu0  ;;  %v842_v62 = vpop.f32.mrf.mxu1 }
 0x18d   : > { %v910_v0 = vpop.f32.mrf.mxu0 }
 0x18e   : > { %v917_v3 = vadd.f32 %v910_v0, %v844_v63 }
 0x18f   : > { %v912_v5 = vpop.f32.mrf.mxu0 }
 0x190   : > { %v3350_v8 = vmax.f32 %v917_v3, 0.0  ;;  %v918_v12 = vadd.f32 %v912_v5, %v845_v1 }
 0x191   : > { %v914_v13 = vpop.f32.mrf.mxu0 }
 0x192   : > { %v3352_v14 = vmax.f32 %v918_v12, 0.0  ;;  %932 = vrot.lane.b32.xlu0 %v3350_v8, %s3009_s25  ;;  %v1174_v63 = vpack.c.bf16 %v3350_v8, %v3350_v8  ;;  %v2760_v13 = vld [vmem:[%s3876_s3 + $0x8] sm:$0xf] }
 0x193   : > { %v915_v2 = vpop.f32.mrf.mxu0 }
 0x194   : > { %934 = vrot.lane.b32.xlu1 %v3352_v14, %s3009_s25  ;;  %v1175_v12 = vpack.c.bf16 %v3352_v14, %v3352_v14 }
 0x196   : > { %921 = vrot.lane.b32.xlu0 %v3350_v8, %s3008_s23 }
 0x198   : > { %923 = vrot.lane.b32.xlu1 %v3352_v14, %s3008_s23 }
 0x19a   : > { %1044 = vrot.lane.b32.xlu0 %v3350_v8, %s3011_s26 }
 0x19c   : > { %1046 = vrot.lane.b32.xlu1 %v3352_v14, %s3011_s26 }
 0x19e   : > { %1108 = vrot.lane.b32.xlu0 %v3350_v8, %s3012_s30 }
 0x1a0   : > { %1110 = vrot.lane.b32.xlu1 %v3352_v14, %s3012_s30 }
 0x1a2   : > { %1228 = vrot.lane.b32.xlu0 %v3350_v8, %s3013_s6 }
 0x1a4   : > { %1230 = vrot.lane.b32.xlu1 %v3352_v14, %s3013_s6 }
 0x1a6   : > { %1292 = vrot.lane.b32.xlu0 %v3350_v8, %s3014_s7 }
 0x1a8   : > { %1294 = vrot.lane.b32.xlu1 %v3352_v14, %s3014_s7 }
 0x1aa   : > { %1356 = vrot.lane.b32.xlu0 %v3350_v8, %s3015_s8 }
 0x1ac   : > { %1358 = vrot.lane.b32.xlu1 %v3352_v14, %s3015_s8 }
 0x1ae   : > { %1420 = vrot.lane.b32.xlu0 %v3350_v8, %s3016_s9 }
 0x1b0   : > { %1422 = vrot.lane.b32.xlu1 %v3352_v14, %s3016_s9 }
 0x1b2   : > { %1507 = vrot.lane.b32.xlu0 %v3386_v23, %s3009_s25 }
 0x1b4   : > { %1509 = vrot.lane.b32.xlu1 %v3390_v24, %s3009_s25 }
 0x1b6   : > { %1496 = vrot.lane.b32.xlu0 %v3386_v23, %s3008_s23 }
 0x1b8   : > { %1498 = vrot.lane.b32.xlu1 %v3390_v24, %s3008_s23 }
 0x1ba   : > { %1618 = vrot.lane.b32.xlu0 %v3386_v23, %s3011_s26 }
 0x1bc   : > { %1620 = vrot.lane.b32.xlu1 %v3390_v24, %s3011_s26 }
 0x1be   : > { %1681 = vrot.lane.b32.xlu0 %v3386_v23, %s3012_s30 }
 0x1c0   : > { %1683 = vrot.lane.b32.xlu1 %v3390_v24, %s3012_s30 }
 0x1c2   : > { %1799 = vrot.lane.b32.xlu0 %v3386_v23, %s3013_s6 }
 0x1c4   : > { %1801 = vrot.lane.b32.xlu1 %v3390_v24, %s3013_s6 }
 0x1c6   : > { %1862 = vrot.lane.b32.xlu0 %v3386_v23, %s3014_s7 }
 0x1c8   : > { %1864 = vrot.lane.b32.xlu1 %v3390_v24, %s3014_s7 }
 0x1ca   : > { %1925 = vrot.lane.b32.xlu0 %v3386_v23, %s3015_s8 }
 0x1cc   : > { %1927 = vrot.lane.b32.xlu1 %v3390_v24, %s3015_s8 }
 0x1ce   : > { %1988 = vrot.lane.b32.xlu0 %v3386_v23, %s3016_s9 }
 0x1d0   : > { %1990 = vrot.lane.b32.xlu1 %v3390_v24, %s3016_s9 }
 0x204   : > { %v933_v25 = vpop.permute.xlu0 %932 }
 0x206   : > { %v935_v26 = vpop.permute.xlu1 %934 }
 0x207   : > { %v936_v27 = vsel %vm306_vm1, %v933_v25, %v935_v26  ;;  %v937_v28 = vsel %vm306_vm1, %v935_v26, %v933_v25 }
 0x208   : > { %v938_v29 = vmul.f32 %v937_v28, %v3183_v16  ;;  %v939_v31 = vmul.f32 %v936_v27, %v3186_v17  ;;  %v922_v32 = vpop.permute.xlu0 %921 }
 0x20a   : > { %v942_v33 = vpack.c.bf16 %v938_v29, %v938_v29  ;;  %v943_v35 = vpack.c.bf16 %v939_v31, %v939_v31  ;;  %v924_v36 = vpop.permute.xlu1 %923  ;;  %v1180_v29 = vsel %vm327_vm3, %v1174_v63, 0  ;;  %v2763_v31 = vld [vmem:[%s3876_s3 + $0xc] sm:$0xf] }
 0x20b   : > { %v925_v10 = vsel %vm286_vm0, %v922_v32, %v924_v36  ;;  %v926_v37 = vsel %vm286_vm0, %v924_v36, %v922_v32 }
 0x20c   : > { %v927_v38 = vmul.f32 %v926_v37, %v3180_v15  ;;  %v928_v39 = vmul.f32 %v925_v10, %v3189_v18  ;;  %2756 = vmatprep.subr.msk.bf16.mxu1 %vm327_vm3, %v943_v35  ;;  %v1045_v11 = vpop.permute.xlu0 %1044  ;;  %v948_v40 = vsel %vm327_vm3, %v942_v33, 0 }
 0x20d   : > { %968 = vmatpush1.bf16.msra.mxu1 %v948_v40  ;;  %v2766_v40 = vld [vmem:[%s3876_s3 + $0x10] sm:$0xf] }
 0x20e   : > { %v930_v44 = vpack.c.bf16 %v927_v38, %v927_v38  ;;  %v931_v47 = vpack.c.bf16 %v928_v39, %v928_v39  ;;  %v1047_v48 = vpop.permute.xlu1 %1046 }
 0x20f   : > { %v1048_v49 = vsel %vm429_vm2, %v1045_v11, %v1047_v48  ;;  %v1049_v50 = vsel %vm429_vm2, %v1047_v48, %v1045_v11 }
 0x210   : > { %v1050_v51 = vmul.f32 %v1049_v50, %v3193_v21  ;;  %v1051_v52 = vmul.f32 %v1048_v49, %v3196_v22  ;;  %2757 = vmatmul.mubr.msk.bf16.vlgmr.msra.gmra.mxu1 %vm323_vm5, %v2755_v43  ;;  %2758 = vmatprep.subr.msk.bf16.mxu0 %vm327_vm3, %v931_v47  ;;  %v1109_v54 = vpop.permute.xlu0 %1108  ;;  %v998_v55 = vsel %vm327_vm3, %v930_v44, 0 }
 0x211   : > { %1018 = vmatpush1.bf16.msra.mxu0 %v998_v55  ;;  %1097 = vmatprep.mubr.bf16.mxu1 %v3010_v4  ;;  %v2769_v55 = vld [vmem:[%s3876_s3 + $0x14] sm:$0xf] }
 0x212   : > { %v1054_v57 = vpack.c.bf16 %v1050_v51, %v1050_v51  ;;  %v1055_v58 = vpack.c.bf16 %v1051_v52, %v1051_v52  ;;  %v1111_v59 = vpop.permute.xlu1 %1110 }
 0x213   : > { %v1112_v60 = vsel %vm502_vm4, %v1109_v54, %v1111_v59  ;;  %v1113_v62 = vsel %vm502_vm4, %v1111_v59, %v1109_v54 }
 0x214   : > { %v1114_v0 = vmul.f32 %v1113_v62, %v3218_v41  ;;  %v1115_v1 = vmul.f32 %v1112_v60, %v3221_v42  ;;  %2759 = vmatmul.mubr.msk.bf16.vlgmr.msra.gmra.mxu0 %vm323_vm5, %v929_v56  ;;  %2761 = vmatprep.subr.msk.bf16.mxu1 %vm327_vm3, %v1055_v58  ;;  %v1229_v3 = vpop.permute.xlu0 %1228  ;;  %v1060_v5 = vsel %vm327_vm3, %v1054_v57, 0 }
 0x215   : > { %1080 = vmatpush1.bf16.msra.mxu1 %v1060_v5  ;;  %1161 = vmatprep.mubr.bf16.mxu0 %v3010_v4 }
 0x216   : > { %v1118_v8 = vpack.c.bf16 %v1114_v0, %v1114_v0  ;;  %v1119_v2 = vpack.c.bf16 %v1115_v1, %v1115_v1  ;;  %v1231_v20 = vpop.permute.xlu1 %1230  ;;  %2767 = vmatprep.subr.msk.bf16.mxu1 %vm327_vm3, %v1175_v12 }
 0x217   : > { %v1232_v6 = vsel %vm631_vm6, %v1229_v3, %v1231_v20  ;;  %v1233_v25 = vsel %vm631_vm6, %v1231_v20, %v1229_v3  ;;  %v2772_v3 = vld [vmem:[%s3876_s3 + $0x18] sm:$0xf] }
 0x218   : > { %v1234_v14 = vmul.f32 %v1232_v6, %v3237_v53  ;;  %v1235_v26 = vmul.f32 %v1233_v25, %v3252_v61  ;;  %2762 = vmatmul.mubr.msk.bf16.vlgmr.msra.gmra.mxu1 %vm323_vm5, %v2760_v13  ;;  %2764 = vmatprep.subr.msk.bf16.mxu0 %vm327_vm3, %v1119_v2  ;;  %v1293_v27 = vpop.permute.xlu0 %1292  ;;  %v1124_v28 = vsel %vm327_vm3, %v1118_v8, 0 }
 0x219   : > { %1144 = vmatpush1.bf16.msra.mxu0 %v1124_v28  ;;  %1200 = vmatpush1.bf16.msra.mxu1 %v1180_v29 }
 0x21a   : > { %v1238_v32 = vpack.c.bf16 %v1234_v14, %v1234_v14  ;;  %v1239_v33 = vpack.c.bf16 %v1235_v26, %v1235_v26  ;;  %v1295_v35 = vpop.permute.xlu1 %1294  ;;  %1217 = vmatprep.mubr.bf16.mxu1 %v3010_v4  ;;  %v2775_v26 = vld [vmem:[%s3876_s3 + $0x1c] sm:$0xf] }
 0x21b   : > { %v1296_v36 = vsel %vm704_vm7, %v1293_v27, %v1295_v35  ;;  %v1297_v10 = vsel %vm704_vm7, %v1295_v35, %v1293_v27 }
 0x21c   : > { %v1298_v37 = vmul.f32 %v1296_v36, %v3265_v9  ;;  %v1299_v38 = vmul.f32 %v1297_v10, %v3274_v19  ;;  %2765 = vmatmul.mubr.msk.bf16.vlgmr.msra.gmra.mxu0 %vm323_vm5, %v2763_v31  ;;  %2770 = vmatprep.subr.msk.bf16.mxu0 %vm327_vm3, %v1239_v33  ;;  %v1357_v39 = vpop.permute.xlu0 %1356  ;;  %v1244_v11 = vsel %vm327_vm3, %v1238_v32, 0 }
 0x21d   : > { %1264 = vmatpush1.bf16.msra.mxu0 %v1244_v11  ;;  %1281 = vmatprep.mubr.bf16.mxu0 %v3010_v4 }
 0x21e   : > { %v1302_v43 = vpack.c.bf16 %v1298_v37, %v1298_v37  ;;  %v1303_v44 = vpack.c.bf16 %v1299_v38, %v1299_v38  ;;  %v1359_v47 = vpop.permute.xlu1 %1358  ;;  %v2778_v37 = vld [vmem:[%s3876_s3 + $0x20] sm:$0xf] }
 0x21f   : > { %v1360_v48 = vsel %vm777_vm8, %v1357_v39, %v1359_v47  ;;  %v1361_v49 = vsel %vm777_vm8, %v1359_v47, %v1357_v39 }
 0x220   : > { %v1362_v50 = vmul.f32 %v1360_v48, %v3289_v30  ;;  %v1363_v51 = vmul.f32 %v1361_v49, %v3297_v34  ;;  %v1421_v52 = vpop.permute.xlu0 %1420  ;;  %2768 = vmatmul.mubr.msk.bf16.vlgmr.msra.gmra.mxu1 %vm323_vm5, %v2766_v40  ;;  %2773 = vmatprep.subr.msk.bf16.mxu1 %vm327_vm3, %v1303_v44  ;;  %v1308_v54 = vsel %vm327_vm3, %v1302_v43, 0 }
 0x221   : > { %1328 = vmatpush1.bf16.msra.mxu1 %v1308_v54  ;;  %1345 = vmatprep.mubr.bf16.mxu1 %v3010_v4 }
 0x222   : > { %v1366_v56 = vpack.c.bf16 %v1362_v50, %v1362_v50  ;;  %v1367_v57 = vpack.c.bf16 %v1363_v51, %v1363_v51  ;;  %v1423_v58 = vpop.permute.xlu1 %1422  ;;  %v2785_v50 = vld [vmem:[%s3875_s2 + $0x4] sm:$0xf] }
 0x223   : > { %v1424_v59 = vsel %vm850_vm9, %v1421_v52, %v1423_v58  ;;  %v1425_v60 = vsel %vm850_vm9, %v1423_v58, %v1421_v52 }
 0x224   : > { %v1426_v62 = vmul.f32 %v3316_v45, %v1424_v59  ;;  %v1427_v63 = vmul.f32 %v3318_v46, %v1425_v60  ;;  %2771 = vmatmul.mubr.msk.bf16.vlgmr.msra.gmra.mxu0 %vm323_vm5, %v2769_v55  ;;  %2776 = vmatprep.subr.msk.bf16.mxu0 %vm327_vm3, %v1367_v57  ;;  %v1372_v0 = vsel %vm327_vm3, %v1366_v56, 0  ;;  %v1508_v1 = vpop.permute.xlu0 %1507  ;;  %v1746_v55 = vpack.c.bf16 %v3390_v24, %v3390_v24  ;;  %v1504_v24 = vld [vmem:[%s3875_s2] sm:$0xf] }
 0x225   : > { %1392 = vmatpush1.bf16.msra.mxu0 %v1372_v0  ;;  %1409 = vmatprep.mubr.bf16.mxu0 %v3010_v4 }
 0x226   : > { %v1430_v5 = vpack.c.bf16 %v1426_v62, %v1426_v62  ;;  %v1431_v12 = vpack.c.bf16 %v1427_v63, %v1427_v63  ;;  %v1510_v13 = vpop.permute.xlu1 %1509 }
 0x227   : > { %v1511_v8 = vsel %vm306_vm1, %v1508_v1, %v1510_v13  ;;  %v1512_v2 = vsel %vm306_vm1, %v1510_v13, %v1508_v1 }
 0x228   : > { %2774 = vmatmul.mubr.msk.bf16.vlgmr.msra.gmra.mxu1 %vm323_vm5, %v2772_v3  ;;  %2779 = vmatprep.subr.msk.bf16.mxu1 %vm327_vm3, %v1431_v12  ;;  %v1436_v20 = vsel %vm327_vm3, %v1430_v5, 0  ;;  %v1513_v6 = vmul.f32 %v1512_v2, %v3183_v16  ;;  %v1514_v25 = vmul.f32 %v1511_v8, %v3186_v17  ;;  %v1497_v14 = vpop.permute.xlu0 %1496  ;;  %v1745_v3 = vpack.c.bf16 %v3386_v23, %v3386_v23  ;;  %v2790_v23 = vld [vmem:[%s3875_s2 + $0x8] sm:$0xf] }
 0x229   : > { %1456 = vmatpush1.bf16.msra.mxu1 %v1436_v20  ;;  %1473 = vmatprep.mubr.bf16.mxu1 %v3010_v4 }
 0x22a   : > { %v1516_v27 = vpack.c.bf16 %v1513_v6, %v1513_v6  ;;  %v1517_v28 = vpack.c.bf16 %v1514_v25, %v1514_v25  ;;  %v1499_v29 = vpop.permute.xlu1 %1498 }
 0x22b   : > { %v1500_v31 = vsel %vm286_vm0, %v1497_v14, %v1499_v29  ;;  %v1501_v32 = vsel %vm286_vm0, %v1499_v29, %v1497_v14  ;;  %v1751_v14 = vsel %vm327_vm3, %v1745_v3, 0 }
 0x22c   : > { %2777 = vmatmul.mubr.msk.bf16.vlgmr.msra.gmra.mxu0 %vm323_vm5, %v2775_v26  ;;  %v1502_v33 = vmul.f32 %v1501_v32, %v3180_v15  ;;  %v1503_v35 = vmul.f32 %v1500_v31, %v3189_v18  ;;  %2786 = vmatprep.subr.msk.bf16.mxu0 %vm327_vm3, %v1517_v28  ;;  %v1522_v36 = vsel %vm327_vm3, %v1516_v27, 0  ;;  %v1619_v10 = vpop.permute.xlu0 %1618 }
 0x22d   : > { %1542 = vmatpush1.bf16.msra.mxu0 %v1522_v36  ;;  %1559 = vmatprep.mubr.bf16.mxu0 %v3010_v4 }
 0x22e   : > { %v1505_v38 = vpack.c.bf16 %v1502_v33, %v1502_v33  ;;  %v1506_v39 = vpack.c.bf16 %v1503_v35, %v1503_v35  ;;  %v1621_v11 = vpop.permute.xlu1 %1620  ;;  %v2793_v33 = vld [vmem:[%s3875_s2 + $0xc] sm:$0xf] }
 0x22f   : > { %v1622_v40 = vsel %vm429_vm2, %v1619_v10, %v1621_v11  ;;  %v1623_v43 = vsel %vm429_vm2, %v1621_v11, %v1619_v10 }
 0x230   : > { %2780 = vmatmul.mubr.msk.bf16.vlgmr.msra.gmra.mxu1 %vm323_vm5, %v2778_v37  ;;  %v1624_v44 = vmul.f32 %v1623_v43, %v3193_v21  ;;  %v1625_v47 = vmul.f32 %v1622_v40, %v3196_v22  ;;  %2788 = vmatprep.subr.msk.bf16.mxu1 %vm327_vm3, %v1506_v39  ;;  %v1572_v48 = vsel %vm327_vm3, %v1505_v38, 0  ;;  %v1682_v49 = vpop.permute.xlu0 %1681 }
 0x231   : > { %1592 = vmatpush1.bf16.msra.mxu1 %v1572_v48  ;;  %1609 = vmatprep.mubr.bf16.mxu1 %v3010_v4 }
 0x232   : > { %v1627_v51 = vpack.c.bf16 %v1624_v44, %v1624_v44  ;;  %v1628_v52 = vpack.c.bf16 %v1625_v47, %v1625_v47  ;;  %v1684_v54 = vpop.permute.xlu1 %1683  ;;  %v2796_v44 = vld [vmem:[%s3875_s2 + $0x10] sm:$0xf] }
 0x233   : > { %v1685_v56 = vsel %vm502_vm4, %v1682_v49, %v1684_v54  ;;  %v1686_v57 = vsel %vm502_vm4, %v1684_v54, %v1682_v49 }
 0x234   : > { %2787 = vmatmul.mubr.msk.bf16.vlgmr.msra.gmra.mxu0 %vm323_vm5, %v2785_v50  ;;  %v1687_v58 = vmul.f32 %v1686_v57, %v3218_v41  ;;  %v1688_v59 = vmul.f32 %v1685_v56, %v3221_v42  ;;  %2791 = vmatprep.subr.msk.bf16.mxu0 %vm327_vm3, %v1628_v52  ;;  %v1633_v60 = vsel %vm327_vm3, %v1627_v51, 0  ;;  %v1800_v62 = vpop.permute.xlu0 %1799  ;;  %v2799_v56 = vld [vmem:[%s3875_s2 + $0x14] sm:$0xf] }
 0x235   : > { %1653 = vmatpush1.bf16.msra.mxu0 %v1633_v60  ;;  %1670 = vmatprep.mubr.bf16.mxu0 %v3010_v4  ;;  %v2805_v60 = vld [vmem:[%s3875_s2 + $0x1c] sm:$0xf] }
 0x236   : > { %v1690_v63 = vpack.c.bf16 %v1687_v58, %v1687_v58  ;;  %v1691_v0 = vpack.c.bf16 %v1688_v59, %v1688_v59  ;;  %v1802_v1 = vpop.permute.xlu1 %1801  ;;  %2797 = vmatprep.subr.msk.bf16.mxu0 %vm327_vm3, %v1746_v55 }
 0x237   : > { %v1803_v5 = vsel %vm631_vm6, %v1800_v62, %v1802_v1  ;;  %v1804_v12 = vsel %vm631_vm6, %v1802_v1, %v1800_v62  ;;  %v2808_v62 = vld [vmem:[%s3875_s2 + $0x20] sm:$0xf] }
 0x238   : > { %2789 = vmatmul.mubr.msk.bf16.vlgmr.msra.gmra.mxu1 %vm323_vm5, %v1504_v24  ;;  %2794 = vmatprep.subr.msk.bf16.mxu1 %vm327_vm3, %v1691_v0  ;;  %v1696_v13 = vsel %vm327_vm3, %v1690_v63, 0  ;;  %v1805_v8 = vmul.f32 %v1803_v5, %v3237_v53  ;;  %v1806_v2 = vmul.f32 %v1804_v12, %v3252_v61  ;;  %v1863_v20 = vpop.permute.xlu0 %1862 }
 0x239   : > { %1716 = vmatpush1.bf16.msra.mxu1 %v1696_v13  ;;  %1733 = vmatprep.mubr.bf16.mxu1 %v3010_v4 }
 0x23a   : > { %v1808_v6 = vpack.c.bf16 %v1805_v8, %v1805_v8  ;;  %v1809_v25 = vpack.c.bf16 %v1806_v2, %v1806_v2  ;;  %v1865_v26 = vpop.permute.xlu1 %1864 }
 0x23b   : > { %v1866_v27 = vsel %vm704_vm7, %v1863_v20, %v1865_v26  ;;  %v1867_v28 = vsel %vm704_vm7, %v1865_v26, %v1863_v20 }
 0x23c   : > { %2792 = vmatmul.mubr.msk.bf16.vlgmr.msra.gmra.mxu0 %vm323_vm5, %v2790_v23  ;;  %v1868_v29 = vmul.f32 %v1866_v27, %v3265_v9  ;;  %v1869_v31 = vmul.f32 %v1867_v28, %v3274_v19  ;;  %2800 = vmatprep.subr.msk.bf16.mxu1 %vm327_vm3, %v1809_v25  ;;  %v1926_v32 = vpop.permute.xlu0 %1925  ;;  %v1814_v10 = vsel %vm327_vm3, %v1808_v6, 0 }
 0x23d   : > { %1771 = vmatpush1.bf16.msra.mxu0 %v1751_v14  ;;  %1788 = vmatprep.mubr.bf16.mxu0 %v3010_v4 }
 0x23e   : > { %v1871_v35 = vpack.c.bf16 %v1868_v29, %v1868_v29  ;;  %v1872_v36 = vpack.c.bf16 %v1869_v31, %v1869_v31  ;;  %v1928_v37 = vpop.permute.xlu1 %1927 }
 0x23f   : > { %v1929_v38 = vsel %vm777_vm8, %v1926_v32, %v1928_v37  ;;  %v1930_v39 = vsel %vm777_vm8, %v1928_v37, %v1926_v32 }
 0x240   : > { %2795 = vmatmul.mubr.msk.bf16.vlgmr.msra.gmra.mxu1 %vm323_vm5, %v2793_v33  ;;  %v1931_v11 = vmul.f32 %v1929_v38, %v3289_v30  ;;  %v1932_v40 = vmul.f32 %v1930_v39, %v3297_v34  ;;  %2803 = vmatprep.subr.msk.bf16.mxu0 %vm327_vm3, %v1872_v36  ;;  %v1989_v43 = vpop.permute.xlu0 %1988  ;;  %v1877_v49 = vsel %vm327_vm3, %v1871_v35, 0 }
 0x241   : > { %1834 = vmatpush1.bf16.msra.mxu1 %v1814_v10  ;;  %1851 = vmatprep.mubr.bf16.mxu1 %v3010_v4 }
 0x242   : > { %v1934_v47 = vpack.c.bf16 %v1931_v11, %v1931_v11  ;;  %v1935_v48 = vpack.c.bf16 %v1932_v40, %v1932_v40  ;;  %v1991_v50 = vpop.permute.xlu1 %1990 }
 0x243   : > { %v1992_v51 = vsel %vm850_vm9, %v1989_v43, %v1991_v50  ;;  %v1993_v52 = vsel %vm850_vm9, %v1991_v50, %v1989_v43 }
 0x244   : > { %2798 = vmatmul.mubr.msk.bf16.vlgmr.msra.gmra.mxu0 %vm323_vm5, %v2796_v44  ;;  %v1994_v54 = vmul.f32 %v3316_v45, %v1992_v51  ;;  %v1995_v55 = vmul.f32 %v3318_v46, %v1993_v52  ;;  %2806 = vmatprep.subr.msk.bf16.mxu1 %vm327_vm3, %v1935_v48  ;;  %v1940_v59 = vsel %vm327_vm3, %v1934_v47, 0  ;;  %v2802_v45 = vld [vmem:[%s3875_s2 + $0x18] sm:$0xf] }
 0x245   : > { %1897 = vmatpush1.bf16.msra.mxu0 %v1877_v49  ;;  %1914 = vmatprep.mubr.bf16.mxu0 %v3010_v4 }
 0x246   : > { %v1997_v57 = vpack.c.bf16 %v1994_v54, %v1994_v54  ;;  %v1998_v58 = vpack.c.bf16 %v1995_v55, %v1995_v55 }
 0x248   : > { %2801 = vmatmul.mubr.msk.bf16.vlgmr.msra.gmra.mxu1 %vm323_vm5, %v2799_v56  ;;  %2809 = vmatprep.subr.msk.bf16.mxu0 %vm327_vm3, %v1998_v58  ;;  %v2003_v46 = vsel %vm327_vm3, %v1997_v57, 0 }
 0x249   : > { %1960 = vmatpush1.bf16.msra.mxu1 %v1940_v59  ;;  %1977 = vmatprep.mubr.bf16.mxu1 %v3010_v4 }
 0x24c   : > { %2804 = vmatmul.mubr.msk.bf16.vlgmr.msra.gmra.mxu0 %vm323_vm5, %v2802_v45  ;;  %v276_v45 = vld [vmem:[%s3660_s10] sm:$0xff] }
 0x24d   : > { %2023 = vmatpush1.bf16.msra.mxu0 %v2003_v46  ;;  %2040 = vmatprep.mubr.bf16.mxu0 %v3010_v4 }
 0x250   : > { %2807 = vmatmul.mubr.msk.bf16.vlgmr.msra.gmra.mxu1 %vm323_vm5, %v2805_v60 }
 0x251   : > { %2116 = vmatprep.mubr.bf16.mxu1 %v3010_v4 }
 0x254   : > { %2810 = vmatmul.mubr.msk.bf16.vlgmr.msra.gmra.mxu0 %vm323_vm5, %v2808_v62 }
 0x255   : > { %2166 = vmatprep.mubr.bf16.mxu0 %v3010_v4 }
 0x2d0   : > { %v987_v24 = vpop.f32.mrf.mxu1 }
 0x2d2   : > { %v989_v63 = vpop.f32.mrf.mxu1 }
 0x2d4   : > { %v991_v0 = vpop.f32.mrf.mxu1  ;;  %v1037_v1 = vpop.f32.mrf.mxu0 }
 0x2d5   : > { %v1038_v29 = vadd.f32 %v1037_v1, %v987_v24 }
 0x2d6   : > { %v992_v3 = vpop.f32.mrf.mxu1  ;;  %v1039_v5 = vpop.f32.mrf.mxu0 }
 0x2d7   : > { %v1040_v33 = vadd.f32 %v1039_v5, %v989_v63  ;;  %v277_v63 = vld [vmem:[%s3660_s10 + $0x8] sm:$0xff] }
 0x2d8   : > { %v1041_v12 = vpop.f32.mrf.mxu0  ;;  %v1099_v13 = vpop.f32.mrf.mxu1 }
 0x2d9   : > { %v1106_v35 = vadd.f32 %v1099_v13, %v1038_v29 }
 0x2da   : > { %v1042_v8 = vpop.f32.mrf.mxu0  ;;  %v1101_v2 = vpop.f32.mrf.mxu1 }
 0x2db   : > { %v1107_v37 = vadd.f32 %v1101_v2, %v1040_v33 }
 0x2dc   : > { %v1103_v20 = vpop.f32.mrf.mxu1  ;;  %v1163_v23 = vpop.f32.mrf.mxu0 }
 0x2dd   : > { %v1170_v38 = vadd.f32 %v1163_v23, %v1106_v35 }
 0x2de   : > { %v1104_v6 = vpop.f32.mrf.mxu1  ;;  %v1165_v25 = vpop.f32.mrf.mxu0 }
 0x2df   : > { %v1171_v40 = vadd.f32 %v1165_v25, %v1107_v37 }
 0x2e0   : > { %v1167_v14 = vpop.f32.mrf.mxu0  ;;  %v1219_v26 = vpop.f32.mrf.mxu1 }
 0x2e1   : > { %v1226_v43 = vadd.f32 %v1219_v26, %v1170_v38 }
 0x2e2   : > { %v1168_v27 = vpop.f32.mrf.mxu0  ;;  %v1221_v28 = vpop.f32.mrf.mxu1 }
 0x2e3   : > { %v1227_v48 = vadd.f32 %v1221_v28, %v1171_v40 }
 0x2e4   : > { %v1223_v31 = vpop.f32.mrf.mxu1  ;;  %v1283_v32 = vpop.f32.mrf.mxu0 }
 0x2e5   : > { %v1290_v49 = vadd.f32 %v1283_v32, %v1226_v43 }
 0x2e6   : > { %v1224_v36 = vpop.f32.mrf.mxu1  ;;  %v1285_v10 = vpop.f32.mrf.mxu0 }
 0x2e7   : > { %v1291_v52 = vadd.f32 %v1285_v10, %v1227_v48 }
 0x2e8   : > { %v1287_v39 = vpop.f32.mrf.mxu0  ;;  %v1347_v11 = vpop.f32.mrf.mxu1 }
 0x2e9   : > { %v1354_v54 = vadd.f32 %v1347_v11, %v1290_v49 }
 0x2ea   : > { %v1288_v44 = vpop.f32.mrf.mxu0  ;;  %v1349_v47 = vpop.f32.mrf.mxu1 }
 0x2eb   : > { %v1355_v57 = vadd.f32 %v1349_v47, %v1291_v52 }
 0x2ec   : > { %v1351_v50 = vpop.f32.mrf.mxu1  ;;  %v1411_v51 = vpop.f32.mrf.mxu0 }
 0x2ed   : > { %v1418_v58 = vadd.f32 %v1411_v51, %v1354_v54 }
 0x2ee   : > { %v1352_v55 = vpop.f32.mrf.mxu1  ;;  %v1413_v56 = vpop.f32.mrf.mxu0 }
 0x2ef   : > { %v1419_v60 = vadd.f32 %v1413_v56, %v1355_v57 }
 0x2f0   : > { %v1415_v59 = vpop.f32.mrf.mxu0  ;;  %v1475_v46 = vpop.f32.mrf.mxu1 }
 0x2f1   : > { %v1482_v62 = vadd.f32 %v1475_v46, %v1418_v58 }
 0x2f2   : > { %v1416_v24 = vpop.f32.mrf.mxu0  ;;  %v1477_v0 = vpop.f32.mrf.mxu1 }
 0x2f3   : > { %v1484_v1 = vadd.f32 %v1482_v62, %v276_v45  ;;  %v1483_v3 = vadd.f32 %v1477_v0, %v1419_v60 }
 0x2f4   : > { %v1479_v5 = vpop.f32.mrf.mxu1  ;;  %v1561_v12 = vpop.f32.mrf.mxu0 }
 0x2f5   : > { %1486 = vst [vmem:[%s3666_s13] sm:$0xff] %v1484_v1  ;;  %v1485_v13 = vadd.f32 %v1483_v3, %v277_v63 }
 0x2f6   : > { %v1480_v8 = vpop.f32.mrf.mxu1  ;;  %v1563_v2 = vpop.f32.mrf.mxu0 }
 0x2f7   : > { %1487 = vst [vmem:[%s3666_s13 + $0x8] sm:$0xff] %v1485_v13 }
 0x2f8   : > { %v1565_v20 = vpop.f32.mrf.mxu0  ;;  %v1611_v23 = vpop.f32.mrf.mxu1 }
 0x2f9   : > { %v1612_v38 = vadd.f32 %v1611_v23, %v1561_v12 }
 0x2fa   : > { %v1566_v6 = vpop.f32.mrf.mxu0  ;;  %v1613_v25 = vpop.f32.mrf.mxu1 }
 0x2fb   : > { %v1614_v40 = vadd.f32 %v1613_v25, %v1563_v2 }
 0x2fc   : > { %v1615_v14 = vpop.f32.mrf.mxu1  ;;  %v1672_v26 = vpop.f32.mrf.mxu0 }
 0x2fd   : > { %v1679_v43 = vadd.f32 %v1672_v26, %v1612_v38 }
 0x2fe   : > { %v1616_v27 = vpop.f32.mrf.mxu1  ;;  %v1674_v28 = vpop.f32.mrf.mxu0 }
 0x2ff   : > { %v1680_v48 = vadd.f32 %v1674_v28, %v1614_v40 }
 0x300   : > { %v1676_v29 = vpop.f32.mrf.mxu0  ;;  %v1735_v31 = vpop.f32.mrf.mxu1 }
 0x301   : > { %v1742_v49 = vadd.f32 %v1735_v31, %v1679_v43 }
 0x302   : > { %v1677_v32 = vpop.f32.mrf.mxu0  ;;  %v1737_v33 = vpop.f32.mrf.mxu1 }
 0x303   : > { %v1743_v52 = vadd.f32 %v1737_v33, %v1680_v48 }
 0x304   : > { %v1739_v35 = vpop.f32.mrf.mxu1  ;;  %v1790_v36 = vpop.f32.mrf.mxu0 }
 0x305   : > { %v1797_v54 = vadd.f32 %v1790_v36, %v1742_v49 }
 0x306   : > { %v1740_v10 = vpop.f32.mrf.mxu1  ;;  %v1792_v37 = vpop.f32.mrf.mxu0 }
 0x307   : > { %v1798_v57 = vadd.f32 %v1792_v37, %v1743_v52 }
 0x308   : > { %v1794_v39 = vpop.f32.mrf.mxu0  ;;  %v1853_v11 = vpop.f32.mrf.mxu1 }
 0x309   : > { %v1860_v58 = vadd.f32 %v1853_v11, %v1797_v54 }
 0x30a   : > { %v1795_v44 = vpop.f32.mrf.mxu0  ;;  %v1855_v47 = vpop.f32.mrf.mxu1 }
 0x30b   : > { %v1861_v46 = vadd.f32 %v1855_v47, %v1798_v57 }
 0x30c   : > { %v1857_v50 = vpop.f32.mrf.mxu1  ;;  %v1916_v51 = vpop.f32.mrf.mxu0 }
 0x30d   : > { %v1923_v60 = vadd.f32 %v1916_v51, %v1860_v58  ;;  %v2061_v51 = vld [vmem:[%s3876_s3] sm:$0xf] }
 0x30e   : > { %v1858_v55 = vpop.f32.mrf.mxu1  ;;  %v1918_v56 = vpop.f32.mrf.mxu0 }
 0x30f   : > { %v1924_v63 = vadd.f32 %v1918_v56, %v1861_v46 }
 0x310   : > { %v1920_v59 = vpop.f32.mrf.mxu0  ;;  %v1979_v45 = vpop.f32.mrf.mxu1 }
 0x311   : > { %v1986_v0 = vadd.f32 %v1979_v45, %v1923_v60  ;;  %v2816_v60 = vld [vmem:[%s3876_s3 + $0x8] sm:$0xf] }
 0x312   : > { %v1921_v62 = vpop.f32.mrf.mxu0  ;;  %v1981_v24 = vpop.f32.mrf.mxu1 }
 0x313   : > { %v1987_v5 = vadd.f32 %v1981_v24, %v1924_v63 }
 0x314   : > { %v1983_v1 = vpop.f32.mrf.mxu1  ;;  %v2042_v3 = vpop.f32.mrf.mxu0 }
 0x315   : > { %v2049_v12 = vadd.f32 %v2042_v3, %v1986_v0 }
 0x316   : > { %v1984_v13 = vpop.f32.mrf.mxu1  ;;  %v2044_v8 = vpop.f32.mrf.mxu0 }
 0x317   : > { %v3670_v2 = vmax.f32 %v2049_v12, 0.0  ;;  %v2050_v20 = vadd.f32 %v2044_v8, %v1987_v5  ;;  %v2819_v13 = vld [vmem:[%s3876_s3 + $0xc] sm:$0xf] }
 0x318   : > { %v2046_v23 = vpop.f32.mrf.mxu0 }
 0x319   : > { %v3672_v6 = vmax.f32 %v2050_v20, 0.0  ;;  %2064 = vrot.lane.b32.xlu0 %v3670_v2, %s3009_s25  ;;  %v2302_v56 = vpack.c.bf16 %v3670_v2, %v3670_v2 }
 0x31a   : > { %v2047_v25 = vpop.f32.mrf.mxu0 }
 0x31b   : > { %2066 = vrot.lane.b32.xlu1 %v3672_v6, %s3009_s25  ;;  %v2303_v46 = vpack.c.bf16 %v3672_v6, %v3672_v6  ;;  %v2308_v12 = vsel %vm327_vm3, %v2302_v56, 0 }
 0x31d   : > { %2053 = vrot.lane.b32.xlu0 %v3670_v2, %s3008_s23 }
 0x31f   : > { %2055 = vrot.lane.b32.xlu1 %v3672_v6, %s3008_s23  ;;  %s2943_s23 = sshll.u32 %s3017_s11, 4  ;;  %s2944_s23 = int_to_ptr.vmem [resolvable:$false] %s2943_s23 }
 0x321   : > { %2175 = vrot.lane.b32.xlu0 %v3670_v2, %s3011_s26 }
 0x323   : > { %2177 = vrot.lane.b32.xlu1 %v3672_v6, %s3011_s26  ;;  %s2945_s26 = scalar_lea.vmem %s2944_s23, 1024 }
 0x325   : > { %2238 = vrot.lane.b32.xlu0 %v3670_v2, %s3012_s30 }
 0x327   : > { %2240 = vrot.lane.b32.xlu1 %v3672_v6, %s3012_s30 }
 0x329   : > { %2356 = vrot.lane.b32.xlu0 %v3670_v2, %s3013_s6 }
 0x32b   : > { %2358 = vrot.lane.b32.xlu1 %v3672_v6, %s3013_s6 }
 0x32d   : > { %2419 = vrot.lane.b32.xlu0 %v3670_v2, %s3014_s7 }
 0x32f   : > { %2421 = vrot.lane.b32.xlu1 %v3672_v6, %s3014_s7 }
 0x331   : > { %2482 = vrot.lane.b32.xlu0 %v3670_v2, %s3015_s8 }
 0x333   : > { %2484 = vrot.lane.b32.xlu1 %v3672_v6, %s3015_s8 }
 0x335   : > { %2545 = vrot.lane.b32.xlu0 %v3670_v2, %s3016_s9 }
 0x337   : > { %2547 = vrot.lane.b32.xlu1 %v3672_v6, %s3016_s9  ;;  %s2628_s9 = sshll.u32 %s3666_s13, 4  ;;  %s3821_s9 = int_to_ptr.vmem [resolvable:$true] %s2628_s9 }
 0x338   : > { %s2939_s22 = scalar_lea.vmem %s3821_s9, 512  ;;  %p2946_p11 = scmp.lt.s32.totalorder %s3821_s9, %s2944_s23 }
 0x339   : > { %p2940_p6 = scmp.ne.s32.totalorder %s3821_s9, %s2939_s22  ;;  %p2947_p12 = scmp.lt.s32.totalorder %s2945_s26, %s2939_s22 }
 0x33b   : > { %p2941_p9 = pnand %p2940_p6, %p3087_p5  ;;  %p2948_p13 = por %p2947_p12, %p2946_p11 }
 0x33d   : > { %p2942_p10 = pneg %p2941_p9 }
 0x33f   : > { %p2949_p0 = pnand %p2948_p13, %p2942_p10 }
 0x38b   : > { %v2065_v14 = vpop.permute.xlu0 %2064 }
 0x38d   : > { %v2067_v26 = vpop.permute.xlu1 %2066 }
 0x38e   : > { %v2068_v27 = vsel %vm306_vm1, %v2065_v14, %v2067_v26  ;;  %v2069_v28 = vsel %vm306_vm1, %v2067_v26, %v2065_v14  ;;  %v2822_v26 = vld [vmem:[%s3876_s3 + $0x10] sm:$0xf] }
 0x38f   : > { %v2070_v29 = vmul.f32 %v2069_v28, %v3183_v16  ;;  %v2071_v31 = vmul.f32 %v2068_v27, %v3186_v17  ;;  %v2054_v32 = vpop.permute.xlu0 %2053  ;;  %v2811_v17 = vld [vmem:[%s3876_s3 + $0x4] sm:$0xf] }
 0x391   : > { %v2073_v33 = vpack.c.bf16 %v2070_v29, %v2070_v29  ;;  %v2074_v35 = vpack.c.bf16 %v2071_v31, %v2071_v31  ;;  %v2056_v36 = vpop.permute.xlu1 %2055 }
 0x392   : > { %v2057_v10 = vsel %vm286_vm0, %v2054_v32, %v2056_v36  ;;  %v2058_v37 = vsel %vm286_vm0, %v2056_v36, %v2054_v32 }
 0x393   : > { %v2059_v38 = vmul.f32 %v2058_v37, %v3180_v15  ;;  %v2060_v39 = vmul.f32 %v2057_v10, %v3189_v18  ;;  %2812 = vmatprep.subr.msk.bf16.mxu1 %vm327_vm3, %v2074_v35  ;;  %v2176_v11 = vpop.permute.xlu0 %2175  ;;  %v2079_v16 = vsel %vm327_vm3, %v2073_v33, 0  ;;  %v2825_v35 = vld [vmem:[%s3876_s3 + $0x14] sm:$0xf] }
 0x394   : > { %2099 = vmatpush1.bf16.msra.mxu1 %v2079_v16  ;;  %v2912_v16 = vld [vmem:[#allocation2 + $0x18] ss:$0 sm:$0xff] }
 0x395   : > { %v2062_v40 = vpack.c.bf16 %v2059_v38, %v2059_v38  ;;  %v2063_v43 = vpack.c.bf16 %v2060_v39, %v2060_v39  ;;  %v2178_v44 = vpop.permute.xlu1 %2177  ;;  %v2911_v39 = vld [vmem:[#allocation2 + $0x10] ss:$0 sm:$0xff] }
 0x396   : > { %v2179_v47 = vsel %vm429_vm2, %v2176_v11, %v2178_v44  ;;  %v2180_v15 = vsel %vm429_vm2, %v2178_v44, %v2176_v11 }
 0x397   : > { %v2181_v18 = vmul.f32 %v2180_v15, %v3193_v21  ;;  %v2182_v48 = vmul.f32 %v2179_v47, %v3196_v22  ;;  %2813 = vmatmul.mubr.msk.bf16.vlgmr.msra.gmra.mxu1 %vm323_vm5, %v2811_v17  ;;  %2814 = vmatprep.subr.msk.bf16.mxu0 %vm327_vm3, %v2063_v43  ;;  %v2239_v49 = vpop.permute.xlu0 %2238  ;;  %v2129_v50 = vsel %vm327_vm3, %v2062_v40, 0  ;;  %v2828_v43 = vld [vmem:[%s3876_s3 + $0x18] sm:$0xf]  ;;  %v2831_v15 = vld [vmem:[%s3876_s3 + $0x1c] sm:$0xf] }
 0x398   : > { %2149 = vmatpush1.bf16.msra.mxu0 %v2129_v50  ;;  %2227 = vmatprep.mubr.bf16.mxu1 %v3010_v4 }
 0x399   : > { %v2184_v52 = vpack.c.bf16 %v2181_v18, %v2181_v18  ;;  %v2185_v54 = vpack.c.bf16 %v2182_v48, %v2182_v48  ;;  %v2241_v55 = vpop.permute.xlu1 %2240  ;;  %v2834_v18 = vld [vmem:[%s3876_s3 + $0x20] sm:$0xf] }
 0x39a   : > { %v2242_v21 = vsel %vm502_vm4, %v2239_v49, %v2241_v55  ;;  %v2243_v22 = vsel %vm502_vm4, %v2241_v55, %v2239_v49 }
 0x39b   : > { %v2244_v57 = vmul.f32 %v2243_v22, %v3218_v41  ;;  %v2245_v58 = vmul.f32 %v2242_v21, %v3221_v42  ;;  %2815 = vmatmul.mubr.msk.bf16.vlgmr.msra.gmra.mxu0 %vm323_vm5, %v2061_v51  ;;  %2817 = vmatprep.subr.msk.bf16.mxu1 %vm327_vm3, %v2185_v54  ;;  %v2357_v59 = vpop.permute.xlu0 %2356  ;;  %v2190_v45 = vsel %vm327_vm3, %v2184_v52, 0 }
 0x39c   : > { %2210 = vmatpush1.bf16.msra.mxu1 %v2190_v45  ;;  %2290 = vmatprep.mubr.bf16.mxu0 %v3010_v4 }
 0x39d   : > { %v2247_v41 = vpack.c.bf16 %v2244_v57, %v2244_v57  ;;  %v2248_v62 = vpack.c.bf16 %v2245_v58, %v2245_v58  ;;  %v2359_v42 = vpop.permute.xlu1 %2358  ;;  %2823 = vmatprep.subr.msk.bf16.mxu1 %vm327_vm3, %v2303_v46 }
 0x39e   : > { %v2360_v24 = vsel %vm631_vm6, %v2357_v59, %v2359_v42  ;;  %v2361_v63 = vsel %vm631_vm6, %v2359_v42, %v2357_v59 }
 0x39f   : > { %v2362_v0 = vmul.f32 %v2360_v24, %v3237_v53  ;;  %v2363_v1 = vmul.f32 %v2361_v63, %v3252_v61  ;;  %2818 = vmatmul.mubr.msk.bf16.vlgmr.msra.gmra.mxu1 %vm323_vm5, %v2816_v60  ;;  %2820 = vmatprep.subr.msk.bf16.mxu0 %vm327_vm3, %v2248_v62  ;;  %v2420_v3 = vpop.permute.xlu0 %2419  ;;  %v2253_v5 = vsel %vm327_vm3, %v2247_v41, 0 }
 0x3a0   : > { %2273 = vmatpush1.bf16.msra.mxu0 %v2253_v5  ;;  %2328 = vmatpush1.bf16.msra.mxu1 %v2308_v12 }
 0x3a1   : > { %v2365_v8 = vpack.c.bf16 %v2362_v0, %v2362_v0  ;;  %v2366_v2 = vpack.c.bf16 %v2363_v1, %v2363_v1  ;;  %v2422_v53 = vpop.permute.xlu1 %2421  ;;  %2345 = vmatprep.mubr.bf16.mxu1 %v3010_v4 }
 0x3a2   : > { %v2423_v61 = vsel %vm704_vm7, %v2420_v3, %v2422_v53  ;;  %v2424_v20 = vsel %vm704_vm7, %v2422_v53, %v2420_v3 }
 0x3a3   : > { %v2425_v23 = vmul.f32 %v2423_v61, %v3265_v9  ;;  %v2426_v6 = vmul.f32 %v2424_v20, %v3274_v19  ;;  %2821 = vmatmul.mubr.msk.bf16.vlgmr.msra.gmra.mxu0 %vm323_vm5, %v2819_v13  ;;  %2826 = vmatprep.subr.msk.bf16.mxu0 %vm327_vm3, %v2366_v2  ;;  %v2483_v25 = vpop.permute.xlu0 %2482  ;;  %v2371_v14 = vsel %vm327_vm3, %v2365_v8, 0 }
 0x3a4   : > { %2391 = vmatpush1.bf16.msra.mxu0 %v2371_v14  ;;  %2408 = vmatprep.mubr.bf16.mxu0 %v3010_v4 }
 0x3a5   : > { %v2428_v27 = vpack.c.bf16 %v2425_v23, %v2425_v23  ;;  %v2429_v28 = vpack.c.bf16 %v2426_v6, %v2426_v6  ;;  %v2485_v29 = vpop.permute.xlu1 %2484 }
 0x3a6   : > { %v2486_v9 = vsel %vm777_vm8, %v2483_v25, %v2485_v29  ;;  %v2487_v19 = vsel %vm777_vm8, %v2485_v29, %v2483_v25 }
 0x3a7   : > { %v2488_v31 = vmul.f32 %v2486_v9, %v3289_v30  ;;  %v2489_v32 = vmul.f32 %v2487_v19, %v3297_v34  ;;  %2824 = vmatmul.mubr.msk.bf16.vlgmr.msra.gmra.mxu1 %vm323_vm5, %v2822_v26  ;;  %2829 = vmatprep.subr.msk.bf16.mxu1 %vm327_vm3, %v2429_v28  ;;  %v2434_v33 = vsel %vm327_vm3, %v2428_v27, 0  ;;  %v2546_v37 = vpop.permute.xlu0 %2545 }
 0x3a8   : > { %2454 = vmatpush1.bf16.msra.mxu1 %v2434_v33  ;;  %2471 = vmatprep.mubr.bf16.mxu1 %v3010_v4 }
 0x3a9   : > { %v2491_v36 = vpack.c.bf16 %v2488_v31, %v2488_v31  ;;  %v2492_v10 = vpack.c.bf16 %v2489_v32, %v2489_v32  ;;  %v2548_v38 = vpop.permute.xlu1 %2547  ;;  %v2783_v31 = vld [vmem:[%s3660_s10 + $0x10] sm:$0xff] }
 0x3aa   : > { %v2549_v30 = vsel %vm850_vm9, %v2546_v37, %v2548_v38  ;;  %v2550_v34 = vsel %vm850_vm9, %v2548_v38, %v2546_v37 }
 0x3ab   : > { %v2551_v11 = vmul.f32 %v2911_v39, %v2549_v30  ;;  %v2552_v17 = vmul.f32 %v2912_v16, %v2550_v34  ;;  %2827 = vmatmul.mubr.msk.bf16.vlgmr.msra.gmra.mxu0 %vm323_vm5, %v2825_v35  ;;  %2832 = vmatprep.subr.msk.bf16.mxu0 %vm327_vm3, %v2492_v10  ;;  %v2497_v40 = vsel %vm327_vm3, %v2491_v36, 0  ;;  %v2784_v10 = vld [vmem:[%s3660_s10 + $0x18] sm:$0xff]  ;;  %s3832_s10 = scalar_lea.sflag [#allocation4], %s251_s17 }
 0x3ac   : > { %2517 = vmatpush1.bf16.msra.mxu0 %v2497_v40  ;;  %2534 = vmatprep.mubr.bf16.mxu0 %v3010_v4 }
 0x3ad   : > { %v2554_v44 = vpack.c.bf16 %v2551_v11, %v2551_v11  ;;  %v2555_v7 = vpack.c.bf16 %v2552_v17, %v2552_v17 }
 0x3af   : > { %2830 = vmatmul.mubr.msk.bf16.vlgmr.msra.gmra.mxu1 %vm323_vm5, %v2828_v43  ;;  %2835 = vmatprep.subr.msk.bf16.mxu1 %vm327_vm3, %v2555_v7  ;;  %v2560_v47 = vsel %vm327_vm3, %v2554_v44, 0 }
 0x3b0   : > { %2580 = vmatpush1.bf16.msra.mxu1 %v2560_v47  ;;  %2597 = vmatprep.mubr.bf16.mxu1 %v3010_v4 }
 0x3b3   : > { %2833 = vmatmul.mubr.msk.bf16.vlgmr.msra.gmra.mxu0 %vm323_vm5, %v2831_v15 }
 0x3b7   : > { %2836 = vmatmul.mubr.msk.bf16.vlgmr.msra.gmra.mxu1 %vm323_vm5, %v2834_v18 }
 0x457   : > { %v2118_v48 = vpop.f32.mrf.mxu1 }
 0x459   : > { %v2120_v49 = vpop.f32.mrf.mxu1 }
 0x45b   : > { %v2122_v50 = vpop.f32.mrf.mxu1  ;;  %v2168_v51 = vpop.f32.mrf.mxu0 }
 0x45c   : > { %v2169_v62 = vadd.f32 %v2168_v51, %v2118_v48 }
 0x45d   : > { %v2123_v52 = vpop.f32.mrf.mxu1  ;;  %v2170_v54 = vpop.f32.mrf.mxu0 }
 0x45e   : > { %v2171_v63 = vadd.f32 %v2170_v54, %v2120_v49 }
 0x45f   : > { %v2172_v55 = vpop.f32.mrf.mxu0  ;;  %v2229_v21 = vpop.f32.mrf.mxu1 }
 0x460   : > { %v2236_v0 = vadd.f32 %v2229_v21, %v2169_v62 }
 0x461   : > { %v2173_v22 = vpop.f32.mrf.mxu0  ;;  %v2231_v56 = vpop.f32.mrf.mxu1 }
 0x462   : > { %v2237_v5 = vadd.f32 %v2231_v56, %v2171_v63 }
 0x463   : > { %v2233_v57 = vpop.f32.mrf.mxu1  ;;  %v2292_v4 = vpop.f32.mrf.mxu0 }
 0x464   : > { %v2299_v12 = vadd.f32 %v2292_v4, %v2236_v0 }
 0x465   : > { %v2234_v58 = vpop.f32.mrf.mxu1  ;;  %v2294_v59 = vpop.f32.mrf.mxu0 }
 0x466   : > { %v2300_v2 = vadd.f32 %v2294_v59, %v2237_v5 }
 0x467   : > { %v2296_v45 = vpop.f32.mrf.mxu0  ;;  %v2347_v46 = vpop.f32.mrf.mxu1 }
 0x468   : > { %v2354_v53 = vadd.f32 %v2347_v46, %v2299_v12 }
 0x469   : > { %v2297_v60 = vpop.f32.mrf.mxu0  ;;  %v2349_v41 = vpop.f32.mrf.mxu1 }
 0x46a   : > { %v2355_v23 = vadd.f32 %v2349_v41, %v2300_v2 }
 0x46b   : > { %v2351_v42 = vpop.f32.mrf.mxu1  ;;  %v2410_v24 = vpop.f32.mrf.mxu0 }
 0x46c   : > { %v2417_v6 = vadd.f32 %v2410_v24, %v2354_v53 }
 0x46d   : > { %v2352_v1 = vpop.f32.mrf.mxu1  ;;  %v2412_v3 = vpop.f32.mrf.mxu0 }
 0x46e   : > { %v2418_v26 = vadd.f32 %v2412_v3, %v2355_v23 }
 0x46f   : > { %v2414_v13 = vpop.f32.mrf.mxu0  ;;  %v2473_v8 = vpop.f32.mrf.mxu1 }
 0x470   : > { %v2480_v27 = vadd.f32 %v2473_v8, %v2417_v6 }
 0x471   : > { %v2415_v61 = vpop.f32.mrf.mxu0  ;;  %v2475_v20 = vpop.f32.mrf.mxu1 }
 0x472   : > { %v2481_v9 = vadd.f32 %v2475_v20, %v2418_v26 }
 0x473   : > { %v2477_v25 = vpop.f32.mrf.mxu1  ;;  %v2536_v14 = vpop.f32.mrf.mxu0 }
 0x474   : > { %v2543_v19 = vadd.f32 %v2536_v14, %v2480_v27 }
 0x475   : > { %v2478_v28 = vpop.f32.mrf.mxu1  ;;  %v2538_v29 = vpop.f32.mrf.mxu0 }
 0x476   : > { %v2544_v35 = vadd.f32 %v2538_v29, %v2481_v9 }
 0x477   : > { %v2599_v32 = vpop.f32.mrf.mxu1  ;;  %v2540_v33 = vpop.f32.mrf.mxu0 }
 0x478   : > { %v2606_v36 = vadd.f32 %v2599_v32, %v2543_v19 }
 0x479   : > { %v2601_v37 = vpop.f32.mrf.mxu1  ;;  %v2541_v38 = vpop.f32.mrf.mxu0 }
 0x47a   : > { %v2608_v30 = vadd.f32 %v2783_v31, %v2606_v36  ;;  %v2607_v34 = vadd.f32 %v2601_v37, %v2544_v35 }
 0x47b   : > { %v2603_v39 = vpop.f32.mrf.mxu1 }
 0x47c   : > { %2837 = vst [vmem:[%s3666_s13 + $0x10] sm:$0xff] %v2608_v30  ;;  %v2609_v11 = vadd.f32 %v2784_v10, %v2607_v34 }
 0x47d   : > { %v2604_v16 = vpop.f32.mrf.mxu1 }
 0x47e   : > { %2838 = vst [vmem:[%s3666_s13 + $0x18] sm:$0xff] %v2609_v11 }
 0x47f   : > { %2952 = shalt.err (!%p2949_p0)
}
 0x480   : > { %s2953_s17 = scalar_lea.hbm %s3827_s16, 512  ;;  %s2957_s6 = scalar_lea.hbm %s3878_s5, 1024 }
 0x481   : > { %p2954_p1 = scmp.ne.s32.totalorder %s3827_s16, %s2953_s17  ;;  %p2958_p4 = scmp.lt.s32.totalorder %s3827_s16, %s3878_s5 }
 0x482   : > { %p2959_p7 = scmp.lt.s32.totalorder %s2957_s6, %s2953_s17 }
 0x483   : > { %p2955_p2 = pnand %p2954_p1, %p3087_p5 }
 0x484   : > { %p2960_p8 = por %p2959_p7, %p2958_p4 }
 0x485   : > { %p2956_p3 = pneg %p2955_p2 }
 0x487   : > { %p2961_p6 = pnand %p2960_p8, %p2956_p3 }
 0x489   : > { %2964 = shalt.err (!%p2961_p6)
}
 0x48a   : > { %s3018_s14 = smov 256  }
 0x48b   : > { %2853 = dma.vmem_to_hbm [thread:$0]  (%p3087_p5), %s3821_s9, 512, %s3827_s16, %s3832_s10, %s3018_s14, %s3018_s14, %s3009_s25  }
 0x48c PF: > { %p2865_p9 = scmp.ge.s32.totalorder %s3003_s21, 2  ;;  %s2643_s12 = sand.u32 1, %s2991_s18  }
 0x48d   : > { %p3884_p10 = scmp.ne.s32.totalorder %s3881_s29, 0  ;;  %s2644_s15 = scalar_lea.sflag [#allocation4], %s2643_s12 }
 0x48f   : > { %p2860_p11 = pnand %p2865_p9, %p3884_p10 }
 0x491   : > { %p2861_p12 = pneg %p2860_p11 }
 0x493   : > { %2986 = dma.done.wait (%p2861_p12), %s2644_s15, 512  }
 0x494   : > { %2988 = vsyncadd (%p2861_p12), %s2644_s15, 4294966784  ;;  %p16_p13 = scmp.ge.s32.totalorder %s3074_s24, 4   ;;  %s3885_s18 = smov %s2995_s19 }
 0x495   : > { %s3886_s19 = smov %s2999_s20  ;;  %s3887_s20 = smov %s3085_s27 }
 0x496   : > { %s3888_s21 = smov %s3074_s24  ;;  %18 = sbr.rel (!%p16_p13) target bundleno = 4 (0x4), region = 102 }
 0x49b   :  { %2649 = vsyncpa [#allocation3], 1 }
 0x49c   :  { %2651 = vsyncpa [#allocation3 + $0x1], 1 }
 0x49d   :  { %2652 = vsyncpa [#allocation4], 1 }
 0x49e   :  { %2654 = vsyncpa [#allocation4 + $0x1], 1 }

// kernel: tpu_custom_call.1
= control target key start
LH: loop header
LB: loop body
LE: loop exit
PB: predicated region body
PF: predicated region fallthrough
CT: control target
= control target key end

     0   :  { %10 = vsyncpa [#allocation3], 0  ;;  %s3873_s0 = inlined_call_operand.vmem [shape: f32[4,8,256], index: 0, kind: input, shape index: {}]   ;;  %s3874_s1 = inlined_call_operand.vmem [shape: f32[4,8,256], index: 1, kind: input, shape index: {}]   ;;  %s3875_s2 = inlined_call_operand.vmem [shape: bf16[9,8,8], index: 2, kind: input, shape index: {}]   ;;  %s3876_s3 = inlined_call_operand.vmem [shape: bf16[9,8,8], index: 3, kind: input, shape index: {}]   ;;  %s3877_s4 = inlined_call_operand.hbm [shape: f32[9,256], index: 4, kind: input, shape index: {}]   ;;  %s3878_s5 = inlined_call_operand.hbm [shape: f32[4,8,256], index: 5, kind: output, shape index: {}]  }
   0x1   :  { %11 = vsyncpa [#allocation4], 0 }
   0x2   :  { %13 = vsyncpa [#allocation4 + $0x1], 0  ;;  %s3049_s18 = smov 0   ;;  %s3051_s19 = smov 0  }
   0x3   :  { %s3053_s20 = smov 0   ;;  %s3055_s21 = smov 0  }
   0x4 LB: > { %s3070_s22 = sadd.s32 4294967295, %s3003_s21   ;;  %s2714_s23 = sadd.s32 4294967294, %s3003_s21   ;;  %s3003_s21 = sphi %s3055_s21, %s3888_s21   ;;  %s2999_s20 = sphi %s3053_s20, %s3887_s20   ;;  %s2995_s19 = sphi %s3051_s19, %s3886_s19   ;;  %s2991_s18 = sphi %s3049_s18, %s3885_s18  }
   0x5   : > { %s3074_s24 = sadd.s32 1, %s3003_s21   ;;  %s141_s25 = sadd.s32 1, %s2999_s20 }
   0x6   : > { %s138_s26 = ssub.s32 %s3003_s21, %s3074_s24  ;;  %p151_p0 = scmp.ne.s32.totalorder %s2999_s20, %s2995_s19 }
   0x7   : > { %p139_p1 = scmp.eq.s32.totalorder %s138_s26, 0  ;;  %p152_p2 = scmp.eq.s32.totalorder %s3070_s22, 1 }
   0x8   : > { %p157_p3 = scmp.ne.s32.totalorder %s2995_s19, %s2991_s18  ;;  %p158_p4 = scmp.eq.s32.totalorder %s2714_s23, 1 }
   0x9   : > { %s3085_s27 = scalar_select %p139_p1, %s2999_s20, %s141_s25  }
   0xa   : > { %p3087_p5 = por %p152_p2, %p151_p0  ;;  %p3091_p6 = por %p158_p4, %p157_p3 }
   0xb   : > { %p2715_p7 = scmp.ge.s32.totalorder %s3003_s21, 1  ;;  %p165_p8 = scmp.lt.s32.totalorder %s3003_s21, 3 }
   0xc   : > { %s3881_s29 = scalar_select %p3091_p6, 1, 0 }
   0xd   : > { %p2863_p9 = scmp.eq.s32.totalorder %s3070_s22, 0  ;;  %p3098_p10 = pnand %p2715_p7, %p165_p8 }
   0xe   : > { %s3005_s6 = smov [#allocation2]  }
   0xf   : > { %s183_s7 = sshll.u32 %s3005_s6, 4  ;;  %p2855_p11 = pneg %p3098_p10  ;;  %s184_s7 = int_to_ptr.vmem [resolvable:$true] %s183_s7 }
  0x10   : > { %s2924_s8 = scalar_lea.vmem %s184_s7, 512  ;;  %p2932_p3 = scmp.lt.s32.totalorder %s184_s7, %s184_s7 }
  0x11   : > { %p2856_p12 = pnand %p2863_p9, %p2855_p11  ;;  %p2925_p0 = scmp.ne.s32.totalorder %s184_s7, %s2924_s8 }
  0x12   : > { %p2933_p4 = scmp.lt.s32.totalorder %s2924_s8, %s2924_s8 }
  0x13   : > { %p2915_p13 = pneg %p2856_p12 }
  0x14   : > { %p2934_p6 = por %p2933_p4, %p2932_p3 }
  0x15   : > { %p2927_p1 = pnand %p2925_p0, %p2915_p13 }
  0x17   : > { %p2928_p2 = pneg %p2927_p1 }
  0x19   : > { %p2935_p7 = pnand %p2934_p6, %p2928_p2 }
  0x1b   : > { %2938 = shalt.err (!%p2935_p7)
}
  0x1c   : > { %s3006_s9 = smov 256   ;;  %s3007_s10 = smov 16  }
  0x1d   : > { %2858 = dma.hbm_to_vmem [thread:$0]  (!%p2856_p12), %s3877_s4, 512, %s184_s7, [#allocation3], %s3006_s9, %s3006_s9, %s3007_s10  }
  0x1e   : > { %219 = sbr.rel (%p3098_p10) target bundleno = 1164 (0x48c), region = 40 }
  0x23   : > { %2982 = dma.done.wait (%p2863_p9), [#allocation3], 512  }
  0x24   : > { %2984 = vsyncadd (%p2863_p9), [#allocation3], 4294966784  ;;  %s2721_s13 = sshll.u32 %s3070_s22, 1  ;;  %s3008_s23 = smov 17   ;;  %v3010_v4 = vmov 0   ;;  %v284_v5 = vlaneseq  ;;  %v3172_v10 = vld [vmem:[#allocation2] sm:$0xff] }
  0x25   : > { %p255_p8 = scmp.lt.s32.totalorder %s2721_s13, 3  ;;  %s3009_s25 = smov 16   ;;  %366 = vmatprep.mubr.bf16.mxu0 %v3010_v4  ;;  %416 = vmatprep.mubr.bf16.mxu1 %v3010_v4  ;;  %v3174_v11 = vld [vmem:[#allocation2 + $0x8] sm:$0xff]  ;;  %vm327_vm3 = vcmask 1043456   ;;  %v2727_v47 = vld [vmem:[%s3875_s2 + $0x4] sm:$0xf] }
  0x26   : > { %s3011_s26 = smov 15   ;;  %s3012_s30 = smov 1   ;;  %v3166_v6 = vshrl.u32 %v284_v5, 7  ;;  %v3168_v7 = vand.u32 127, %v284_v5  ;;  %vm323_vm5 = vcmask 64512  }
  0x27   : > { %s3890_s13 = smov (!%p255_p8, %s2721_s13), 3  ;;  %s3013_s6 = smov 127   ;;  %v299_v48 = vld [vmem:[%s3875_s2] sm:$0xf] }
  0x28   : > { %s3879_s14 = sshll.u32 %s3890_s13, 4  ;;  %s3014_s7 = smov 113   ;;  %v291_v8 = vsub.s32 0, %v3166_v6  ;;  %v311_v9 = vsub.s32 1, %v3166_v6  ;;  %v434_v14 = vsub.s32 2, %v3166_v6  ;;  %vm286_vm0 = vcmp.lt.s32.totalorder %v3168_v7, 17 }
  0x29   : > { %s3124_s17 = scalar_lea.vmem %s3873_s0, %s3879_s14  ;;  %s3015_s8 = smov 112   ;;  %vm306_vm1 = vcmp.lt.s32.totalorder %v3168_v7, 16  ;;  %vm429_vm2 = vcmp.lt.s32.totalorder %v3168_v7, 15  ;;  %v507_v23 = vsub.s32 3, %v3166_v6  ;;  %vm502_vm4 = vcmp.lt.s32.totalorder %v3168_v7, 1 }
  0x2a   : > { %v274_v0 = vld [vmem:[%s3124_s17] sm:$0xff]  ;;  %v275_v1 = vld [vmem:[%s3124_s17 + $0x8] sm:$0xff]  ;;  %s3016_s9 = smov 111   ;;  %v3180_v15 = vrot.slane %v3172_v10, %v291_v8  ;;  %v3183_v16 = vrot.slane %v3172_v10, %v311_v9  ;;  %v3186_v17 = vrot.slane %v3174_v11, %v311_v9  ;;  %v3189_v18 = vrot.slane %v3174_v11, %v291_v8  ;;  %s3883_s12 = sshll.u32 %s3890_s13, 4 }
  0x2b   : > { %v3128_v2 = vmax.f32 %v274_v0, 0.0  ;;  %v3134_v3 = vmax.f32 %v275_v1, 0.0  ;;  %v3193_v21 = vrot.slane %v3172_v10, %v434_v14  ;;  %v3196_v22 = vrot.slane %v3174_v11, %v434_v14  ;;  %s3660_s10 = scalar_lea.vmem %s3874_s1, %s3883_s12  ;;  %s2848_s14 = sshll.u32 %s3070_s22, 9 }
  0x2c   : > { %v636_v32 = vsub.s32 5, %v3166_v6  ;;  %v3218_v41 = vrot.slane %v3172_v10, %v507_v23  ;;  %v3221_v42 = vrot.slane %v3174_v11, %v507_v23  ;;  %vm631_vm6 = vcmp.lt.s32.totalorder %v3168_v7, 127  ;;  %s3827_s16 = scalar_lea.hbm %s3878_s5, %s2848_s14 }
  0x2d   : > { %280 = vrot.lane.b32.xlu1 %v3128_v2, %s3008_s23  ;;  %302 = vrot.lane.b32.xlu0 %v3128_v2, %s3009_s25  ;;  %v709_v56 = vsub.s32 6, %v3166_v6  ;;  %v574_v57 = vpack.c.bf16 %v3134_v3, %v3134_v3  ;;  %vm704_vm7 = vcmp.lt.s32.totalorder %v3168_v7, 113  ;;  %vm777_vm8 = vcmp.lt.s32.totalorder %v3168_v7, 112 }
  0x2e   : > { %v3237_v53 = vrot.slane %v3172_v10, %v636_v32  ;;  %v3252_v61 = vrot.slane %v3174_v11, %v636_v32  ;;  %vm850_vm9 = vcmp.lt.s32.totalorder %v3168_v7, 111 }
  0x2f   : > { %v3265_v9 = vrot.slane %v3172_v10, %v709_v56 }
  0x31   : > { %282 = vrot.lane.b32.xlu1 %v3134_v3, %s3008_s23  ;;  %304 = vrot.lane.b32.xlu0 %v3134_v3, %s3009_s25 }
  0x35   : > { %427 = vrot.lane.b32.xlu1 %v3134_v3, %s3011_s26  ;;  %425 = vrot.lane.b32.xlu0 %v3128_v2, %s3011_s26 }
  0x39   : > { %500 = vrot.lane.b32.xlu1 %v3134_v3, %s3012_s30  ;;  %498 = vrot.lane.b32.xlu0 %v3128_v2, %s3012_s30 }
  0x3d   : > { %629 = vrot.lane.b32.xlu1 %v3134_v3, %s3013_s6  ;;  %627 = vrot.lane.b32.xlu0 %v3128_v2, %s3013_s6 }
  0x41   : > { %702 = vrot.lane.b32.xlu1 %v3134_v3, %s3014_s7  ;;  %700 = vrot.lane.b32.xlu0 %v3128_v2, %s3014_s7 }
  0x45   : > { %775 = vrot.lane.b32.xlu1 %v3134_v3, %s3015_s8  ;;  %773 = vrot.lane.b32.xlu0 %v3128_v2, %s3015_s8 }
  0x49   : > { %848 = vrot.lane.b32.xlu1 %v3134_v3, %s3016_s9  ;;  %846 = vrot.lane.b32.xlu0 %v3128_v2, %s3016_s9  ;;  %v573_v3 = vpack.c.bf16 %v3128_v2, %v3128_v2 }
  0x9f   : > { %v281_v12 = vpop.permute.xlu1 %280  ;;  %v303_v13 = vpop.permute.xlu0 %302 }
  0xa3   : > { %v283_v19 = vpop.permute.xlu1 %282  ;;  %v305_v20 = vpop.permute.xlu0 %304 }
  0xa4   : > { %v287_v24 = vsel %vm286_vm0, %v281_v12, %v283_v19  ;;  %v288_v25 = vsel %vm286_vm0, %v283_v19, %v281_v12  ;;  %v307_v26 = vsel %vm306_vm1, %v303_v13, %v305_v20  ;;  %v308_v27 = vsel %vm306_vm1, %v305_v20, %v303_v13  ;;  %v2732_v20 = vld [vmem:[%s3875_s2 + $0x8] sm:$0xf] }
  0xa5   : > { %v297_v28 = vmul.f32 %v3180_v15, %v288_v25  ;;  %v317_v29 = vmul.f32 %v3183_v16, %v308_v27  ;;  %v318_v30 = vmul.f32 %v3186_v17, %v307_v26  ;;  %v298_v31 = vmul.f32 %v3189_v18, %v287_v24 }
  0xa6   : > { %v782_v12 = vsub.s32 7, %v3166_v6  ;;  %v3274_v19 = vrot.slane %v3174_v11, %v709_v56  ;;  %v2735_v6 = vld [vmem:[%s3875_s2 + $0xc] sm:$0xf]  ;;  %v579_v27 = vsel %vm327_vm3, %v573_v3, 0 }
  0xa7   : > { %v428_v33 = vpop.permute.xlu1 %427  ;;  %v426_v34 = vpop.permute.xlu0 %425  ;;  %v322_v35 = vpack.c.bf16 %v318_v30, %v318_v30  ;;  %v301_v36 = vpack.c.bf16 %v298_v31, %v298_v31  ;;  %v321_v37 = vpack.c.bf16 %v317_v29, %v317_v29  ;;  %v300_v38 = vpack.c.bf16 %v297_v28, %v297_v28 }
  0xa8   : > { %v430_v39 = vsel %vm429_vm2, %v426_v34, %v428_v33  ;;  %v431_v40 = vsel %vm429_vm2, %v428_v33, %v426_v34  ;;  %v3289_v30 = vrot.slane %v3172_v10, %v782_v12  ;;  %v3297_v34 = vrot.slane %v3174_v11, %v782_v12 }
  0xa9   : > { %v440_v43 = vmul.f32 %v3193_v21, %v431_v40  ;;  %v441_v44 = vmul.f32 %v3196_v22, %v430_v39  ;;  %2728 = vmatprep.subr.msk.bf16.mxu0 %vm327_vm3, %v322_v35  ;;  %2730 = vmatprep.subr.msk.bf16.mxu1 %vm327_vm3, %v301_v36  ;;  %v329_v45 = vsel %vm327_vm3, %v321_v37, 0  ;;  %v379_v46 = vsel %vm327_vm3, %v300_v38, 0 }
  0xaa   : > { %349 = vmatpush1.bf16.msra.mxu0 %v329_v45  ;;  %399 = vmatpush1.bf16.msra.mxu1 %v379_v46  ;;  %v3316_v45 = vld [vmem:[#allocation2 + $0x10] ss:$0 sm:$0xff]  ;;  %v3318_v46 = vld [vmem:[#allocation2 + $0x18] ss:$0 sm:$0xff] }
  0xab   : > { %v444_v49 = vpack.c.bf16 %v440_v43, %v440_v43  ;;  %v445_v50 = vpack.c.bf16 %v441_v44, %v441_v44  ;;  %v501_v51 = vpop.permute.xlu1 %500  ;;  %v499_v52 = vpop.permute.xlu0 %498  ;;  %v2738_v43 = vld [vmem:[%s3875_s2 + $0x10] sm:$0xf]  ;;  %v2741_v44 = vld [vmem:[%s3875_s2 + $0x14] sm:$0xf] }
  0xac   : > { %v503_v54 = vsel %vm502_vm4, %v499_v52, %v501_v51  ;;  %v504_v55 = vsel %vm502_vm4, %v501_v51, %v499_v52 }
  0xad   : > { %v513_v58 = vmul.f32 %v3218_v41, %v504_v55  ;;  %v514_v59 = vmul.f32 %v3221_v42, %v503_v54  ;;  %2729 = vmatmul.mubr.msk.bf16.vlgmr.msra.gmra.mxu0 %vm323_vm5, %v2727_v47  ;;  %2731 = vmatmul.mubr.msk.bf16.vlgmr.msra.gmra.mxu1 %vm323_vm5, %v299_v48  ;;  %v450_v60 = vsel %vm327_vm3, %v444_v49, 0 }
  0xae   : > { %2733 = vmatprep.subr.msk.bf16.mxu0 %vm327_vm3, %v445_v50  ;;  %487 = vmatprep.mubr.bf16.mxu0 %v3010_v4 }
  0xaf   : > { %v517_v62 = vpack.c.bf16 %v513_v58, %v513_v58  ;;  %v518_v63 = vpack.c.bf16 %v514_v59, %v514_v59  ;;  %470 = vmatpush1.bf16.msra.mxu0 %v450_v60  ;;  %v630_v0 = vpop.permute.xlu1 %629  ;;  %v628_v1 = vpop.permute.xlu0 %627  ;;  %560 = vmatprep.mubr.bf16.mxu1 %v3010_v4  ;;  %v2744_v60 = vld [vmem:[%s3875_s2 + $0x18] sm:$0xf] }
  0xb0   : > { %v632_v5 = vsel %vm631_vm6, %v628_v1, %v630_v0  ;;  %v633_v8 = vsel %vm631_vm6, %v630_v0, %v628_v1  ;;  %2739 = vmatprep.subr.msk.bf16.mxu0 %vm327_vm3, %v574_v57  ;;  %v2752_v0 = vld [vmem:[%s3875_s2 + $0x20] sm:$0xf] }
  0xb1   : > { %2736 = vmatprep.subr.msk.bf16.mxu1 %vm327_vm3, %v518_v63  ;;  %v523_v13 = vsel %vm327_vm3, %v517_v62, 0  ;;  %v642_v14 = vmul.f32 %v3237_v53, %v632_v5  ;;  %v643_v2 = vmul.f32 %v3252_v61, %v633_v8  ;;  %v2747_v62 = vld [vmem:[%s3875_s2 + $0x1c] sm:$0xf] }
  0xb2   : > { %543 = vmatpush1.bf16.msra.mxu1 %v523_v13 }
  0xb3   : > { %v646_v23 = vpack.c.bf16 %v642_v14, %v642_v14  ;;  %v647_v24 = vpack.c.bf16 %v643_v2, %v643_v2  ;;  %v703_v25 = vpop.permute.xlu1 %702  ;;  %v701_v26 = vpop.permute.xlu0 %700 }
  0xb4   : > { %v705_v28 = vsel %vm704_vm7, %v701_v26, %v703_v25  ;;  %v706_v29 = vsel %vm704_vm7, %v703_v25, %v701_v26 }
  0xb5   : > { %2734 = vmatmul.mubr.msk.bf16.vlgmr.msra.gmra.mxu0 %vm323_vm5, %v2732_v20  ;;  %2737 = vmatmul.mubr.msk.bf16.vlgmr.msra.gmra.mxu1 %vm323_vm5, %v2735_v6  ;;  %v715_v31 = vmul.f32 %v3265_v9, %v705_v28  ;;  %v716_v32 = vmul.f32 %v3274_v19, %v706_v29  ;;  %v652_v33 = vsel %vm327_vm3, %v646_v23, 0 }
  0xb6   : > { %2742 = vmatprep.subr.msk.bf16.mxu1 %vm327_vm3, %v647_v24  ;;  %599 = vmatpush1.bf16.msra.mxu0 %v579_v27 }
  0xb7   : > { %v719_v35 = vpack.c.bf16 %v715_v31, %v715_v31  ;;  %v720_v36 = vpack.c.bf16 %v716_v32, %v716_v32  ;;  %672 = vmatpush1.bf16.msra.mxu1 %v652_v33  ;;  %v776_v10 = vpop.permute.xlu1 %775  ;;  %v774_v37 = vpop.permute.xlu0 %773  ;;  %616 = vmatprep.mubr.bf16.mxu0 %v3010_v4 }
  0xb8   : > { %v778_v38 = vsel %vm777_vm8, %v774_v37, %v776_v10  ;;  %v779_v39 = vsel %vm777_vm8, %v776_v10, %v774_v37  ;;  %689 = vmatprep.mubr.bf16.mxu1 %v3010_v4 }
  0xb9   : > { %v788_v11 = vmul.f32 %v3289_v30, %v778_v38  ;;  %v789_v40 = vmul.f32 %v3297_v34, %v779_v39  ;;  %2745 = vmatprep.subr.msk.bf16.mxu0 %vm327_vm3, %v720_v36  ;;  %v725_v49 = vsel %vm327_vm3, %v719_v35, 0 }
  0xbb   : > { %v792_v47 = vpack.c.bf16 %v788_v11, %v788_v11  ;;  %v793_v48 = vpack.c.bf16 %v789_v40, %v789_v40  ;;  %v849_v50 = vpop.permute.xlu1 %848  ;;  %v847_v51 = vpop.permute.xlu0 %846 }
  0xbc   : > { %v851_v52 = vsel %vm850_vm9, %v847_v51, %v849_v50  ;;  %v852_v54 = vsel %vm850_vm9, %v849_v50, %v847_v51 }
  0xbd   : > { %2740 = vmatmul.mubr.msk.bf16.vlgmr.msra.gmra.mxu0 %vm323_vm5, %v2738_v43  ;;  %2743 = vmatmul.mubr.msk.bf16.vlgmr.msra.gmra.mxu1 %vm323_vm5, %v2741_v44  ;;  %v798_v55 = vsel %vm327_vm3, %v792_v47, 0  ;;  %v861_v56 = vmul.f32 %v3316_v45, %v851_v52  ;;  %v862_v57 = vmul.f32 %v3318_v46, %v852_v54 }
  0xbe   : > { %2748 = vmatprep.subr.msk.bf16.mxu1 %vm327_vm3, %v793_v48  ;;  %745 = vmatpush1.bf16.msra.mxu0 %v725_v49 }
  0xbf   : > { %818 = vmatpush1.bf16.msra.mxu1 %v798_v55  ;;  %v865_v58 = vpack.c.bf16 %v861_v56, %v861_v56  ;;  %v866_v59 = vpack.c.bf16 %v862_v57, %v862_v57  ;;  %762 = vmatprep.mubr.bf16.mxu0 %v3010_v4 }
  0xc0   : > { %835 = vmatprep.mubr.bf16.mxu1 %v3010_v4 }
  0xc1   : > { %2753 = vmatprep.subr.msk.bf16.mxu0 %vm327_vm3, %v866_v59  ;;  %v871_v63 = vsel %vm327_vm3, %v865_v58, 0 }
  0xc5   : > { %2746 = vmatmul.mubr.msk.bf16.vlgmr.msra.gmra.mxu0 %vm323_vm5, %v2744_v60  ;;  %2749 = vmatmul.mubr.msk.bf16.vlgmr.msra.gmra.mxu1 %vm323_vm5, %v2747_v62 }
  0xc6   : > { %891 = vmatpush1.bf16.msra.mxu0 %v871_v63  ;;  %908 = vmatprep.mubr.bf16.mxu0 %v3010_v4 }
  0xc7   : > { %985 = vmatprep.mubr.bf16.mxu1 %v3010_v4 }
  0xcd   : > { %2754 = vmatmul.mubr.msk.bf16.vlgmr.msra.gmra.mxu0 %vm323_vm5, %v2752_v0 }
  0xce   : > { %1035 = vmatprep.mubr.bf16.mxu0 %v3010_v4 }
 0x16d   : > { %v368_v1 = vpop.f32.mrf.mxu0  ;;  %v418_v3 = vpop.f32.mrf.mxu1 }
 0x16e   : > { %v419_v27 = vadd.f32 %v418_v3, %v368_v1 }
 0x16f   : > { %v370_v5 = vpop.f32.mrf.mxu0  ;;  %v420_v8 = vpop.f32.mrf.mxu1 }
 0x170   : > { %v421_v31 = vadd.f32 %v420_v8, %v370_v5 }
 0x171   : > { %v372_v12 = vpop.f32.mrf.mxu0  ;;  %v422_v13 = vpop.f32.mrf.mxu1 }
 0x173   : > { %v373_v14 = vpop.f32.mrf.mxu0  ;;  %v423_v2 = vpop.f32.mrf.mxu1 }
 0x175   : > { %v489_v20 = vpop.f32.mrf.mxu0  ;;  %v562_v6 = vpop.f32.mrf.mxu1 }
 0x176   : > { %v496_v32 = vadd.f32 %v489_v20, %v419_v27  ;;  %v2781_v20 = vld [vmem:[%s3124_s17 + $0x10] sm:$0xff] }
 0x177   : > { %v491_v23 = vpop.f32.mrf.mxu0  ;;  %v564_v24 = vpop.f32.mrf.mxu1 }
 0x178   : > { %v497_v36 = vadd.f32 %v491_v23, %v421_v31  ;;  %v569_v38 = vadd.f32 %v562_v6, %v496_v32  ;;  %v2782_v6 = vld [vmem:[%s3124_s17 + $0x18] sm:$0xff]  ;;  %v3386_v23 = vmax.f32 %v2781_v20, 0.0  ;;  %s251_s17 = sand.u32 1, %s2995_s19  }
 0x179   : > { %v493_v25 = vpop.f32.mrf.mxu0  ;;  %v566_v26 = vpop.f32.mrf.mxu1  ;;  %s2720_s11 = sshll.u32 %s251_s17, 5 }
 0x17a   : > { %v570_v40 = vadd.f32 %v564_v24, %v497_v36  ;;  %v3390_v24 = vmax.f32 %v2782_v6, 0.0  ;;  %s3666_s13 = scalar_lea.vmem [#allocation5], %s2720_s11  ;;  %s3017_s11 = smov [#allocation5]  }
 0x17b   : > { %v494_v28 = vpop.f32.mrf.mxu0  ;;  %v567_v29 = vpop.f32.mrf.mxu1 }
 0x17d   : > { %v618_v33 = vpop.f32.mrf.mxu0  ;;  %v691_v35 = vpop.f32.mrf.mxu1 }
 0x17e   : > { %v625_v43 = vadd.f32 %v618_v33, %v569_v38 }
 0x17f   : > { %v620_v10 = vpop.f32.mrf.mxu0  ;;  %v693_v37 = vpop.f32.mrf.mxu1 }
 0x180   : > { %v626_v48 = vadd.f32 %v620_v10, %v570_v40  ;;  %v698_v51 = vadd.f32 %v691_v35, %v625_v43  ;;  %v2755_v43 = vld [vmem:[%s3876_s3 + $0x4] sm:$0xf] }
 0x181   : > { %v622_v39 = vpop.f32.mrf.mxu0  ;;  %v695_v11 = vpop.f32.mrf.mxu1 }
 0x182   : > { %v699_v55 = vadd.f32 %v693_v37, %v626_v48 }
 0x183   : > { %v623_v44 = vpop.f32.mrf.mxu0  ;;  %v696_v47 = vpop.f32.mrf.mxu1 }
 0x185   : > { %v764_v49 = vpop.f32.mrf.mxu0  ;;  %v837_v50 = vpop.f32.mrf.mxu1 }
 0x186   : > { %v771_v56 = vadd.f32 %v764_v49, %v698_v51 }
 0x187   : > { %v766_v52 = vpop.f32.mrf.mxu0  ;;  %v839_v54 = vpop.f32.mrf.mxu1 }
 0x188   : > { %v772_v59 = vadd.f32 %v766_v52, %v699_v55  ;;  %v844_v63 = vadd.f32 %v837_v50, %v771_v56  ;;  %v929_v56 = vld [vmem:[%s3876_s3] sm:$0xf] }
 0x189   : > { %v768_v57 = vpop.f32.mrf.mxu0  ;;  %v841_v58 = vpop.f32.mrf.mxu1 }
 0x18a   : > { %v845_v1 = vadd.f32 %v839_v54, %v772_v59 }
 0x18b   : > { %v769_v60 = vpop.f32.mrf.mxu0  ;;  %v842_v62 = vpop.f32.mrf.mxu1 }
 0x18d   : > { %v910_v0 = vpop.f32.mrf.mxu0 }
 0x18e   : > { %v917_v3 = vadd.f32 %v910_v0, %v844_v63 }
 0x18f   : > { %v912_v5 = vpop.f32.mrf.mxu0 }
 0x190   : > { %v3350_v8 = vmax.f32 %v917_v3, 0.0  ;;  %v918_v12 = vadd.f32 %v912_v5, %v845_v1 }
 0x191   : > { %v914_v13 = vpop.f32.mrf.mxu0 }
 0x192   : > { %v3352_v14 = vmax.f32 %v918_v12, 0.0  ;;  %932 = vrot.lane.b32.xlu0 %v3350_v8, %s3009_s25  ;;  %v1174_v63 = vpack.c.bf16 %v3350_v8, %v3350_v8  ;;  %v2760_v13 = vld [vmem:[%s3876_s3 + $0x8] sm:$0xf] }
 0x193   : > { %v915_v2 = vpop.f32.mrf.mxu0 }
 0x194   : > { %934 = vrot.lane.b32.xlu1 %v3352_v14, %s3009_s25  ;;  %v1175_v12 = vpack.c.bf16 %v3352_v14, %v3352_v14 }
 0x196   : > { %921 = vrot.lane.b32.xlu0 %v3350_v8, %s3008_s23 }
 0x198   : > { %923 = vrot.lane.b32.xlu1 %v3352_v14, %s3008_s23 }
 0x19a   : > { %1044 = vrot.lane.b32.xlu0 %v3350_v8, %s3011_s26 }
 0x19c   : > { %1046 = vrot.lane.b32.xlu1 %v3352_v14, %s3011_s26 }
 0x19e   : > { %1108 = vrot.lane.b32.xlu0 %v3350_v8, %s3012_s30 }
 0x1a0   : > { %1110 = vrot.lane.b32.xlu1 %v3352_v14, %s3012_s30 }
 0x1a2   : > { %1228 = vrot.lane.b32.xlu0 %v3350_v8, %s3013_s6 }
 0x1a4   : > { %1230 = vrot.lane.b32.xlu1 %v3352_v14, %s3013_s6 }
 0x1a6   : > { %1292 = vrot.lane.b32.xlu0 %v3350_v8, %s3014_s7 }
 0x1a8   : > { %1294 = vrot.lane.b32.xlu1 %v3352_v14, %s3014_s7 }
 0x1aa   : > { %1356 = vrot.lane.b32.xlu0 %v3350_v8, %s3015_s8 }
 0x1ac   : > { %1358 = vrot.lane.b32.xlu1 %v3352_v14, %s3015_s8 }
 0x1ae   : > { %1420 = vrot.lane.b32.xlu0 %v3350_v8, %s3016_s9 }
 0x1b0   : > { %1422 = vrot.lane.b32.xlu1 %v3352_v14, %s3016_s9 }
 0x1b2   : > { %1507 = vrot.lane.b32.xlu0 %v3386_v23, %s3009_s25 }
 0x1b4   : > { %1509 = vrot.lane.b32.xlu1 %v3390_v24, %s3009_s25 }
 0x1b6   : > { %1496 = vrot.lane.b32.xlu0 %v3386_v23, %s3008_s23 }
 0x1b8   : > { %1498 = vrot.lane.b32.xlu1 %v3390_v24, %s3008_s23 }
 0x1ba   : > { %1618 = vrot.lane.b32.xlu0 %v3386_v23, %s3011_s26 }
 0x1bc   : > { %1620 = vrot.lane.b32.xlu1 %v3390_v24, %s3011_s26 }
 0x1be   : > { %1681 = vrot.lane.b32.xlu0 %v3386_v23, %s3012_s30 }
 0x1c0   : > { %1683 = vrot.lane.b32.xlu1 %v3390_v24, %s3012_s30 }
 0x1c2   : > { %1799 = vrot.lane.b32.xlu0 %v3386_v23, %s3013_s6 }
 0x1c4   : > { %1801 = vrot.lane.b32.xlu1 %v3390_v24, %s3013_s6 }
 0x1c6   : > { %1862 = vrot.lane.b32.xlu0 %v3386_v23, %s3014_s7 }
 0x1c8   : > { %1864 = vrot.lane.b32.xlu1 %v3390_v24, %s3014_s7 }
 0x1ca   : > { %1925 = vrot.lane.b32.xlu0 %v3386_v23, %s3015_s8 }
 0x1cc   : > { %1927 = vrot.lane.b32.xlu1 %v3390_v24, %s3015_s8 }
 0x1ce   : > { %1988 = vrot.lane.b32.xlu0 %v3386_v23, %s3016_s9 }
 0x1d0   : > { %1990 = vrot.lane.b32.xlu1 %v3390_v24, %s3016_s9 }
 0x204   : > { %v933_v25 = vpop.permute.xlu0 %932 }
 0x206   : > { %v935_v26 = vpop.permute.xlu1 %934 }
 0x207   : > { %v936_v27 = vsel %vm306_vm1, %v933_v25, %v935_v26  ;;  %v937_v28 = vsel %vm306_vm1, %v935_v26, %v933_v25 }
 0x208   : > { %v938_v29 = vmul.f32 %v937_v28, %v3183_v16  ;;  %v939_v31 = vmul.f32 %v936_v27, %v3186_v17  ;;  %v922_v32 = vpop.permute.xlu0 %921 }
 0x20a   : > { %v942_v33 = vpack.c.bf16 %v938_v29, %v938_v29  ;;  %v943_v35 = vpack.c.bf16 %v939_v31, %v939_v31  ;;  %v924_v36 = vpop.permute.xlu1 %923  ;;  %v1180_v29 = vsel %vm327_vm3, %v1174_v63, 0  ;;  %v2763_v31 = vld [vmem:[%s3876_s3 + $0xc] sm:$0xf] }
 0x20b   : > { %v925_v10 = vsel %vm286_vm0, %v922_v32, %v924_v36  ;;  %v926_v37 = vsel %vm286_vm0, %v924_v36, %v922_v32 }
 0x20c   : > { %v927_v38 = vmul.f32 %v926_v37, %v3180_v15  ;;  %v928_v39 = vmul.f32 %v925_v10, %v3189_v18  ;;  %2756 = vmatprep.subr.msk.bf16.mxu1 %vm327_vm3, %v943_v35  ;;  %v1045_v11 = vpop.permute.xlu0 %1044  ;;  %v948_v40 = vsel %vm327_vm3, %v942_v33, 0 }
 0x20d   : > { %968 = vmatpush1.bf16.msra.mxu1 %v948_v40  ;;  %v2766_v40 = vld [vmem:[%s3876_s3 + $0x10] sm:$0xf] }
 0x20e   : > { %v930_v44 = vpack.c.bf16 %v927_v38, %v927_v38  ;;  %v931_v47 = vpack.c.bf16 %v928_v39, %v928_v39  ;;  %v1047_v48 = vpop.permute.xlu1 %1046 }
 0x20f   : > { %v1048_v49 = vsel %vm429_vm2, %v1045_v11, %v1047_v48  ;;  %v1049_v50 = vsel %vm429_vm2, %v1047_v48, %v1045_v11 }
 0x210   : > { %v1050_v51 = vmul.f32 %v1049_v50, %v3193_v21  ;;  %v1051_v52 = vmul.f32 %v1048_v49, %v3196_v22  ;;  %2757 = vmatmul.mubr.msk.bf16.vlgmr.msra.gmra.mxu1 %vm323_vm5, %v2755_v43  ;;  %2758 = vmatprep.subr.msk.bf16.mxu0 %vm327_vm3, %v931_v47  ;;  %v1109_v54 = vpop.permute.xlu0 %1108  ;;  %v998_v55 = vsel %vm327_vm3, %v930_v44, 0 }
 0x211   : > { %1018 = vmatpush1.bf16.msra.mxu0 %v998_v55  ;;  %1097 = vmatprep.mubr.bf16.mxu1 %v3010_v4  ;;  %v2769_v55 = vld [vmem:[%s3876_s3 + $0x14] sm:$0xf] }
 0x212   : > { %v1054_v57 = vpack.c.bf16 %v1050_v51, %v1050_v51  ;;  %v1055_v58 = vpack.c.bf16 %v1051_v52, %v1051_v52  ;;  %v1111_v59 = vpop.permute.xlu1 %1110 }
 0x213   : > { %v1112_v60 = vsel %vm502_vm4, %v1109_v54, %v1111_v59  ;;  %v1113_v62 = vsel %vm502_vm4, %v1111_v59, %v1109_v54 }
 0x214   : > { %v1114_v0 = vmul.f32 %v1113_v62, %v3218_v41  ;;  %v1115_v1 = vmul.f32 %v1112_v60, %v3221_v42  ;;  %2759 = vmatmul.mubr.msk.bf16.vlgmr.msra.gmra.mxu0 %vm323_vm5, %v929_v56  ;;  %2761 = vmatprep.subr.msk.bf16.mxu1 %vm327_vm3, %v1055_v58  ;;  %v1229_v3 = vpop.permute.xlu0 %1228  ;;  %v1060_v5 = vsel %vm327_vm3, %v1054_v57, 0 }
 0x215   : > { %1080 = vmatpush1.bf16.msra.mxu1 %v1060_v5  ;;  %1161 = vmatprep.mubr.bf16.mxu0 %v3010_v4 }
 0x216   : > { %v1118_v8 = vpack.c.bf16 %v1114_v0, %v1114_v0  ;;  %v1119_v2 = vpack.c.bf16 %v1115_v1, %v1115_v1  ;;  %v1231_v20 = vpop.permute.xlu1 %1230  ;;  %2767 = vmatprep.subr.msk.bf16.mxu1 %vm327_vm3, %v1175_v12 }
 0x217   : > { %v1232_v6 = vsel %vm631_vm6, %v1229_v3, %v1231_v20  ;;  %v1233_v25 = vsel %vm631_vm6, %v1231_v20, %v1229_v3  ;;  %v2772_v3 = vld [vmem:[%s3876_s3 + $0x18] sm:$0xf] }
 0x218   : > { %v1234_v14 = vmul.f32 %v1232_v6, %v3237_v53  ;;  %v1235_v26 = vmul.f32 %v1233_v25, %v3252_v61  ;;  %2762 = vmatmul.mubr.msk.bf16.vlgmr.msra.gmra.mxu1 %vm323_vm5, %v2760_v13  ;;  %2764 = vmatprep.subr.msk.bf16.mxu0 %vm327_vm3, %v1119_v2  ;;  %v1293_v27 = vpop.permute.xlu0 %1292  ;;  %v1124_v28 = vsel %vm327_vm3, %v1118_v8, 0 }
 0x219   : > { %1144 = vmatpush1.bf16.msra.mxu0 %v1124_v28  ;;  %1200 = vmatpush1.bf16.msra.mxu1 %v1180_v29 }
 0x21a   : > { %v1238_v32 = vpack.c.bf16 %v1234_v14, %v1234_v14  ;;  %v1239_v33 = vpack.c.bf16 %v1235_v26, %v1235_v26  ;;  %v1295_v35 = vpop.permute.xlu1 %1294  ;;  %1217 = vmatprep.mubr.bf16.mxu1 %v3010_v4  ;;  %v2775_v26 = vld [vmem:[%s3876_s3 + $0x1c] sm:$0xf] }
 0x21b   : > { %v1296_v36 = vsel %vm704_vm7, %v1293_v27, %v1295_v35  ;;  %v1297_v10 = vsel %vm704_vm7, %v1295_v35, %v1293_v27 }
 0x21c   : > { %v1298_v37 = vmul.f32 %v1296_v36, %v3265_v9  ;;  %v1299_v38 = vmul.f32 %v1297_v10, %v3274_v19  ;;  %2765 = vmatmul.mubr.msk.bf16.vlgmr.msra.gmra.mxu0 %vm323_vm5, %v2763_v31  ;;  %2770 = vmatprep.subr.msk.bf16.mxu0 %vm327_vm3, %v1239_v33  ;;  %v1357_v39 = vpop.permute.xlu0 %1356  ;;  %v1244_v11 = vsel %vm327_vm3, %v1238_v32, 0 }
 0x21d   : > { %1264 = vmatpush1.bf16.msra.mxu0 %v1244_v11  ;;  %1281 = vmatprep.mubr.bf16.mxu0 %v3010_v4 }
 0x21e   : > { %v1302_v43 = vpack.c.bf16 %v1298_v37, %v1298_v37  ;;  %v1303_v44 = vpack.c.bf16 %v1299_v38, %v1299_v38  ;;  %v1359_v47 = vpop.permute.xlu1 %1358  ;;  %v2778_v37 = vld [vmem:[%s3876_s3 + $0x20] sm:$0xf] }
 0x21f   : > { %v1360_v48 = vsel %vm777_vm8, %v1357_v39, %v1359_v47  ;;  %v1361_v49 = vsel %vm777_vm8, %v1359_v47, %v1357_v39 }
 0x220   : > { %v1362_v50 = vmul.f32 %v1360_v48, %v3289_v30  ;;  %v1363_v51 = vmul.f32 %v1361_v49, %v3297_v34  ;;  %v1421_v52 = vpop.permute.xlu0 %1420  ;;  %2768 = vmatmul.mubr.msk.bf16.vlgmr.msra.gmra.mxu1 %vm323_vm5, %v2766_v40  ;;  %2773 = vmatprep.subr.msk.bf16.mxu1 %vm327_vm3, %v1303_v44  ;;  %v1308_v54 = vsel %vm327_vm3, %v1302_v43, 0 }
 0x221   : > { %1328 = vmatpush1.bf16.msra.mxu1 %v1308_v54  ;;  %1345 = vmatprep.mubr.bf16.mxu1 %v3010_v4 }
 0x222   : > { %v1366_v56 = vpack.c.bf16 %v1362_v50, %v1362_v50  ;;  %v1367_v57 = vpack.c.bf16 %v1363_v51, %v1363_v51  ;;  %v1423_v58 = vpop.permute.xlu1 %1422  ;;  %v2785_v50 = vld [vmem:[%s3875_s2 + $0x4] sm:$0xf] }
 0x223   : > { %v1424_v59 = vsel %vm850_vm9, %v1421_v52, %v1423_v58  ;;  %v1425_v60 = vsel %vm850_vm9, %v1423_v58, %v1421_v52 }
 0x224   : > { %v1426_v62 = vmul.f32 %v3316_v45, %v1424_v59  ;;  %v1427_v63 = vmul.f32 %v3318_v46, %v1425_v60  ;;  %2771 = vmatmul.mubr.msk.bf16.vlgmr.msra.gmra.mxu0 %vm323_vm5, %v2769_v55  ;;  %2776 = vmatprep.subr.msk.bf16.mxu0 %vm327_vm3, %v1367_v57  ;;  %v1372_v0 = vsel %vm327_vm3, %v1366_v56, 0  ;;  %v1508_v1 = vpop.permute.xlu0 %1507  ;;  %v1746_v55 = vpack.c.bf16 %v3390_v24, %v3390_v24  ;;  %v1504_v24 = vld [vmem:[%s3875_s2] sm:$0xf] }
 0x225   : > { %1392 = vmatpush1.bf16.msra.mxu0 %v1372_v0  ;;  %1409 = vmatprep.mubr.bf16.mxu0 %v3010_v4 }
 0x226   : > { %v1430_v5 = vpack.c.bf16 %v1426_v62, %v1426_v62  ;;  %v1431_v12 = vpack.c.bf16 %v1427_v63, %v1427_v63  ;;  %v1510_v13 = vpop.permute.xlu1 %1509 }
 0x227   : > { %v1511_v8 = vsel %vm306_vm1, %v1508_v1, %v1510_v13  ;;  %v1512_v2 = vsel %vm306_vm1, %v1510_v13, %v1508_v1 }
 0x228   : > { %2774 = vmatmul.mubr.msk.bf16.vlgmr.msra.gmra.mxu1 %vm323_vm5, %v2772_v3  ;;  %2779 = vmatprep.subr.msk.bf16.mxu1 %vm327_vm3, %v1431_v12  ;;  %v1436_v20 = vsel %vm327_vm3, %v1430_v5, 0  ;;  %v1513_v6 = vmul.f32 %v1512_v2, %v3183_v16  ;;  %v1514_v25 = vmul.f32 %v1511_v8, %v3186_v17  ;;  %v1497_v14 = vpop.permute.xlu0 %1496  ;;  %v1745_v3 = vpack.c.bf16 %v3386_v23, %v3386_v23  ;;  %v2790_v23 = vld [vmem:[%s3875_s2 + $0x8] sm:$0xf] }
 0x229   : > { %1456 = vmatpush1.bf16.msra.mxu1 %v1436_v20  ;;  %1473 = vmatprep.mubr.bf16.mxu1 %v3010_v4 }
 0x22a   : > { %v1516_v27 = vpack.c.bf16 %v1513_v6, %v1513_v6  ;;  %v1517_v28 = vpack.c.bf16 %v1514_v25, %v1514_v25  ;;  %v1499_v29 = vpop.permute.xlu1 %1498 }
 0x22b   : > { %v1500_v31 = vsel %vm286_vm0, %v1497_v14, %v1499_v29  ;;  %v1501_v32 = vsel %vm286_vm0, %v1499_v29, %v1497_v14  ;;  %v1751_v14 = vsel %vm327_vm3, %v1745_v3, 0 }
 0x22c   : > { %2777 = vmatmul.mubr.msk.bf16.vlgmr.msra.gmra.mxu0 %vm323_vm5, %v2775_v26  ;;  %v1502_v33 = vmul.f32 %v1501_v32, %v3180_v15  ;;  %v1503_v35 = vmul.f32 %v1500_v31, %v3189_v18  ;;  %2786 = vmatprep.subr.msk.bf16.mxu0 %vm327_vm3, %v1517_v28  ;;  %v1522_v36 = vsel %vm327_vm3, %v1516_v27, 0  ;;  %v1619_v10 = vpop.permute.xlu0 %1618 }
 0x22d   : > { %1542 = vmatpush1.bf16.msra.mxu0 %v1522_v36  ;;  %1559 = vmatprep.mubr.bf16.mxu0 %v3010_v4 }
 0x22e   : > { %v1505_v38 = vpack.c.bf16 %v1502_v33, %v1502_v33  ;;  %v1506_v39 = vpack.c.bf16 %v1503_v35, %v1503_v35  ;;  %v1621_v11 = vpop.permute.xlu1 %1620  ;;  %v2793_v33 = vld [vmem:[%s3875_s2 + $0xc] sm:$0xf] }
 0x22f   : > { %v1622_v40 = vsel %vm429_vm2, %v1619_v10, %v1621_v11  ;;  %v1623_v43 = vsel %vm429_vm2, %v1621_v11, %v1619_v10 }
 0x230   : > { %2780 = vmatmul.mubr.msk.bf16.vlgmr.msra.gmra.mxu1 %vm323_vm5, %v2778_v37  ;;  %v1624_v44 = vmul.f32 %v1623_v43, %v3193_v21  ;;  %v1625_v47 = vmul.f32 %v1622_v40, %v3196_v22  ;;  %2788 = vmatprep.subr.msk.bf16.mxu1 %vm327_vm3, %v1506_v39  ;;  %v1572_v48 = vsel %vm327_vm3, %v1505_v38, 0  ;;  %v1682_v49 = vpop.permute.xlu0 %1681 }
 0x231   : > { %1592 = vmatpush1.bf16.msra.mxu1 %v1572_v48  ;;  %1609 = vmatprep.mubr.bf16.mxu1 %v3010_v4 }
 0x232   : > { %v1627_v51 = vpack.c.bf16 %v1624_v44, %v1624_v44  ;;  %v1628_v52 = vpack.c.bf16 %v1625_v47, %v1625_v47  ;;  %v1684_v54 = vpop.permute.xlu1 %1683  ;;  %v2796_v44 = vld [vmem:[%s3875_s2 + $0x10] sm:$0xf] }
 0x233   : > { %v1685_v56 = vsel %vm502_vm4, %v1682_v49, %v1684_v54  ;;  %v1686_v57 = vsel %vm502_vm4, %v1684_v54, %v1682_v49 }
 0x234   : > { %2787 = vmatmul.mubr.msk.bf16.vlgmr.msra.gmra.mxu0 %vm323_vm5, %v2785_v50  ;;  %v1687_v58 = vmul.f32 %v1686_v57, %v3218_v41  ;;  %v1688_v59 = vmul.f32 %v1685_v56, %v3221_v42  ;;  %2791 = vmatprep.subr.msk.bf16.mxu0 %vm327_vm3, %v1628_v52  ;;  %v1633_v60 = vsel %vm327_vm3, %v1627_v51, 0  ;;  %v1800_v62 = vpop.permute.xlu0 %1799  ;;  %v2799_v56 = vld [vmem:[%s3875_s2 + $0x14] sm:$0xf] }
 0x235   : > { %1653 = vmatpush1.bf16.msra.mxu0 %v1633_v60  ;;  %1670 = vmatprep.mubr.bf16.mxu0 %v3010_v4  ;;  %v2805_v60 = vld [vmem:[%s3875_s2 + $0x1c] sm:$0xf] }
 0x236   : > { %v1690_v63 = vpack.c.bf16 %v1687_v58, %v1687_v58  ;;  %v1691_v0 = vpack.c.bf16 %v1688_v59, %v1688_v59  ;;  %v1802_v1 = vpop.permute.xlu1 %1801  ;;  %2797 = vmatprep.subr.msk.bf16.mxu0 %vm327_vm3, %v1746_v55 }
 0x237   : > { %v1803_v5 = vsel %vm631_vm6, %v1800_v62, %v1802_v1  ;;  %v1804_v12 = vsel %vm631_vm6, %v1802_v1, %v1800_v62  ;;  %v2808_v62 = vld [vmem:[%s3875_s2 + $0x20] sm:$0xf] }
 0x238   : > { %2789 = vmatmul.mubr.msk.bf16.vlgmr.msra.gmra.mxu1 %vm323_vm5, %v1504_v24  ;;  %2794 = vmatprep.subr.msk.bf16.mxu1 %vm327_vm3, %v1691_v0  ;;  %v1696_v13 = vsel %vm327_vm3, %v1690_v63, 0  ;;  %v1805_v8 = vmul.f32 %v1803_v5, %v3237_v53  ;;  %v1806_v2 = vmul.f32 %v1804_v12, %v3252_v61  ;;  %v1863_v20 = vpop.permute.xlu0 %1862 }
 0x239   : > { %1716 = vmatpush1.bf16.msra.mxu1 %v1696_v13  ;;  %1733 = vmatprep.mubr.bf16.mxu1 %v3010_v4 }
 0x23a   : > { %v1808_v6 = vpack.c.bf16 %v1805_v8, %v1805_v8  ;;  %v1809_v25 = vpack.c.bf16 %v1806_v2, %v1806_v2  ;;  %v1865_v26 = vpop.permute.xlu1 %1864 }
 0x23b   : > { %v1866_v27 = vsel %vm704_vm7, %v1863_v20, %v1865_v26  ;;  %v1867_v28 = vsel %vm704_vm7, %v1865_v26, %v1863_v20 }
 0x23c   : > { %2792 = vmatmul.mubr.msk.bf16.vlgmr.msra.gmra.mxu0 %vm323_vm5, %v2790_v23  ;;  %v1868_v29 = vmul.f32 %v1866_v27, %v3265_v9  ;;  %v1869_v31 = vmul.f32 %v1867_v28, %v3274_v19  ;;  %2800 = vmatprep.subr.msk.bf16.mxu1 %vm327_vm3, %v1809_v25  ;;  %v1926_v32 = vpop.permute.xlu0 %1925  ;;  %v1814_v10 = vsel %vm327_vm3, %v1808_v6, 0 }
 0x23d   : > { %1771 = vmatpush1.bf16.msra.mxu0 %v1751_v14  ;;  %1788 = vmatprep.mubr.bf16.mxu0 %v3010_v4 }
 0x23e   : > { %v1871_v35 = vpack.c.bf16 %v1868_v29, %v1868_v29  ;;  %v1872_v36 = vpack.c.bf16 %v1869_v31, %v1869_v31  ;;  %v1928_v37 = vpop.permute.xlu1 %1927 }
 0x23f   : > { %v1929_v38 = vsel %vm777_vm8, %v1926_v32, %v1928_v37  ;;  %v1930_v39 = vsel %vm777_vm8, %v1928_v37, %v1926_v32 }
 0x240   : > { %2795 = vmatmul.mubr.msk.bf16.vlgmr.msra.gmra.mxu1 %vm323_vm5, %v2793_v33  ;;  %v1931_v11 = vmul.f32 %v1929_v38, %v3289_v30  ;;  %v1932_v40 = vmul.f32 %v1930_v39, %v3297_v34  ;;  %2803 = vmatprep.subr.msk.bf16.mxu0 %vm327_vm3, %v1872_v36  ;;  %v1989_v43 = vpop.permute.xlu0 %1988  ;;  %v1877_v49 = vsel %vm327_vm3, %v1871_v35, 0 }
 0x241   : > { %1834 = vmatpush1.bf16.msra.mxu1 %v1814_v10  ;;  %1851 = vmatprep.mubr.bf16.mxu1 %v3010_v4 }
 0x242   : > { %v1934_v47 = vpack.c.bf16 %v1931_v11, %v1931_v11  ;;  %v1935_v48 = vpack.c.bf16 %v1932_v40, %v1932_v40  ;;  %v1991_v50 = vpop.permute.xlu1 %1990 }
 0x243   : > { %v1992_v51 = vsel %vm850_vm9, %v1989_v43, %v1991_v50  ;;  %v1993_v52 = vsel %vm850_vm9, %v1991_v50, %v1989_v43 }
 0x244   : > { %2798 = vmatmul.mubr.msk.bf16.vlgmr.msra.gmra.mxu0 %vm323_vm5, %v2796_v44  ;;  %v1994_v54 = vmul.f32 %v3316_v45, %v1992_v51  ;;  %v1995_v55 = vmul.f32 %v3318_v46, %v1993_v52  ;;  %2806 = vmatprep.subr.msk.bf16.mxu1 %vm327_vm3, %v1935_v48  ;;  %v1940_v59 = vsel %vm327_vm3, %v1934_v47, 0  ;;  %v2802_v45 = vld [vmem:[%s3875_s2 + $0x18] sm:$0xf] }
 0x245   : > { %1897 = vmatpush1.bf16.msra.mxu0 %v1877_v49  ;;  %1914 = vmatprep.mubr.bf16.mxu0 %v3010_v4 }
 0x246   : > { %v1997_v57 = vpack.c.bf16 %v1994_v54, %v1994_v54  ;;  %v1998_v58 = vpack.c.bf16 %v1995_v55, %v1995_v55 }
 0x248   : > { %2801 = vmatmul.mubr.msk.bf16.vlgmr.msra.gmra.mxu1 %vm323_vm5, %v2799_v56  ;;  %2809 = vmatprep.subr.msk.bf16.mxu0 %vm327_vm3, %v1998_v58  ;;  %v2003_v46 = vsel %vm327_vm3, %v1997_v57, 0 }
 0x249   : > { %1960 = vmatpush1.bf16.msra.mxu1 %v1940_v59  ;;  %1977 = vmatprep.mubr.bf16.mxu1 %v3010_v4 }
 0x24c   : > { %2804 = vmatmul.mubr.msk.bf16.vlgmr.msra.gmra.mxu0 %vm323_vm5, %v2802_v45  ;;  %v276_v45 = vld [vmem:[%s3660_s10] sm:$0xff] }
 0x24d   : > { %2023 = vmatpush1.bf16.msra.mxu0 %v2003_v46  ;;  %2040 = vmatprep.mubr.bf16.mxu0 %v3010_v4 }
 0x250   : > { %2807 = vmatmul.mubr.msk.bf16.vlgmr.msra.gmra.mxu1 %vm323_vm5, %v2805_v60 }
 0x251   : > { %2116 = vmatprep.mubr.bf16.mxu1 %v3010_v4 }
 0x254   : > { %2810 = vmatmul.mubr.msk.bf16.vlgmr.msra.gmra.mxu0 %vm323_vm5, %v2808_v62 }
 0x255   : > { %2166 = vmatprep.mubr.bf16.mxu0 %v3010_v4 }
 0x2d0   : > { %v987_v24 = vpop.f32.mrf.mxu1 }
 0x2d2   : > { %v989_v63 = vpop.f32.mrf.mxu1 }
 0x2d4   : > { %v991_v0 = vpop.f32.mrf.mxu1  ;;  %v1037_v1 = vpop.f32.mrf.mxu0 }
 0x2d5   : > { %v1038_v29 = vadd.f32 %v1037_v1, %v987_v24 }
 0x2d6   : > { %v992_v3 = vpop.f32.mrf.mxu1  ;;  %v1039_v5 = vpop.f32.mrf.mxu0 }
 0x2d7   : > { %v1040_v33 = vadd.f32 %v1039_v5, %v989_v63  ;;  %v277_v63 = vld [vmem:[%s3660_s10 + $0x8] sm:$0xff] }
 0x2d8   : > { %v1041_v12 = vpop.f32.mrf.mxu0  ;;  %v1099_v13 = vpop.f32.mrf.mxu1 }
 0x2d9   : > { %v1106_v35 = vadd.f32 %v1099_v13, %v1038_v29 }
 0x2da   : > { %v1042_v8 = vpop.f32.mrf.mxu0  ;;  %v1101_v2 = vpop.f32.mrf.mxu1 }
 0x2db   : > { %v1107_v37 = vadd.f32 %v1101_v2, %v1040_v33 }
 0x2dc   : > { %v1103_v20 = vpop.f32.mrf.mxu1  ;;  %v1163_v23 = vpop.f32.mrf.mxu0 }
 0x2dd   : > { %v1170_v38 = vadd.f32 %v1163_v23, %v1106_v35 }
 0x2de   : > { %v1104_v6 = vpop.f32.mrf.mxu1  ;;  %v1165_v25 = vpop.f32.mrf.mxu0 }
 0x2df   : > { %v1171_v40 = vadd.f32 %v1165_v25, %v1107_v37 }
 0x2e0   : > { %v1167_v14 = vpop.f32.mrf.mxu0  ;;  %v1219_v26 = vpop.f32.mrf.mxu1 }
 0x2e1   : > { %v1226_v43 = vadd.f32 %v1219_v26, %v1170_v38 }
 0x2e2   : > { %v1168_v27 = vpop.f32.mrf.mxu0  ;;  %v1221_v28 = vpop.f32.mrf.mxu1 }
 0x2e3   : > { %v1227_v48 = vadd.f32 %v1221_v28, %v1171_v40 }
 0x2e4   : > { %v1223_v31 = vpop.f32.mrf.mxu1  ;;  %v1283_v32 = vpop.f32.mrf.mxu0 }
 0x2e5   : > { %v1290_v49 = vadd.f32 %v1283_v32, %v1226_v43 }
 0x2e6   : > { %v1224_v36 = vpop.f32.mrf.mxu1  ;;  %v1285_v10 = vpop.f32.mrf.mxu0 }
 0x2e7   : > { %v1291_v52 = vadd.f32 %v1285_v10, %v1227_v48 }
 0x2e8   : > { %v1287_v39 = vpop.f32.mrf.mxu0  ;;  %v1347_v11 = vpop.f32.mrf.mxu1 }
 0x2e9   : > { %v1354_v54 = vadd.f32 %v1347_v11, %v1290_v49 }
 0x2ea   : > { %v1288_v44 = vpop.f32.mrf.mxu0  ;;  %v1349_v47 = vpop.f32.mrf.mxu1 }
 0x2eb   : > { %v1355_v57 = vadd.f32 %v1349_v47, %v1291_v52 }
 0x2ec   : > { %v1351_v50 = vpop.f32.mrf.mxu1  ;;  %v1411_v51 = vpop.f32.mrf.mxu0 }
 0x2ed   : > { %v1418_v58 = vadd.f32 %v1411_v51, %v1354_v54 }
 0x2ee   : > { %v1352_v55 = vpop.f32.mrf.mxu1  ;;  %v1413_v56 = vpop.f32.mrf.mxu0 }
 0x2ef   : > { %v1419_v60 = vadd.f32 %v1413_v56, %v1355_v57 }
 0x2f0   : > { %v1415_v59 = vpop.f32.mrf.mxu0  ;;  %v1475_v46 = vpop.f32.mrf.mxu1 }
 0x2f1   : > { %v1482_v62 = vadd.f32 %v1475_v46, %v1418_v58 }
 0x2f2   : > { %v1416_v24 = vpop.f32.mrf.mxu0  ;;  %v1477_v0 = vpop.f32.mrf.mxu1 }
 0x2f3   : > { %v1484_v1 = vadd.f32 %v1482_v62, %v276_v45  ;;  %v1483_v3 = vadd.f32 %v1477_v0, %v1419_v60 }
 0x2f4   : > { %v1479_v5 = vpop.f32.mrf.mxu1  ;;  %v1561_v12 = vpop.f32.mrf.mxu0 }
 0x2f5   : > { %1486 = vst [vmem:[%s3666_s13] sm:$0xff] %v1484_v1  ;;  %v1485_v13 = vadd.f32 %v1483_v3, %v277_v63 }
 0x2f6   : > { %v1480_v8 = vpop.f32.mrf.mxu1  ;;  %v1563_v2 = vpop.f32.mrf.mxu0 }
 0x2f7   : > { %1487 = vst [vmem:[%s3666_s13 + $0x8] sm:$0xff] %v1485_v13 }
 0x2f8   : > { %v1565_v20 = vpop.f32.mrf.mxu0  ;;  %v1611_v23 = vpop.f32.mrf.mxu1 }
 0x2f9   : > { %v1612_v38 = vadd.f32 %v1611_v23, %v1561_v12 }
 0x2fa   : > { %v1566_v6 = vpop.f32.mrf.mxu0  ;;  %v1613_v25 = vpop.f32.mrf.mxu1 }
 0x2fb   : > { %v1614_v40 = vadd.f32 %v1613_v25, %v1563_v2 }
 0x2fc   : > { %v1615_v14 = vpop.f32.mrf.mxu1  ;;  %v1672_v26 = vpop.f32.mrf.mxu0 }
 0x2fd   : > { %v1679_v43 = vadd.f32 %v1672_v26, %v1612_v38 }
 0x2fe   : > { %v1616_v27 = vpop.f32.mrf.mxu1  ;;  %v1674_v28 = vpop.f32.mrf.mxu0 }
 0x2ff   : > { %v1680_v48 = vadd.f32 %v1674_v28, %v1614_v40 }
 0x300   : > { %v1676_v29 = vpop.f32.mrf.mxu0  ;;  %v1735_v31 = vpop.f32.mrf.mxu1 }
 0x301   : > { %v1742_v49 = vadd.f32 %v1735_v31, %v1679_v43 }
 0x302   : > { %v1677_v32 = vpop.f32.mrf.mxu0  ;;  %v1737_v33 = vpop.f32.mrf.mxu1 }
 0x303   : > { %v1743_v52 = vadd.f32 %v1737_v33, %v1680_v48 }
 0x304   : > { %v1739_v35 = vpop.f32.mrf.mxu1  ;;  %v1790_v36 = vpop.f32.mrf.mxu0 }
 0x305   : > { %v1797_v54 = vadd.f32 %v1790_v36, %v1742_v49 }
 0x306   : > { %v1740_v10 = vpop.f32.mrf.mxu1  ;;  %v1792_v37 = vpop.f32.mrf.mxu0 }
 0x307   : > { %v1798_v57 = vadd.f32 %v1792_v37, %v1743_v52 }
 0x308   : > { %v1794_v39 = vpop.f32.mrf.mxu0  ;;  %v1853_v11 = vpop.f32.mrf.mxu1 }
 0x309   : > { %v1860_v58 = vadd.f32 %v1853_v11, %v1797_v54 }
 0x30a   : > { %v1795_v44 = vpop.f32.mrf.mxu0  ;;  %v1855_v47 = vpop.f32.mrf.mxu1 }
 0x30b   : > { %v1861_v46 = vadd.f32 %v1855_v47, %v1798_v57 }
 0x30c   : > { %v1857_v50 = vpop.f32.mrf.mxu1  ;;  %v1916_v51 = vpop.f32.mrf.mxu0 }
 0x30d   : > { %v1923_v60 = vadd.f32 %v1916_v51, %v1860_v58  ;;  %v2061_v51 = vld [vmem:[%s3876_s3] sm:$0xf] }
 0x30e   : > { %v1858_v55 = vpop.f32.mrf.mxu1  ;;  %v1918_v56 = vpop.f32.mrf.mxu0 }
 0x30f   : > { %v1924_v63 = vadd.f32 %v1918_v56, %v1861_v46 }
 0x310   : > { %v1920_v59 = vpop.f32.mrf.mxu0  ;;  %v1979_v45 = vpop.f32.mrf.mxu1 }
 0x311   : > { %v1986_v0 = vadd.f32 %v1979_v45, %v1923_v60  ;;  %v2816_v60 = vld [vmem:[%s3876_s3 + $0x8] sm:$0xf] }
 0x312   : > { %v1921_v62 = vpop.f32.mrf.mxu0  ;;  %v1981_v24 = vpop.f32.mrf.mxu1 }
 0x313   : > { %v1987_v5 = vadd.f32 %v1981_v24, %v1924_v63 }
 0x314   : > { %v1983_v1 = vpop.f32.mrf.mxu1  ;;  %v2042_v3 = vpop.f32.mrf.mxu0 }
 0x315   : > { %v2049_v12 = vadd.f32 %v2042_v3, %v1986_v0 }
 0x316   : > { %v1984_v13 = vpop.f32.mrf.mxu1  ;;  %v2044_v8 = vpop.f32.mrf.mxu0 }
 0x317   : > { %v3670_v2 = vmax.f32 %v2049_v12, 0.0  ;;  %v2050_v20 = vadd.f32 %v2044_v8, %v1987_v5  ;;  %v2819_v13 = vld [vmem:[%s3876_s3 + $0xc] sm:$0xf] }
 0x318   : > { %v2046_v23 = vpop.f32.mrf.mxu0 }
 0x319   : > { %v3672_v6 = vmax.f32 %v2050_v20, 0.0  ;;  %2064 = vrot.lane.b32.xlu0 %v3670_v2, %s3009_s25  ;;  %v2302_v56 = vpack.c.bf16 %v3670_v2, %v3670_v2 }
 0x31a   : > { %v2047_v25 = vpop.f32.mrf.mxu0 }
 0x31b   : > { %2066 = vrot.lane.b32.xlu1 %v3672_v6, %s3009_s25  ;;  %v2303_v46 = vpack.c.bf16 %v3672_v6, %v3672_v6  ;;  %v2308_v12 = vsel %vm327_vm3, %v2302_v56, 0 }
 0x31d   : > { %2053 = vrot.lane.b32.xlu0 %v3670_v2, %s3008_s23 }
 0x31f   : > { %2055 = vrot.lane.b32.xlu1 %v3672_v6, %s3008_s23  ;;  %s2943_s23 = sshll.u32 %s3017_s11, 4  ;;  %s2944_s23 = int_to_ptr.vmem [resolvable:$false] %s2943_s23 }
 0x321   : > { %2175 = vrot.lane.b32.xlu0 %v3670_v2, %s3011_s26 }
 0x323   : > { %2177 = vrot.lane.b32.xlu1 %v3672_v6, %s3011_s26  ;;  %s2945_s26 = scalar_lea.vmem %s2944_s23, 1024 }
 0x325   : > { %2238 = vrot.lane.b32.xlu0 %v3670_v2, %s3012_s30 }
 0x327   : > { %2240 = vrot.lane.b32.xlu1 %v3672_v6, %s3012_s30 }
 0x329   : > { %2356 = vrot.lane.b32.xlu0 %v3670_v2, %s3013_s6 }
 0x32b   : > { %2358 = vrot.lane.b32.xlu1 %v3672_v6, %s3013_s6 }
 0x32d   : > { %2419 = vrot.lane.b32.xlu0 %v3670_v2, %s3014_s7 }
 0x32f   : > { %2421 = vrot.lane.b32.xlu1 %v3672_v6, %s3014_s7 }
 0x331   : > { %2482 = vrot.lane.b32.xlu0 %v3670_v2, %s3015_s8 }
 0x333   : > { %2484 = vrot.lane.b32.xlu1 %v3672_v6, %s3015_s8 }
 0x335   : > { %2545 = vrot.lane.b32.xlu0 %v3670_v2, %s3016_s9 }
 0x337   : > { %2547 = vrot.lane.b32.xlu1 %v3672_v6, %s3016_s9  ;;  %s2628_s9 = sshll.u32 %s3666_s13, 4  ;;  %s3821_s9 = int_to_ptr.vmem [resolvable:$true] %s2628_s9 }
 0x338   : > { %s2939_s22 = scalar_lea.vmem %s3821_s9, 512  ;;  %p2946_p11 = scmp.lt.s32.totalorder %s3821_s9, %s2944_s23 }
 0x339   : > { %p2940_p6 = scmp.ne.s32.totalorder %s3821_s9, %s2939_s22  ;;  %p2947_p12 = scmp.lt.s32.totalorder %s2945_s26, %s2939_s22 }
 0x33b   : > { %p2941_p9 = pnand %p2940_p6, %p3087_p5  ;;  %p2948_p13 = por %p2947_p12, %p2946_p11 }
 0x33d   : > { %p2942_p10 = pneg %p2941_p9 }
 0x33f   : > { %p2949_p0 = pnand %p2948_p13, %p2942_p10 }
 0x38b   : > { %v2065_v14 = vpop.permute.xlu0 %2064 }
 0x38d   : > { %v2067_v26 = vpop.permute.xlu1 %2066 }
 0x38e   : > { %v2068_v27 = vsel %vm306_vm1, %v2065_v14, %v2067_v26  ;;  %v2069_v28 = vsel %vm306_vm1, %v2067_v26, %v2065_v14  ;;  %v2822_v26 = vld [vmem:[%s3876_s3 + $0x10] sm:$0xf] }
 0x38f   : > { %v2070_v29 = vmul.f32 %v2069_v28, %v3183_v16  ;;  %v2071_v31 = vmul.f32 %v2068_v27, %v3186_v17  ;;  %v2054_v32 = vpop.permute.xlu0 %2053  ;;  %v2811_v17 = vld [vmem:[%s3876_s3 + $0x4] sm:$0xf] }
 0x391   : > { %v2073_v33 = vpack.c.bf16 %v2070_v29, %v2070_v29  ;;  %v2074_v35 = vpack.c.bf16 %v2071_v31, %v2071_v31  ;;  %v2056_v36 = vpop.permute.xlu1 %2055 }
 0x392   : > { %v2057_v10 = vsel %vm286_vm0, %v2054_v32, %v2056_v36  ;;  %v2058_v37 = vsel %vm286_vm0, %v2056_v36, %v2054_v32 }
 0x393   : > { %v2059_v38 = vmul.f32 %v2058_v37, %v3180_v15  ;;  %v2060_v39 = vmul.f32 %v2057_v10, %v3189_v18  ;;  %2812 = vmatprep.subr.msk.bf16.mxu1 %vm327_vm3, %v2074_v35  ;;  %v2176_v11 = vpop.permute.xlu0 %2175  ;;  %v2079_v16 = vsel %vm327_vm3, %v2073_v33, 0  ;;  %v2825_v35 = vld [vmem:[%s3876_s3 + $0x14] sm:$0xf] }
 0x394   : > { %2099 = vmatpush1.bf16.msra.mxu1 %v2079_v16  ;;  %v2912_v16 = vld [vmem:[#allocation2 + $0x18] ss:$0 sm:$0xff] }
 0x395   : > { %v2062_v40 = vpack.c.bf16 %v2059_v38, %v2059_v38  ;;  %v2063_v43 = vpack.c.bf16 %v2060_v39, %v2060_v39  ;;  %v2178_v44 = vpop.permute.xlu1 %2177  ;;  %v2911_v39 = vld [vmem:[#allocation2 + $0x10] ss:$0 sm:$0xff] }
 0x396   : > { %v2179_v47 = vsel %vm429_vm2, %v2176_v11, %v2178_v44  ;;  %v2180_v15 = vsel %vm429_vm2, %v2178_v44, %v2176_v11 }
 0x397   : > { %v2181_v18 = vmul.f32 %v2180_v15, %v3193_v21  ;;  %v2182_v48 = vmul.f32 %v2179_v47, %v3196_v22  ;;  %2813 = vmatmul.mubr.msk.bf16.vlgmr.msra.gmra.mxu1 %vm323_vm5, %v2811_v17  ;;  %2814 = vmatprep.subr.msk.bf16.mxu0 %vm327_vm3, %v2063_v43  ;;  %v2239_v49 = vpop.permute.xlu0 %2238  ;;  %v2129_v50 = vsel %vm327_vm3, %v2062_v40, 0  ;;  %v2828_v43 = vld [vmem:[%s3876_s3 + $0x18] sm:$0xf]  ;;  %v2831_v15 = vld [vmem:[%s3876_s3 + $0x1c] sm:$0xf] }
 0x398   : > { %2149 = vmatpush1.bf16.msra.mxu0 %v2129_v50  ;;  %2227 = vmatprep.mubr.bf16.mxu1 %v3010_v4 }
 0x399   : > { %v2184_v52 = vpack.c.bf16 %v2181_v18, %v2181_v18  ;;  %v2185_v54 = vpack.c.bf16 %v2182_v48, %v2182_v48  ;;  %v2241_v55 = vpop.permute.xlu1 %2240  ;;  %v2834_v18 = vld [vmem:[%s3876_s3 + $0x20] sm:$0xf] }
 0x39a   : > { %v2242_v21 = vsel %vm502_vm4, %v2239_v49, %v2241_v55  ;;  %v2243_v22 = vsel %vm502_vm4, %v2241_v55, %v2239_v49 }
 0x39b   : > { %v2244_v57 = vmul.f32 %v2243_v22, %v3218_v41  ;;  %v2245_v58 = vmul.f32 %v2242_v21, %v3221_v42  ;;  %2815 = vmatmul.mubr.msk.bf16.vlgmr.msra.gmra.mxu0 %vm323_vm5, %v2061_v51  ;;  %2817 = vmatprep.subr.msk.bf16.mxu1 %vm327_vm3, %v2185_v54  ;;  %v2357_v59 = vpop.permute.xlu0 %2356  ;;  %v2190_v45 = vsel %vm327_vm3, %v2184_v52, 0 }
 0x39c   : > { %2210 = vmatpush1.bf16.msra.mxu1 %v2190_v45  ;;  %2290 = vmatprep.mubr.bf16.mxu0 %v3010_v4 }
 0x39d   : > { %v2247_v41 = vpack.c.bf16 %v2244_v57, %v2244_v57  ;;  %v2248_v62 = vpack.c.bf16 %v2245_v58, %v2245_v58  ;;  %v2359_v42 = vpop.permute.xlu1 %2358  ;;  %2823 = vmatprep.subr.msk.bf16.mxu1 %vm327_vm3, %v2303_v46 }
 0x39e   : > { %v2360_v24 = vsel %vm631_vm6, %v2357_v59, %v2359_v42  ;;  %v2361_v63 = vsel %vm631_vm6, %v2359_v42, %v2357_v59 }
 0x39f   : > { %v2362_v0 = vmul.f32 %v2360_v24, %v3237_v53  ;;  %v2363_v1 = vmul.f32 %v2361_v63, %v3252_v61  ;;  %2818 = vmatmul.mubr.msk.bf16.vlgmr.msra.gmra.mxu1 %vm323_vm5, %v2816_v60  ;;  %2820 = vmatprep.subr.msk.bf16.mxu0 %vm327_vm3, %v2248_v62  ;;  %v2420_v3 = vpop.permute.xlu0 %2419  ;;  %v2253_v5 = vsel %vm327_vm3, %v2247_v41, 0 }
 0x3a0   : > { %2273 = vmatpush1.bf16.msra.mxu0 %v2253_v5  ;;  %2328 = vmatpush1.bf16.msra.mxu1 %v2308_v12 }
 0x3a1   : > { %v2365_v8 = vpack.c.bf16 %v2362_v0, %v2362_v0  ;;  %v2366_v2 = vpack.c.bf16 %v2363_v1, %v2363_v1  ;;  %v2422_v53 = vpop.permute.xlu1 %2421  ;;  %2345 = vmatprep.mubr.bf16.mxu1 %v3010_v4 }
 0x3a2   : > { %v2423_v61 = vsel %vm704_vm7, %v2420_v3, %v2422_v53  ;;  %v2424_v20 = vsel %vm704_vm7, %v2422_v53, %v2420_v3 }
 0x3a3   : > { %v2425_v23 = vmul.f32 %v2423_v61, %v3265_v9  ;;  %v2426_v6 = vmul.f32 %v2424_v20, %v3274_v19  ;;  %2821 = vmatmul.mubr.msk.bf16.vlgmr.msra.gmra.mxu0 %vm323_vm5, %v2819_v13  ;;  %2826 = vmatprep.subr.msk.bf16.mxu0 %vm327_vm3, %v2366_v2  ;;  %v2483_v25 = vpop.permute.xlu0 %2482  ;;  %v2371_v14 = vsel %vm327_vm3, %v2365_v8, 0 }
 0x3a4   : > { %2391 = vmatpush1.bf16.msra.mxu0 %v2371_v14  ;;  %2408 = vmatprep.mubr.bf16.mxu0 %v3010_v4 }
 0x3a5   : > { %v2428_v27 = vpack.c.bf16 %v2425_v23, %v2425_v23  ;;  %v2429_v28 = vpack.c.bf16 %v2426_v6, %v2426_v6  ;;  %v2485_v29 = vpop.permute.xlu1 %2484 }
 0x3a6   : > { %v2486_v9 = vsel %vm777_vm8, %v2483_v25, %v2485_v29  ;;  %v2487_v19 = vsel %vm777_vm8, %v2485_v29, %v2483_v25 }
 0x3a7   : > { %v2488_v31 = vmul.f32 %v2486_v9, %v3289_v30  ;;  %v2489_v32 = vmul.f32 %v2487_v19, %v3297_v34  ;;  %2824 = vmatmul.mubr.msk.bf16.vlgmr.msra.gmra.mxu1 %vm323_vm5, %v2822_v26  ;;  %2829 = vmatprep.subr.msk.bf16.mxu1 %vm327_vm3, %v2429_v28  ;;  %v2434_v33 = vsel %vm327_vm3, %v2428_v27, 0  ;;  %v2546_v37 = vpop.permute.xlu0 %2545 }
 0x3a8   : > { %2454 = vmatpush1.bf16.msra.mxu1 %v2434_v33  ;;  %2471 = vmatprep.mubr.bf16.mxu1 %v3010_v4 }
 0x3a9   : > { %v2491_v36 = vpack.c.bf16 %v2488_v31, %v2488_v31  ;;  %v2492_v10 = vpack.c.bf16 %v2489_v32, %v2489_v32  ;;  %v2548_v38 = vpop.permute.xlu1 %2547  ;;  %v2783_v31 = vld [vmem:[%s3660_s10 + $0x10] sm:$0xff] }
 0x3aa   : > { %v2549_v30 = vsel %vm850_vm9, %v2546_v37, %v2548_v38  ;;  %v2550_v34 = vsel %vm850_vm9, %v2548_v38, %v2546_v37 }
 0x3ab   : > { %v2551_v11 = vmul.f32 %v2911_v39, %v2549_v30  ;;  %v2552_v17 = vmul.f32 %v2912_v16, %v2550_v34  ;;  %2827 = vmatmul.mubr.msk.bf16.vlgmr.msra.gmra.mxu0 %vm323_vm5, %v2825_v35  ;;  %2832 = vmatprep.subr.msk.bf16.mxu0 %vm327_vm3, %v2492_v10  ;;  %v2497_v40 = vsel %vm327_vm3, %v2491_v36, 0  ;;  %v2784_v10 = vld [vmem:[%s3660_s10 + $0x18] sm:$0xff]  ;;  %s3832_s10 = scalar_lea.sflag [#allocation4], %s251_s17 }
 0x3ac   : > { %2517 = vmatpush1.bf16.msra.mxu0 %v2497_v40  ;;  %2534 = vmatprep.mubr.bf16.mxu0 %v3010_v4 }
 0x3ad   : > { %v2554_v44 = vpack.c.bf16 %v2551_v11, %v2551_v11  ;;  %v2555_v7 = vpack.c.bf16 %v2552_v17, %v2552_v17 }
 0x3af   : > { %2830 = vmatmul.mubr.msk.bf16.vlgmr.msra.gmra.mxu1 %vm323_vm5, %v2828_v43  ;;  %2835 = vmatprep.subr.msk.bf16.mxu1 %vm327_vm3, %v2555_v7  ;;  %v2560_v47 = vsel %vm327_vm3, %v2554_v44, 0 }
 0x3b0   : > { %2580 = vmatpush1.bf16.msra.mxu1 %v2560_v47  ;;  %2597 = vmatprep.mubr.bf16.mxu1 %v3010_v4 }
 0x3b3   : > { %2833 = vmatmul.mubr.msk.bf16.vlgmr.msra.gmra.mxu0 %vm323_vm5, %v2831_v15 }
 0x3b7   : > { %2836 = vmatmul.mubr.msk.bf16.vlgmr.msra.gmra.mxu1 %vm323_vm5, %v2834_v18 }
 0x457   : > { %v2118_v48 = vpop.f32.mrf.mxu1 }
 0x459   : > { %v2120_v49 = vpop.f32.mrf.mxu1 }
 0x45b   : > { %v2122_v50 = vpop.f32.mrf.mxu1  ;;  %v2168_v51 = vpop.f32.mrf.mxu0 }
 0x45c   : > { %v2169_v62 = vadd.f32 %v2168_v51, %v2118_v48 }
 0x45d   : > { %v2123_v52 = vpop.f32.mrf.mxu1  ;;  %v2170_v54 = vpop.f32.mrf.mxu0 }
 0x45e   : > { %v2171_v63 = vadd.f32 %v2170_v54, %v2120_v49 }
 0x45f   : > { %v2172_v55 = vpop.f32.mrf.mxu0  ;;  %v2229_v21 = vpop.f32.mrf.mxu1 }
 0x460   : > { %v2236_v0 = vadd.f32 %v2229_v21, %v2169_v62 }
 0x461   : > { %v2173_v22 = vpop.f32.mrf.mxu0  ;;  %v2231_v56 = vpop.f32.mrf.mxu1 }
 0x462   : > { %v2237_v5 = vadd.f32 %v2231_v56, %v2171_v63 }
 0x463   : > { %v2233_v57 = vpop.f32.mrf.mxu1  ;;  %v2292_v4 = vpop.f32.mrf.mxu0 }
 0x464   : > { %v2299_v12 = vadd.f32 %v2292_v4, %v2236_v0 }
 0x465   : > { %v2234_v58 = vpop.f32.mrf.mxu1  ;;  %v2294_v59 = vpop.f32.mrf.mxu0 }
 0x466   : > { %v2300_v2 = vadd.f32 %v2294_v59, %v2237_v5 }
 0x467   : > { %v2296_v45 = vpop.f32.mrf.mxu0  ;;  %v2347_v46 = vpop.f32.mrf.mxu1 }
 0x468   : > { %v2354_v53 = vadd.f32 %v2347_v46, %v2299_v12 }
 0x469   : > { %v2297_v60 = vpop.f32.mrf.mxu0  ;;  %v2349_v41 = vpop.f32.mrf.mxu1 }
 0x46a   : > { %v2355_v23 = vadd.f32 %v2349_v41, %v2300_v2 }
 0x46b   : > { %v2351_v42 = vpop.f32.mrf.mxu1  ;;  %v2410_v24 = vpop.f32.mrf.mxu0 }
 0x46c   : > { %v2417_v6 = vadd.f32 %v2410_v24, %v2354_v53 }
 0x46d   : > { %v2352_v1 = vpop.f32.mrf.mxu1  ;;  %v2412_v3 = vpop.f32.mrf.mxu0 }
 0x46e   : > { %v2418_v26 = vadd.f32 %v2412_v3, %v2355_v23 }
 0x46f   : > { %v2414_v13 = vpop.f32.mrf.mxu0  ;;  %v2473_v8 = vpop.f32.mrf.mxu1 }
 0x470   : > { %v2480_v27 = vadd.f32 %v2473_v8, %v2417_v6 }
 0x471   : > { %v2415_v61 = vpop.f32.mrf.mxu0  ;;  %v2475_v20 = vpop.f32.mrf.mxu1 }
 0x472   : > { %v2481_v9 = vadd.f32 %v2475_v20, %v2418_v26 }
 0x473   : > { %v2477_v25 = vpop.f32.mrf.mxu1  ;;  %v2536_v14 = vpop.f32.mrf.mxu0 }
 0x474   : > { %v2543_v19 = vadd.f32 %v2536_v14, %v2480_v27 }
 0x475   : > { %v2478_v28 = vpop.f32.mrf.mxu1  ;;  %v2538_v29 = vpop.f32.mrf.mxu0 }
 0x476   : > { %v2544_v35 = vadd.f32 %v2538_v29, %v2481_v9 }
 0x477   : > { %v2599_v32 = vpop.f32.mrf.mxu1  ;;  %v2540_v33 = vpop.f32.mrf.mxu0 }
 0x478   : > { %v2606_v36 = vadd.f32 %v2599_v32, %v2543_v19 }
 0x479   : > { %v2601_v37 = vpop.f32.mrf.mxu1  ;;  %v2541_v38 = vpop.f32.mrf.mxu0 }
 0x47a   : > { %v2608_v30 = vadd.f32 %v2783_v31, %v2606_v36  ;;  %v2607_v34 = vadd.f32 %v2601_v37, %v2544_v35 }
 0x47b   : > { %v2603_v39 = vpop.f32.mrf.mxu1 }
 0x47c   : > { %2837 = vst [vmem:[%s3666_s13 + $0x10] sm:$0xff] %v2608_v30  ;;  %v2609_v11 = vadd.f32 %v2784_v10, %v2607_v34 }
 0x47d   : > { %v2604_v16 = vpop.f32.mrf.mxu1 }
 0x47e   : > { %2838 = vst [vmem:[%s3666_s13 + $0x18] sm:$0xff] %v2609_v11 }
 0x47f   : > { %2952 = shalt.err (!%p2949_p0)
}
 0x480   : > { %s2953_s17 = scalar_lea.hbm %s3827_s16, 512  ;;  %s2957_s6 = scalar_lea.hbm %s3878_s5, 1024 }
 0x481   : > { %p2954_p1 = scmp.ne.s32.totalorder %s3827_s16, %s2953_s17  ;;  %p2958_p4 = scmp.lt.s32.totalorder %s3827_s16, %s3878_s5 }
 0x482   : > { %p2959_p7 = scmp.lt.s32.totalorder %s2957_s6, %s2953_s17 }
 0x483   : > { %p2955_p2 = pnand %p2954_p1, %p3087_p5 }
 0x484   : > { %p2960_p8 = por %p2959_p7, %p2958_p4 }
 0x485   : > { %p2956_p3 = pneg %p2955_p2 }
 0x487   : > { %p2961_p6 = pnand %p2960_p8, %p2956_p3 }
 0x489   : > { %2964 = shalt.err (!%p2961_p6)
}
 0x48a   : > { %s3018_s14 = smov 256  }
 0x48b   : > { %2853 = dma.vmem_to_hbm [thread:$0]  (%p3087_p5), %s3821_s9, 512, %s3827_s16, %s3832_s10, %s3018_s14, %s3018_s14, %s3009_s25  }
 0x48c PF: > { %p2865_p9 = scmp.ge.s32.totalorder %s3003_s21, 2  ;;  %s2643_s12 = sand.u32 1, %s2991_s18  }
 0x48d   : > { %p3884_p10 = scmp.ne.s32.totalorder %s3881_s29, 0  ;;  %s2644_s15 = scalar_lea.sflag [#allocation4], %s2643_s12 }
 0x48f   : > { %p2860_p11 = pnand %p2865_p9, %p3884_p10 }
 0x491   : > { %p2861_p12 = pneg %p2860_p11 }
 0x493   : > { %2986 = dma.done.wait (%p2861_p12), %s2644_s15, 512  }
 0x494   : > { %2988 = vsyncadd (%p2861_p12), %s2644_s15, 4294966784  ;;  %p16_p13 = scmp.ge.s32.totalorder %s3074_s24, 4   ;;  %s3885_s18 = smov %s2995_s19 }
 0x495   : > { %s3886_s19 = smov %s2999_s20  ;;  %s3887_s20 = smov %s3085_s27 }
 0x496   : > { %s3888_s21 = smov %s3074_s24  ;;  %18 = sbr.rel (!%p16_p13) target bundleno = 4 (0x4), region = 102 }
 0x49b   :  { %2649 = vsyncpa [#allocation3], 1 }
 0x49c   :  { %2651 = vsyncpa [#allocation3 + $0x1], 1 }
 0x49d   :  { %2652 = vsyncpa [#allocation4], 1 }
 0x49e   :  { %2654 = vsyncpa [#allocation4 + $0x1], 1 }

</bundles_post_ra>
